<compile_context>
chip_gen: v6e
topology: v6e:2x2x1
jax: 0.10.0
libtpu: 0.0.40
codegen_flags: <defaults>
</compile_context>

<pallas_src>
import jax
import jax.numpy as jnp
from jax import lax
from jax.experimental import pallas as pl
from jax.experimental.pallas import tpu as pltpu

EPS = 1e-5
F32 = jnp.float32
BF16 = jnp.bfloat16


def _pick_row_tile(Ho, Wo, stride, row_tile=None):
    """Output-row tile T: divides Ho and keeps the flattened (D, T*Wo) output block
    an unmasked multiple of 128 lanes (or the full map)."""
    valid = [T for T in range(1, Ho + 1)
             if Ho % T == 0 and (T == Ho or (T * Wo) % 128 == 0)]
    if row_tile is not None:
        if row_tile not in valid:
            raise ValueError(f"row_tile={row_tile} not in valid tiles {valid}")
        return row_tile
    capped = [T for T in valid if T * stride <= 64]
    return max(capped) if capped else min(valid)


def _full_spec(shape):
    n = len(shape)
    return pl.BlockSpec(shape, lambda b, t, _n=n: (0,) * _n)


def _make_kernel(H, W, Cin, D, Ho, Wo, stride, T, nt, has_conv_shortcut):
    """One grid step == one (batch, output-row-tile). All work in VMEM."""
    Ri = (T - 1) * stride + 5          # padded-input rows needed per tile
    Rm = (T - 1) * stride + 3          # padded-mid rows needed per tile
    n_bot_in = max(0, (Ho - 1) * stride + 3 - H)    # bottom pad rows (last tile)
    n_bot_mid = max(0, (Ho - 1) * stride + 2 - H)
    Mo = T * Wo

    def mid_tap(ref, kh, kw):
        if stride == 1:
            return ref[pl.ds(kh, T), pl.ds(kw, Wo), :]
        return ref[pl.ds(kh, T, stride=stride), pl.ds(kw, Wo, stride=stride), :]

    def kernel(*refs):
        it = iter(refs)
        xpad_ref = next(it)
        bn1s_ref = next(it)
        bn1b_ref = next(it)
        w1_ref = next(it)
        alpha_ref = next(it)
        w2t_ref = next(it)
        bn2s_ref = next(it)
        bn2b_ref = next(it)
        xsc_ref = next(it) if stride > 1 else None
        if has_conv_shortcut:
            wst_ref = next(it)
            bnss_ref = next(it)
            bnsb_ref = next(it)
        out_ref = next(it)
        pad_in = next(it)
        pad_mid = next(it)

        t = pl.program_id(1)
        row0 = t * (T * stride)                       # tile's first padded-x row
        if (T * stride) % 8 == 0:
            row0 = pl.multiple_of(row0, 8)

        # ---------------- BN1 into the tile's padded-input scratch ----------------
        xin = xpad_ref[:, pl.ds(row0, Ri), :, :].reshape(Ri, W + 2, Cin)
        pad_in[...] = xin * bn1s_ref[0] + bn1b_ref[0]
        # conv1 zero padding: xpad's zero pad rows/cols picked up the BN bias, re-zero.
        zc_in = jnp.zeros((Ri, 1, Cin), F32)
        pad_in[:, pl.ds(0, 1), :] = zc_in
        pad_in[:, pl.ds(W + 1, 1), :] = zc_in

        @pl.when(t == 0)
        def _():
            pad_in[pl.ds(0, 2), :, :] = jnp.zeros((2, W + 2, Cin), F32)

        if n_bot_in:
            @pl.when(t == nt - 1)
            def _():
                pad_in[pl.ds(Ri - n_bot_in, n_bot_in), :, :] = jnp.zeros(
                    (n_bot_in, W + 2, Cin), F32)

        # -------- conv1: 3x3, stride 1, pad 1 -> 9 per-tap MXU matmuls (f32 acc) --------
        acc1 = None
        for kk in range(9):
            kh, kw = kk // 3, kk % 3
            tap = pad_in[pl.ds(kh, Rm), pl.ds(kw, W), :].reshape(Rm * W, Cin)
            part = jnp.dot(tap.astype(BF16), w1_ref[kk],
                           preferred_element_type=F32)          # (Rm*W, D)
            acc1 = part if acc1 is None else acc1 + part

        # PReLU (per-channel slope), into the padded-mid scratch
        o1 = jnp.where(acc1 > 0, acc1, acc1 * alpha_ref[0])
        pad_mid[:, pl.ds(1, W), :] = o1.reshape(Rm, W, D)
        zc_mid = jnp.zeros((Rm, 1, D), F32)
        pad_mid[:, pl.ds(0, 1), :] = zc_mid
        pad_mid[:, pl.ds(W + 1, 1), :] = zc_mid

        @pl.when(t == 0)
        def _():
            pad_mid[pl.ds(0, 1), :, :] = jnp.zeros((1, W + 2, D), F32)

        if n_bot_mid:
            @pl.when(t == nt - 1)
            def _():
                pad_mid[pl.ds(Rm - n_bot_mid, n_bot_mid), :, :] = jnp.zeros(
                    (n_bot_mid, W + 2, D), F32)

        # -------- conv2: 3x3, stride s, pad 1 -> 9 per-tap transposed-output matmuls --------
        acc2 = None
        for kk in range(9):
            kh, kw = kk // 3, kk % 3
            tap = mid_tap(pad_mid, kh, kw).reshape(Mo, D)
            part = lax.dot_general(w2t_ref[kk], tap.astype(BF16),
                                   dimension_numbers=(((1,), (1,)), ((), ())),
                                   preferred_element_type=F32)  # (D, Mo) channel-major
            acc2 = part if acc2 is None else acc2 + part
        res_t = acc2 * bn2s_ref[...] + bn2b_ref[...]            # BN2 affine

        # ---------------- shortcut branch ----------------
        if stride == 1:
            xs = xpad_ref[:, pl.ds(row0 + 2, T), pl.ds(1, W), :].reshape(Mo, Cin)
        else:
            xs = xsc_ref[...].reshape(Mo, Cin)                  # pre-strided in wrapper

        if has_conv_shortcut:
            sc_t = lax.dot_general(wst_ref[...], xs.astype(BF16),
                                   dimension_numbers=(((1,), (1,)), ((), ())),
                                   preferred_element_type=F32)  # (D, Mo)
            sc_t = sc_t * bnss_ref[...] + bnsb_ref[...]
        else:
            sc_t = jnp.transpose(xs)                            # exact f32, XLU transpose

        out_ref[0] = (res_t + sc_t).astype(out_ref.dtype)       # (D, T*Wo)

    return kernel


def bottleneck_ir_forward(x_nchw, params, stride, row_tile=None):
    N, Cin, H, W = x_nchw.shape
    D = params["w1"].shape[-1]
    has_conv_shortcut = Cin != D
    Ho = (H - 1) // stride + 1
    Wo = (W - 1) // stride + 1
    T = _pick_row_tile(Ho, Wo, stride, row_tile)
    nt = Ho // T
    Ri = (T - 1) * stride + 5
    Rm = (T - 1) * stride + 3

    x = jnp.transpose(x_nchw, (0, 2, 3, 1)).astype(F32)          # NHWC
    # 2-row / 1-col zero pad: conv1's 1-px pad plus one extra halo row so every
    # per-tile slab read (incl. the to-be-zeroed mid-border rows) is in-bounds.
    xpad = jnp.pad(x, ((0, 0), (2, 2), (1, 1), (0, 0)))

    def fold_bn(gamma, beta, mean, var, shape):
        s = (gamma / jnp.sqrt(var + EPS)).astype(F32)
        b = (beta - mean * s).astype(F32)
        return s.reshape(shape), b.reshape(shape)

    bn1s, bn1b = fold_bn(params["gamma1"], params["beta1"],
                         params["mean1"], params["var1"], (1, Cin))
    bn2s, bn2b = fold_bn(params["gamma2"], params["beta2"],
                         params["mean2"], params["var2"], (D, 1))

    w1 = params["w1"].reshape(9, Cin, D).astype(BF16)                       # per-tap (Cin, D)
    w2t = jnp.transpose(params["w2"].reshape(9, D, D), (0, 2, 1)).astype(BF16)  # per-tap (Dout, Din)
    alpha = params["alpha"].reshape(1, D).astype(F32)

    inputs = [xpad, bn1s, bn1b, w1, alpha, w2t, bn2s, bn2b]
    in_specs = [
        pl.BlockSpec((1, H + 4, W + 2, Cin), lambda b, t: (b, 0, 0, 0)),
        _full_spec((1, Cin)), _full_spec((1, Cin)),
        _full_spec((9, Cin, D)), _full_spec((1, D)), _full_spec((9, D, D)),
        _full_spec((D, 1)), _full_spec((D, 1)),
    ]
    if stride > 1:
        x_sc = x[:, ::stride, ::stride, :]
        x_sc = x_sc.astype(BF16 if has_conv_shortcut else F32)
        inputs.append(x_sc)
        in_specs.append(pl.BlockSpec((1, T, Wo, Cin), lambda b, t: (b, t, 0, 0)))
    if has_conv_shortcut:
        bnss, bnsb = fold_bn(params["gammas"], params["betas"],
                             params["means"], params["vars"], (D, 1))
        inputs += [params["ws"].T.astype(BF16), bnss, bnsb]
        in_specs += [_full_spec((D, Cin)), _full_spec((D, 1)), _full_spec((D, 1))]

    kernel = _make_kernel(H, W, Cin, D, Ho, Wo, stride, T, nt, has_conv_shortcut)

    out = pl.pallas_call(
        kernel,
        out_shape=jax.ShapeDtypeStruct((N, D, Ho * Wo), F32),
        grid_spec=pltpu.PrefetchScalarGridSpec(
            num_scalar_prefetch=0,
            grid=(N, nt),
            in_specs=in_specs,
            out_specs=pl.BlockSpec((1, D, T * Wo), lambda b, t: (b, 0, t)),
            scratch_shapes=[pltpu.VMEM((Ri, W + 2, Cin), F32),
                            pltpu.VMEM((Rm, W + 2, D), F32)],
        ),
        compiler_params=pltpu.CompilerParams(
            dimension_semantics=("parallel", "parallel"),
            vmem_limit_bytes=64 * 1024 * 1024),
    )(*inputs)

    # already channel-major (NCHW) -- just split the flattened spatial dim
    return out.reshape(N, D, Ho, Wo)


def init_params(key, Cin, D):
    ks = jax.random.split(key, 16)
    p = {
        "w1": 0.1 * jax.random.normal(ks[0], (3, 3, Cin, D), F32),
        "w2": 0.1 * jax.random.normal(ks[1], (3, 3, D, D), F32),
        "alpha": jnp.full((D,), 0.25, F32) + 0.05 * jax.random.normal(ks[2], (D,), F32),
        "gamma1": 1.0 + 0.1 * jax.random.normal(ks[3], (Cin,), F32),
        "beta1": 0.1 * jax.random.normal(ks[4], (Cin,), F32),
        "mean1": 0.1 * jax.random.normal(ks[5], (Cin,), F32),
        "var1": jax.random.uniform(ks[6], (Cin,), F32, 0.5, 1.5),
        "gamma2": 1.0 + 0.1 * jax.random.normal(ks[7], (D,), F32),
        "beta2": 0.1 * jax.random.normal(ks[8], (D,), F32),
        "mean2": 0.1 * jax.random.normal(ks[9], (D,), F32),
        "var2": jax.random.uniform(ks[10], (D,), F32, 0.5, 1.5),
    }
    if Cin != D:
        p["ws"] = 0.1 * jax.random.normal(ks[11], (Cin, D), F32)
        p["gammas"] = 1.0 + 0.1 * jax.random.normal(ks[12], (D,), F32)
        p["betas"] = 0.1 * jax.random.normal(ks[13], (D,), F32)
        p["means"] = 0.1 * jax.random.normal(ks[14], (D,), F32)
        p["vars"] = jax.random.uniform(ks[15], (D,), F32, 0.5, 1.5)
    return p


def reference_forward(x_nchw, params, stride):
    """Pure-JAX reference with matching numerics (eval-mode BN, bf16-in / f32-acc convs)."""
    x = jnp.transpose(x_nchw, (0, 2, 3, 1)).astype(F32)
    Cin, D = x.shape[-1], params["w1"].shape[-1]
    dn = ("NHWC", "HWIO", "NHWC")
    bn = lambda v, g, b, m, var: (v - m) / jnp.sqrt(var + EPS) * g + b

    h = bn(x, params["gamma1"], params["beta1"], params["mean1"], params["var1"])
    h = lax.conv_general_dilated(h.astype(BF16), params["w1"].astype(BF16),
                                 (1, 1), ((1, 1), (1, 1)), dimension_numbers=dn,
                                 preferred_element_type=F32)
    h = jnp.where(h > 0, h, h * params["alpha"])
    h = lax.conv_general_dilated(h.astype(BF16), params["w2"].astype(BF16),
                                 (stride, stride), ((1, 1), (1, 1)),
                                 dimension_numbers=dn, preferred_element_type=F32)
    res = bn(h, params["gamma2"], params["beta2"], params["mean2"], params["var2"])

    if Cin != D:
        sc = lax.conv_general_dilated(x.astype(BF16),
                                      params["ws"].astype(BF16)[None, None],
                                      (stride, stride), ((0, 0), (0, 0)),
                                      dimension_numbers=dn,
                                      preferred_element_type=F32)
        sc = bn(sc, params["gammas"], params["betas"], params["means"], params["vars"])
    else:
        sc = x[:, ::stride, ::stride, :]
    return jnp.transpose(res + sc, (0, 3, 1, 2))


if __name__ == "__main__":
    key = jax.random.PRNGKey(0)
    k_x1, k_p1, k_x2, k_p2 = jax.random.split(key, 4)

    # Config 1: in_channel != depth -> Conv1x1+BN shortcut, stride 2 (single row tile).
    N, Cin, H, W, D, stride = 2, 4, 16, 16, 8, 2
    x1 = jax.random.normal(k_x1, (N, Cin, H, W), F32)
    p1 = init_params(k_p1, Cin, D)
    out1 = jax.block_until_ready(bottleneck_ir_forward(x1, p1, stride))
    ref1 = reference_forward(x1, p1, stride)
    assert out1.shape == (N, D, (H - 1) // stride + 1, (W - 1) // stride + 1)
    assert jnp.allclose(out1, ref1, atol=2e-2, rtol=2e-2), \
        float(jnp.max(jnp.abs(out1 - ref1)))

    # Config 2: in_channel == depth -> MaxPool2d(1, stride) shortcut, stride 1.
    # row_tile=8 exercises the multi-tile halo path (2 row tiles of 8 output rows).
    Cin2 = D2 = 8
    stride2 = 1
    x2 = jax.random.normal(k_x2, (N, Cin2, H, W), F32)
    p2 = init_params(k_p2, Cin2, D2)
    out2 = jax.block_until_ready(bottleneck_ir_forward(x2, p2, stride2, row_tile=8))
    ref2 = reference_forward(x2, p2, stride2)
    assert out2.shape == (N, D2, H, W)
    assert jnp.allclose(out2, ref2, atol=2e-2, rtol=2e-2), \
        float(jnp.max(jnp.abs(out2 - ref2)))

    print("KERNEL_OK")
</pallas_src>

<mosaic_0001>
module attributes {stable_mosaic.version = 11 : i64} {
  func.func @kernel(%arg0: i32, %arg1: i32, %arg2: memref<1x20x18x4xf32, #tpu.memory_space<vmem>>, %arg3: memref<1x4xf32, #tpu.memory_space<vmem>>, %arg4: memref<1x4xf32, #tpu.memory_space<vmem>>, %arg5: memref<9x4x8xbf16, #tpu.memory_space<vmem>>, %arg6: memref<1x8xf32, #tpu.memory_space<vmem>>, %arg7: memref<9x8x8xbf16, #tpu.memory_space<vmem>>, %arg8: memref<8x1xf32, #tpu.memory_space<vmem>>, %arg9: memref<8x1xf32, #tpu.memory_space<vmem>>, %arg10: memref<1x8x8x4xbf16, #tpu.memory_space<vmem>>, %arg11: memref<8x4xbf16, #tpu.memory_space<vmem>>, %arg12: memref<8x1xf32, #tpu.memory_space<vmem>>, %arg13: memref<8x1xf32, #tpu.memory_space<vmem>>, %arg14: memref<1x8x64xf32, #tpu.memory_space<vmem>>, %arg15: memref<19x18x4xf32, #tpu.memory_space<vmem>>, %arg16: memref<17x18x8xf32, #tpu.memory_space<vmem>>) attributes {dimension_semantics = [#tpu.dimension_semantics<parallel>, #tpu.dimension_semantics<parallel>], iteration_bounds = array<i64: 2, 1>, scalar_prefetch = 0 : i64, scratch_operands = 2 : i64, tpu.core_type = #tpu.core_type<tc>, window_params = [{transform_indices = @transform_0, window_bounds = array<i64: 1, 20, 18, 4>}, {pipeline_mode = #tpu.pipeline_mode<synchronous>, transform_indices = @transform_1, window_bounds = array<i64: 1, 4>}, {pipeline_mode = #tpu.pipeline_mode<synchronous>, transform_indices = @transform_2, window_bounds = array<i64: 1, 4>}, {pipeline_mode = #tpu.pipeline_mode<synchronous>, transform_indices = @transform_3, window_bounds = array<i64: 9, 4, 8>}, {pipeline_mode = #tpu.pipeline_mode<synchronous>, transform_indices = @transform_4, window_bounds = array<i64: 1, 8>}, {pipeline_mode = #tpu.pipeline_mode<synchronous>, transform_indices = @transform_5, window_bounds = array<i64: 9, 8, 8>}, {pipeline_mode = #tpu.pipeline_mode<synchronous>, transform_indices = @transform_6, window_bounds = array<i64: 8, 1>}, {pipeline_mode = #tpu.pipeline_mode<synchronous>, transform_indices = @transform_7, window_bounds = array<i64: 8, 1>}, {transform_indices = @transform_8, window_bounds = array<i64: 1, 8, 8, 4>}, {pipeline_mode = #tpu.pipeline_mode<synchronous>, transform_indices = @transform_9, window_bounds = array<i64: 8, 4>}, {pipeline_mode = #tpu.pipeline_mode<synchronous>, transform_indices = @transform_10, window_bounds = array<i64: 8, 1>}, {pipeline_mode = #tpu.pipeline_mode<synchronous>, transform_indices = @transform_11, window_bounds = array<i64: 8, 1>}, {transform_indices = @transform_12, window_bounds = array<i64: 1, 8, 64>}]} {
    %c16_i32 = arith.constant 16 : i32
    %0 = arith.muli %arg1, %c16_i32 : i32
    %1 = tpu.assume_multiple %0, 8 : i32
    %c0 = arith.constant 0 : index
    %2 = arith.index_cast %1 : i32 to index
    %c0_0 = arith.constant 0 : index
    %c0_1 = arith.constant 0 : index
    %3 = vector.load %arg2[%c0, %2, %c0_0, %c0_1] : memref<1x20x18x4xf32, #tpu.memory_space<vmem>>, vector<1x19x18x4xf32>
    %4 = vector.shape_cast %3 : vector<1x19x18x4xf32> to vector<19x18x4xf32>
    %c0_2 = arith.constant 0 : index
    %c0_3 = arith.constant 0 : index
    %5 = vector.load %arg3[%c0_2, %c0_3] : memref<1x4xf32, #tpu.memory_space<vmem>>, vector<1x4xf32>
    %6 = vector.shape_cast %5 : vector<1x4xf32> to vector<4xf32>
    %7 = vector.shape_cast %6 : vector<4xf32> to vector<1x1x4xf32>
    %8 = vector.broadcast %7 : vector<1x1x4xf32> to vector<19x18x4xf32>
    %9 = arith.mulf %4, %8 : vector<19x18x4xf32>
    %c0_4 = arith.constant 0 : index
    %c0_5 = arith.constant 0 : index
    %10 = vector.load %arg4[%c0_4, %c0_5] : memref<1x4xf32, #tpu.memory_space<vmem>>, vector<1x4xf32>
    %11 = vector.shape_cast %10 : vector<1x4xf32> to vector<4xf32>
    %12 = vector.shape_cast %11 : vector<4xf32> to vector<1x1x4xf32>
    %13 = vector.broadcast %12 : vector<1x1x4xf32> to vector<19x18x4xf32>
    %14 = arith.addf %9, %13 : vector<19x18x4xf32>
    %c0_6 = arith.constant 0 : index
    %c0_7 = arith.constant 0 : index
    %c0_8 = arith.constant 0 : index
    %15 = vector.load %arg15[%c0_6, %c0_7, %c0_8] : memref<19x18x4xf32, #tpu.memory_space<vmem>>, vector<19x18x4xf32>
    tpu.vector_store %arg15[%c0_6, %c0_7, %c0_8], %14 {strides = array<i32>} : memref<19x18x4xf32, #tpu.memory_space<vmem>>, vector<19x18x4xf32>,
    %cst = arith.constant 0.000000e+00 : f32
    %16 = vector.broadcast %cst : f32 to vector<19x1x4xf32>
    %c0_9 = arith.constant 0 : index
    %c0_10 = arith.constant 0 : index
    %c0_11 = arith.constant 0 : index
    %17 = vector.load %arg15[%c0_9, %c0_10, %c0_11] : memref<19x18x4xf32, #tpu.memory_space<vmem>>, vector<19x1x4xf32>
    tpu.vector_store %arg15[%c0_9, %c0_10, %c0_11], %16 {strides = array<i32>} : memref<19x18x4xf32, #tpu.memory_space<vmem>>, vector<19x1x4xf32>,
    %c0_12 = arith.constant 0 : index
    %c17 = arith.constant 17 : index
    %c0_13 = arith.constant 0 : index
    %18 = vector.load %arg15[%c0_12, %c17, %c0_13] : memref<19x18x4xf32, #tpu.memory_space<vmem>>, vector<19x1x4xf32>
    tpu.vector_store %arg15[%c0_12, %c17, %c0_13], %16 {strides = array<i32>} : memref<19x18x4xf32, #tpu.memory_space<vmem>>, vector<19x1x4xf32>,
    %c0_i32 = arith.constant 0 : i32
    %19 = arith.cmpi eq, %arg1, %c0_i32 : i32
    %20 = arith.extui %19 : i1 to i32
    %c0_i32_14 = arith.constant 0 : i32
    %21 = arith.cmpi ne, %20, %c0_i32_14 : i32
    scf.if %21 {
      %cst_168 = arith.constant 0.000000e+00 : f32
      %185 = vector.broadcast %cst_168 : f32 to vector<2x18x4xf32>
      %c0_169 = arith.constant 0 : index
      %c0_170 = arith.constant 0 : index
      %c0_171 = arith.constant 0 : index
      %186 = vector.load %arg15[%c0_169, %c0_170, %c0_171] : memref<19x18x4xf32, #tpu.memory_space<vmem>>, vector<2x18x4xf32>
      tpu.vector_store %arg15[%c0_169, %c0_170, %c0_171], %185 {strides = array<i32>} : memref<19x18x4xf32, #tpu.memory_space<vmem>>, vector<2x18x4xf32>,
    } else {
    }
    %c0_i32_15 = arith.constant 0 : i32
    %22 = arith.cmpi eq, %arg1, %c0_i32_15 : i32
    %23 = arith.extui %22 : i1 to i32
    %c0_i32_16 = arith.constant 0 : i32
    %24 = arith.cmpi ne, %23, %c0_i32_16 : i32
    scf.if %24 {
      %cst_168 = arith.constant 0.000000e+00 : f32
      %185 = vector.broadcast %cst_168 : f32 to vector<1x18x4xf32>
      %c18 = arith.constant 18 : index
      %c0_169 = arith.constant 0 : index
      %c0_170 = arith.constant 0 : index
      %186 = vector.load %arg15[%c18, %c0_169, %c0_170] : memref<19x18x4xf32, #tpu.memory_space<vmem>>, vector<1x18x4xf32>
      tpu.vector_store %arg15[%c18, %c0_169, %c0_170], %185 {strides = array<i32>} : memref<19x18x4xf32, #tpu.memory_space<vmem>>, vector<1x18x4xf32>,
    } else {
    }
    %c0_17 = arith.constant 0 : index
    %c0_18 = arith.constant 0 : index
    %c0_19 = arith.constant 0 : index
    %25 = vector.load %arg15[%c0_17, %c0_18, %c0_19] : memref<19x18x4xf32, #tpu.memory_space<vmem>>, vector<17x16x4xf32>
    %26 = vector.shape_cast %25 : vector<17x16x4xf32> to vector<272x4xf32>
    %27 = arith.truncf %26 : vector<272x4xf32> to vector<272x4xbf16>
    %c0_20 = arith.constant 0 : index
    %c0_21 = arith.constant 0 : index
    %c0_22 = arith.constant 0 : index
    %28 = vector.load %arg5[%c0_20, %c0_21, %c0_22] : memref<9x4x8xbf16, #tpu.memory_space<vmem>>, vector<1x4x8xbf16>
    %29 = vector.shape_cast %28 : vector<1x4x8xbf16> to vector<4x8xbf16>
    %cst_23 = arith.constant dense<0.000000e+00> : vector<272x8xf32>
    %30 = tpu.matmul %27, %29, %cst_23 {dimension_numbers = #tpu.dot_dimension_numbers<[1], [0], [0], [1], [0, 0, 1, 1], [], []>} : vector<272x4xbf16>, vector<4x8xbf16>, vector<272x8xf32> -> vector<272x8xf32>
    %c0_24 = arith.constant 0 : index
    %c1 = arith.constant 1 : index
    %c0_25 = arith.constant 0 : index
    %31 = vector.load %arg15[%c0_24, %c1, %c0_25] : memref<19x18x4xf32, #tpu.memory_space<vmem>>, vector<17x16x4xf32>
    %32 = vector.shape_cast %31 : vector<17x16x4xf32> to vector<272x4xf32>
    %33 = arith.truncf %32 : vector<272x4xf32> to vector<272x4xbf16>
    %c1_26 = arith.constant 1 : index
    %c0_27 = arith.constant 0 : index
    %c0_28 = arith.constant 0 : index
    %34 = vector.load %arg5[%c1_26, %c0_27, %c0_28] : memref<9x4x8xbf16, #tpu.memory_space<vmem>>, vector<1x4x8xbf16>
    %35 = vector.shape_cast %34 : vector<1x4x8xbf16> to vector<4x8xbf16>
    %cst_29 = arith.constant dense<0.000000e+00> : vector<272x8xf32>
    %36 = tpu.matmul %33, %35, %cst_29 {dimension_numbers = #tpu.dot_dimension_numbers<[1], [0], [0], [1], [0, 0, 1, 1], [], []>} : vector<272x4xbf16>, vector<4x8xbf16>, vector<272x8xf32> -> vector<272x8xf32>
    %37 = arith.addf %30, %36 : vector<272x8xf32>
    %c0_30 = arith.constant 0 : index
    %c2 = arith.constant 2 : index
    %c0_31 = arith.constant 0 : index
    %38 = vector.load %arg15[%c0_30, %c2, %c0_31] : memref<19x18x4xf32, #tpu.memory_space<vmem>>, vector<17x16x4xf32>
    %39 = vector.shape_cast %38 : vector<17x16x4xf32> to vector<272x4xf32>
    %40 = arith.truncf %39 : vector<272x4xf32> to vector<272x4xbf16>
    %c2_32 = arith.constant 2 : index
    %c0_33 = arith.constant 0 : index
    %c0_34 = arith.constant 0 : index
    %41 = vector.load %arg5[%c2_32, %c0_33, %c0_34] : memref<9x4x8xbf16, #tpu.memory_space<vmem>>, vector<1x4x8xbf16>
    %42 = vector.shape_cast %41 : vector<1x4x8xbf16> to vector<4x8xbf16>
    %cst_35 = arith.constant dense<0.000000e+00> : vector<272x8xf32>
    %43 = tpu.matmul %40, %42, %cst_35 {dimension_numbers = #tpu.dot_dimension_numbers<[1], [0], [0], [1], [0, 0, 1, 1], [], []>} : vector<272x4xbf16>, vector<4x8xbf16>, vector<272x8xf32> -> vector<272x8xf32>
    %44 = arith.addf %37, %43 : vector<272x8xf32>
    %c1_36 = arith.constant 1 : index
    %c0_37 = arith.constant 0 : index
    %c0_38 = arith.constant 0 : index
    %45 = vector.load %arg15[%c1_36, %c0_37, %c0_38] : memref<19x18x4xf32, #tpu.memory_space<vmem>>, vector<17x16x4xf32>
    %46 = vector.shape_cast %45 : vector<17x16x4xf32> to vector<272x4xf32>
    %47 = arith.truncf %46 : vector<272x4xf32> to vector<272x4xbf16>
    %c3 = arith.constant 3 : index
    %c0_39 = arith.constant 0 : index
    %c0_40 = arith.constant 0 : index
    %48 = vector.load %arg5[%c3, %c0_39, %c0_40] : memref<9x4x8xbf16, #tpu.memory_space<vmem>>, vector<1x4x8xbf16>
    %49 = vector.shape_cast %48 : vector<1x4x8xbf16> to vector<4x8xbf16>
    %cst_41 = arith.constant dense<0.000000e+00> : vector<272x8xf32>
    %50 = tpu.matmul %47, %49, %cst_41 {dimension_numbers = #tpu.dot_dimension_numbers<[1], [0], [0], [1], [0, 0, 1, 1], [], []>} : vector<272x4xbf16>, vector<4x8xbf16>, vector<272x8xf32> -> vector<272x8xf32>
    %51 = arith.addf %44, %50 : vector<272x8xf32>
    %c1_42 = arith.constant 1 : index
    %c1_43 = arith.constant 1 : index
    %c0_44 = arith.constant 0 : index
    %52 = vector.load %arg15[%c1_42, %c1_43, %c0_44] : memref<19x18x4xf32, #tpu.memory_space<vmem>>, vector<17x16x4xf32>
    %53 = vector.shape_cast %52 : vector<17x16x4xf32> to vector<272x4xf32>
    %54 = arith.truncf %53 : vector<272x4xf32> to vector<272x4xbf16>
    %c4 = arith.constant 4 : index
    %c0_45 = arith.constant 0 : index
    %c0_46 = arith.constant 0 : index
    %55 = vector.load %arg5[%c4, %c0_45, %c0_46] : memref<9x4x8xbf16, #tpu.memory_space<vmem>>, vector<1x4x8xbf16>
    %56 = vector.shape_cast %55 : vector<1x4x8xbf16> to vector<4x8xbf16>
    %cst_47 = arith.constant dense<0.000000e+00> : vector<272x8xf32>
    %57 = tpu.matmul %54, %56, %cst_47 {dimension_numbers = #tpu.dot_dimension_numbers<[1], [0], [0], [1], [0, 0, 1, 1], [], []>} : vector<272x4xbf16>, vector<4x8xbf16>, vector<272x8xf32> -> vector<272x8xf32>
    %58 = arith.addf %51, %57 : vector<272x8xf32>
    %c1_48 = arith.constant 1 : index
    %c2_49 = arith.constant 2 : index
    %c0_50 = arith.constant 0 : index
    %59 = vector.load %arg15[%c1_48, %c2_49, %c0_50] : memref<19x18x4xf32, #tpu.memory_space<vmem>>, vector<17x16x4xf32>
    %60 = vector.shape_cast %59 : vector<17x16x4xf32> to vector<272x4xf32>
    %61 = arith.truncf %60 : vector<272x4xf32> to vector<272x4xbf16>
    %c5 = arith.constant 5 : index
    %c0_51 = arith.constant 0 : index
    %c0_52 = arith.constant 0 : index
    %62 = vector.load %arg5[%c5, %c0_51, %c0_52] : memref<9x4x8xbf16, #tpu.memory_space<vmem>>, vector<1x4x8xbf16>
    %63 = vector.shape_cast %62 : vector<1x4x8xbf16> to vector<4x8xbf16>
    %cst_53 = arith.constant dense<0.000000e+00> : vector<272x8xf32>
    %64 = tpu.matmul %61, %63, %cst_53 {dimension_numbers = #tpu.dot_dimension_numbers<[1], [0], [0], [1], [0, 0, 1, 1], [], []>} : vector<272x4xbf16>, vector<4x8xbf16>, vector<272x8xf32> -> vector<272x8xf32>
    %65 = arith.addf %58, %64 : vector<272x8xf32>
    %c2_54 = arith.constant 2 : index
    %c0_55 = arith.constant 0 : index
    %c0_56 = arith.constant 0 : index
    %66 = vector.load %arg15[%c2_54, %c0_55, %c0_56] : memref<19x18x4xf32, #tpu.memory_space<vmem>>, vector<17x16x4xf32>
    %67 = vector.shape_cast %66 : vector<17x16x4xf32> to vector<272x4xf32>
    %68 = arith.truncf %67 : vector<272x4xf32> to vector<272x4xbf16>
    %c6 = arith.constant 6 : index
    %c0_57 = arith.constant 0 : index
    %c0_58 = arith.constant 0 : index
    %69 = vector.load %arg5[%c6, %c0_57, %c0_58] : memref<9x4x8xbf16, #tpu.memory_space<vmem>>, vector<1x4x8xbf16>
    %70 = vector.shape_cast %69 : vector<1x4x8xbf16> to vector<4x8xbf16>
    %cst_59 = arith.constant dense<0.000000e+00> : vector<272x8xf32>
    %71 = tpu.matmul %68, %70, %cst_59 {dimension_numbers = #tpu.dot_dimension_numbers<[1], [0], [0], [1], [0, 0, 1, 1], [], []>} : vector<272x4xbf16>, vector<4x8xbf16>, vector<272x8xf32> -> vector<272x8xf32>
    %72 = arith.addf %65, %71 : vector<272x8xf32>
    %c2_60 = arith.constant 2 : index
    %c1_61 = arith.constant 1 : index
    %c0_62 = arith.constant 0 : index
    %73 = vector.load %arg15[%c2_60, %c1_61, %c0_62] : memref<19x18x4xf32, #tpu.memory_space<vmem>>, vector<17x16x4xf32>
    %74 = vector.shape_cast %73 : vector<17x16x4xf32> to vector<272x4xf32>
    %75 = arith.truncf %74 : vector<272x4xf32> to vector<272x4xbf16>
    %c7 = arith.constant 7 : index
    %c0_63 = arith.constant 0 : index
    %c0_64 = arith.constant 0 : index
    %76 = vector.load %arg5[%c7, %c0_63, %c0_64] : memref<9x4x8xbf16, #tpu.memory_space<vmem>>, vector<1x4x8xbf16>
    %77 = vector.shape_cast %76 : vector<1x4x8xbf16> to vector<4x8xbf16>
    %cst_65 = arith.constant dense<0.000000e+00> : vector<272x8xf32>
    %78 = tpu.matmul %75, %77, %cst_65 {dimension_numbers = #tpu.dot_dimension_numbers<[1], [0], [0], [1], [0, 0, 1, 1], [], []>} : vector<272x4xbf16>, vector<4x8xbf16>, vector<272x8xf32> -> vector<272x8xf32>
    %79 = arith.addf %72, %78 : vector<272x8xf32>
    %c2_66 = arith.constant 2 : index
    %c2_67 = arith.constant 2 : index
    %c0_68 = arith.constant 0 : index
    %80 = vector.load %arg15[%c2_66, %c2_67, %c0_68] : memref<19x18x4xf32, #tpu.memory_space<vmem>>, vector<17x16x4xf32>
    %81 = vector.shape_cast %80 : vector<17x16x4xf32> to vector<272x4xf32>
    %82 = arith.truncf %81 : vector<272x4xf32> to vector<272x4xbf16>
    %c8 = arith.constant 8 : index
    %c0_69 = arith.constant 0 : index
    %c0_70 = arith.constant 0 : index
    %83 = vector.load %arg5[%c8, %c0_69, %c0_70] : memref<9x4x8xbf16, #tpu.memory_space<vmem>>, vector<1x4x8xbf16>
    %84 = vector.shape_cast %83 : vector<1x4x8xbf16> to vector<4x8xbf16>
    %cst_71 = arith.constant dense<0.000000e+00> : vector<272x8xf32>
    %85 = tpu.matmul %82, %84, %cst_71 {dimension_numbers = #tpu.dot_dimension_numbers<[1], [0], [0], [1], [0, 0, 1, 1], [], []>} : vector<272x4xbf16>, vector<4x8xbf16>, vector<272x8xf32> -> vector<272x8xf32>
    %86 = arith.addf %79, %85 : vector<272x8xf32>
    %cst_72 = arith.constant 0.000000e+00 : f32
    %87 = vector.broadcast %cst_72 : f32 to vector<272x8xf32>
    %88 = arith.cmpf ogt, %86, %87 : vector<272x8xf32>
    %c0_73 = arith.constant 0 : index
    %c0_74 = arith.constant 0 : index
    %89 = vector.load %arg6[%c0_73, %c0_74] : memref<1x8xf32, #tpu.memory_space<vmem>>, vector<1x8xf32>
    %90 = vector.shape_cast %89 : vector<1x8xf32> to vector<8xf32>
    %91 = vector.shape_cast %90 : vector<8xf32> to vector<1x8xf32>
    %92 = vector.broadcast %91 : vector<1x8xf32> to vector<272x8xf32>
    %93 = arith.mulf %86, %92 : vector<272x8xf32>
    %94 = arith.select %88, %86, %93 : vector<272x8xi1>, vector<272x8xf32>
    %95 = vector.shape_cast %94 : vector<272x8xf32> to vector<17x16x8xf32>
    %c0_75 = arith.constant 0 : index
    %c1_76 = arith.constant 1 : index
    %c0_77 = arith.constant 0 : index
    %96 = vector.load %arg16[%c0_75, %c1_76, %c0_77] : memref<17x18x8xf32, #tpu.memory_space<vmem>>, vector<17x16x8xf32>
    tpu.vector_store %arg16[%c0_75, %c1_76, %c0_77], %95 {strides = array<i32>} : memref<17x18x8xf32, #tpu.memory_space<vmem>>, vector<17x16x8xf32>,
    %cst_78 = arith.constant 0.000000e+00 : f32
    %97 = vector.broadcast %cst_78 : f32 to vector<17x1x8xf32>
    %c0_79 = arith.constant 0 : index
    %c0_80 = arith.constant 0 : index
    %c0_81 = arith.constant 0 : index
    %98 = vector.load %arg16[%c0_79, %c0_80, %c0_81] : memref<17x18x8xf32, #tpu.memory_space<vmem>>, vector<17x1x8xf32>
    tpu.vector_store %arg16[%c0_79, %c0_80, %c0_81], %97 {strides = array<i32>} : memref<17x18x8xf32, #tpu.memory_space<vmem>>, vector<17x1x8xf32>,
    %c0_82 = arith.constant 0 : index
    %c17_83 = arith.constant 17 : index
    %c0_84 = arith.constant 0 : index
    %99 = vector.load %arg16[%c0_82, %c17_83, %c0_84] : memref<17x18x8xf32, #tpu.memory_space<vmem>>, vector<17x1x8xf32>
    tpu.vector_store %arg16[%c0_82, %c17_83, %c0_84], %97 {strides = array<i32>} : memref<17x18x8xf32, #tpu.memory_space<vmem>>, vector<17x1x8xf32>,
    %c0_i32_85 = arith.constant 0 : i32
    %100 = arith.cmpi eq, %arg1, %c0_i32_85 : i32
    %101 = arith.extui %100 : i1 to i32
    %c0_i32_86 = arith.constant 0 : i32
    %102 = arith.cmpi ne, %101, %c0_i32_86 : i32
    scf.if %102 {
      %cst_168 = arith.constant 0.000000e+00 : f32
      %185 = vector.broadcast %cst_168 : f32 to vector<1x18x8xf32>
      %c0_169 = arith.constant 0 : index
      %c0_170 = arith.constant 0 : index
      %c0_171 = arith.constant 0 : index
      %186 = vector.load %arg16[%c0_169, %c0_170, %c0_171] : memref<17x18x8xf32, #tpu.memory_space<vmem>>, vector<1x18x8xf32>
      tpu.vector_store %arg16[%c0_169, %c0_170, %c0_171], %185 {strides = array<i32>} : memref<17x18x8xf32, #tpu.memory_space<vmem>>, vector<1x18x8xf32>,
    } else {
    }
    %c0_87 = arith.constant 0 : index
    %c0_88 = arith.constant 0 : index
    %c0_89 = arith.constant 0 : index
    %103 = tpu.strided_load %arg16[%c0_87, %c0_88, %c0_89] {strides = array<i32: 2, 2, 1>} : memref<17x18x8xf32, #tpu.memory_space<vmem>>, vector<8x8x8xf32>
    %104 = vector.shape_cast %103 : vector<8x8x8xf32> to vector<64x8xf32>
    %c0_90 = arith.constant 0 : index
    %c0_91 = arith.constant 0 : index
    %c0_92 = arith.constant 0 : index
    %105 = vector.load %arg7[%c0_90, %c0_91, %c0_92] : memref<9x8x8xbf16, #tpu.memory_space<vmem>>, vector<1x8x8xbf16>
    %106 = vector.shape_cast %105 : vector<1x8x8xbf16> to vector<8x8xbf16>
    %107 = arith.truncf %104 : vector<64x8xf32> to vector<64x8xbf16>
    %cst_93 = arith.constant dense<0.000000e+00> : vector<8x64xf32>
    %108 = tpu.matmul %106, %107, %cst_93 {dimension_numbers = #tpu.dot_dimension_numbers<[1], [1], [0], [0], [0, 0, 1, 0], [], []>} : vector<8x8xbf16>, vector<64x8xbf16>, vector<8x64xf32> -> vector<8x64xf32>
    %c0_94 = arith.constant 0 : index
    %c1_95 = arith.constant 1 : index
    %c0_96 = arith.constant 0 : index
    %109 = tpu.strided_load %arg16[%c0_94, %c1_95, %c0_96] {strides = array<i32: 2, 2, 1>} : memref<17x18x8xf32, #tpu.memory_space<vmem>>, vector<8x8x8xf32>
    %110 = vector.shape_cast %109 : vector<8x8x8xf32> to vector<64x8xf32>
    %c1_97 = arith.constant 1 : index
    %c0_98 = arith.constant 0 : index
    %c0_99 = arith.constant 0 : index
    %111 = vector.load %arg7[%c1_97, %c0_98, %c0_99] : memref<9x8x8xbf16, #tpu.memory_space<vmem>>, vector<1x8x8xbf16>
    %112 = vector.shape_cast %111 : vector<1x8x8xbf16> to vector<8x8xbf16>
    %113 = arith.truncf %110 : vector<64x8xf32> to vector<64x8xbf16>
    %cst_100 = arith.constant dense<0.000000e+00> : vector<8x64xf32>
    %114 = tpu.matmul %112, %113, %cst_100 {dimension_numbers = #tpu.dot_dimension_numbers<[1], [1], [0], [0], [0, 0, 1, 0], [], []>} : vector<8x8xbf16>, vector<64x8xbf16>, vector<8x64xf32> -> vector<8x64xf32>
    %115 = arith.addf %108, %114 : vector<8x64xf32>
    %c0_101 = arith.constant 0 : index
    %c2_102 = arith.constant 2 : index
    %c0_103 = arith.constant 0 : index
    %116 = tpu.strided_load %arg16[%c0_101, %c2_102, %c0_103] {strides = array<i32: 2, 2, 1>} : memref<17x18x8xf32, #tpu.memory_space<vmem>>, vector<8x8x8xf32>
    %117 = vector.shape_cast %116 : vector<8x8x8xf32> to vector<64x8xf32>
    %c2_104 = arith.constant 2 : index
    %c0_105 = arith.constant 0 : index
    %c0_106 = arith.constant 0 : index
    %118 = vector.load %arg7[%c2_104, %c0_105, %c0_106] : memref<9x8x8xbf16, #tpu.memory_space<vmem>>, vector<1x8x8xbf16>
    %119 = vector.shape_cast %118 : vector<1x8x8xbf16> to vector<8x8xbf16>
    %120 = arith.truncf %117 : vector<64x8xf32> to vector<64x8xbf16>
    %cst_107 = arith.constant dense<0.000000e+00> : vector<8x64xf32>
    %121 = tpu.matmul %119, %120, %cst_107 {dimension_numbers = #tpu.dot_dimension_numbers<[1], [1], [0], [0], [0, 0, 1, 0], [], []>} : vector<8x8xbf16>, vector<64x8xbf16>, vector<8x64xf32> -> vector<8x64xf32>
    %122 = arith.addf %115, %121 : vector<8x64xf32>
    %c1_108 = arith.constant 1 : index
    %c0_109 = arith.constant 0 : index
    %c0_110 = arith.constant 0 : index
    %123 = tpu.strided_load %arg16[%c1_108, %c0_109, %c0_110] {strides = array<i32: 2, 2, 1>} : memref<17x18x8xf32, #tpu.memory_space<vmem>>, vector<8x8x8xf32>
    %124 = vector.shape_cast %123 : vector<8x8x8xf32> to vector<64x8xf32>
    %c3_111 = arith.constant 3 : index
    %c0_112 = arith.constant 0 : index
    %c0_113 = arith.constant 0 : index
    %125 = vector.load %arg7[%c3_111, %c0_112, %c0_113] : memref<9x8x8xbf16, #tpu.memory_space<vmem>>, vector<1x8x8xbf16>
    %126 = vector.shape_cast %125 : vector<1x8x8xbf16> to vector<8x8xbf16>
    %127 = arith.truncf %124 : vector<64x8xf32> to vector<64x8xbf16>
    %cst_114 = arith.constant dense<0.000000e+00> : vector<8x64xf32>
    %128 = tpu.matmul %126, %127, %cst_114 {dimension_numbers = #tpu.dot_dimension_numbers<[1], [1], [0], [0], [0, 0, 1, 0], [], []>} : vector<8x8xbf16>, vector<64x8xbf16>, vector<8x64xf32> -> vector<8x64xf32>
    %129 = arith.addf %122, %128 : vector<8x64xf32>
    %c1_115 = arith.constant 1 : index
    %c1_116 = arith.constant 1 : index
    %c0_117 = arith.constant 0 : index
    %130 = tpu.strided_load %arg16[%c1_115, %c1_116, %c0_117] {strides = array<i32: 2, 2, 1>} : memref<17x18x8xf32, #tpu.memory_space<vmem>>, vector<8x8x8xf32>
    %131 = vector.shape_cast %130 : vector<8x8x8xf32> to vector<64x8xf32>
    %c4_118 = arith.constant 4 : index
    %c0_119 = arith.constant 0 : index
    %c0_120 = arith.constant 0 : index
    %132 = vector.load %arg7[%c4_118, %c0_119, %c0_120] : memref<9x8x8xbf16, #tpu.memory_space<vmem>>, vector<1x8x8xbf16>
    %133 = vector.shape_cast %132 : vector<1x8x8xbf16> to vector<8x8xbf16>
    %134 = arith.truncf %131 : vector<64x8xf32> to vector<64x8xbf16>
    %cst_121 = arith.constant dense<0.000000e+00> : vector<8x64xf32>
    %135 = tpu.matmul %133, %134, %cst_121 {dimension_numbers = #tpu.dot_dimension_numbers<[1], [1], [0], [0], [0, 0, 1, 0], [], []>} : vector<8x8xbf16>, vector<64x8xbf16>, vector<8x64xf32> -> vector<8x64xf32>
    %136 = arith.addf %129, %135 : vector<8x64xf32>
    %c1_122 = arith.constant 1 : index
    %c2_123 = arith.constant 2 : index
    %c0_124 = arith.constant 0 : index
    %137 = tpu.strided_load %arg16[%c1_122, %c2_123, %c0_124] {strides = array<i32: 2, 2, 1>} : memref<17x18x8xf32, #tpu.memory_space<vmem>>, vector<8x8x8xf32>
    %138 = vector.shape_cast %137 : vector<8x8x8xf32> to vector<64x8xf32>
    %c5_125 = arith.constant 5 : index
    %c0_126 = arith.constant 0 : index
    %c0_127 = arith.constant 0 : index
    %139 = vector.load %arg7[%c5_125, %c0_126, %c0_127] : memref<9x8x8xbf16, #tpu.memory_space<vmem>>, vector<1x8x8xbf16>
    %140 = vector.shape_cast %139 : vector<1x8x8xbf16> to vector<8x8xbf16>
    %141 = arith.truncf %138 : vector<64x8xf32> to vector<64x8xbf16>
    %cst_128 = arith.constant dense<0.000000e+00> : vector<8x64xf32>
    %142 = tpu.matmul %140, %141, %cst_128 {dimension_numbers = #tpu.dot_dimension_numbers<[1], [1], [0], [0], [0, 0, 1, 0], [], []>} : vector<8x8xbf16>, vector<64x8xbf16>, vector<8x64xf32> -> vector<8x64xf32>
    %143 = arith.addf %136, %142 : vector<8x64xf32>
    %c2_129 = arith.constant 2 : index
    %c0_130 = arith.constant 0 : index
    %c0_131 = arith.constant 0 : index
    %144 = tpu.strided_load %arg16[%c2_129, %c0_130, %c0_131] {strides = array<i32: 2, 2, 1>} : memref<17x18x8xf32, #tpu.memory_space<vmem>>, vector<8x8x8xf32>
    %145 = vector.shape_cast %144 : vector<8x8x8xf32> to vector<64x8xf32>
    %c6_132 = arith.constant 6 : index
    %c0_133 = arith.constant 0 : index
    %c0_134 = arith.constant 0 : index
    %146 = vector.load %arg7[%c6_132, %c0_133, %c0_134] : memref<9x8x8xbf16, #tpu.memory_space<vmem>>, vector<1x8x8xbf16>
    %147 = vector.shape_cast %146 : vector<1x8x8xbf16> to vector<8x8xbf16>
    %148 = arith.truncf %145 : vector<64x8xf32> to vector<64x8xbf16>
    %cst_135 = arith.constant dense<0.000000e+00> : vector<8x64xf32>
    %149 = tpu.matmul %147, %148, %cst_135 {dimension_numbers = #tpu.dot_dimension_numbers<[1], [1], [0], [0], [0, 0, 1, 0], [], []>} : vector<8x8xbf16>, vector<64x8xbf16>, vector<8x64xf32> -> vector<8x64xf32>
    %150 = arith.addf %143, %149 : vector<8x64xf32>
    %c2_136 = arith.constant 2 : index
    %c1_137 = arith.constant 1 : index
    %c0_138 = arith.constant 0 : index
    %151 = tpu.strided_load %arg16[%c2_136, %c1_137, %c0_138] {strides = array<i32: 2, 2, 1>} : memref<17x18x8xf32, #tpu.memory_space<vmem>>, vector<8x8x8xf32>
    %152 = vector.shape_cast %151 : vector<8x8x8xf32> to vector<64x8xf32>
    %c7_139 = arith.constant 7 : index
    %c0_140 = arith.constant 0 : index
    %c0_141 = arith.constant 0 : index
    %153 = vector.load %arg7[%c7_139, %c0_140, %c0_141] : memref<9x8x8xbf16, #tpu.memory_space<vmem>>, vector<1x8x8xbf16>
    %154 = vector.shape_cast %153 : vector<1x8x8xbf16> to vector<8x8xbf16>
    %155 = arith.truncf %152 : vector<64x8xf32> to vector<64x8xbf16>
    %cst_142 = arith.constant dense<0.000000e+00> : vector<8x64xf32>
    %156 = tpu.matmul %154, %155, %cst_142 {dimension_numbers = #tpu.dot_dimension_numbers<[1], [1], [0], [0], [0, 0, 1, 0], [], []>} : vector<8x8xbf16>, vector<64x8xbf16>, vector<8x64xf32> -> vector<8x64xf32>
    %157 = arith.addf %150, %156 : vector<8x64xf32>
    %c2_143 = arith.constant 2 : index
    %c2_144 = arith.constant 2 : index
    %c0_145 = arith.constant 0 : index
    %158 = tpu.strided_load %arg16[%c2_143, %c2_144, %c0_145] {strides = array<i32: 2, 2, 1>} : memref<17x18x8xf32, #tpu.memory_space<vmem>>, vector<8x8x8xf32>
    %159 = vector.shape_cast %158 : vector<8x8x8xf32> to vector<64x8xf32>
    %c8_146 = arith.constant 8 : index
    %c0_147 = arith.constant 0 : index
    %c0_148 = arith.constant 0 : index
    %160 = vector.load %arg7[%c8_146, %c0_147, %c0_148] : memref<9x8x8xbf16, #tpu.memory_space<vmem>>, vector<1x8x8xbf16>
    %161 = vector.shape_cast %160 : vector<1x8x8xbf16> to vector<8x8xbf16>
    %162 = arith.truncf %159 : vector<64x8xf32> to vector<64x8xbf16>
    %cst_149 = arith.constant dense<0.000000e+00> : vector<8x64xf32>
    %163 = tpu.matmul %161, %162, %cst_149 {dimension_numbers = #tpu.dot_dimension_numbers<[1], [1], [0], [0], [0, 0, 1, 0], [], []>} : vector<8x8xbf16>, vector<64x8xbf16>, vector<8x64xf32> -> vector<8x64xf32>
    %164 = arith.addf %157, %163 : vector<8x64xf32>
    %c0_150 = arith.constant 0 : index
    %c0_151 = arith.constant 0 : index
    %165 = vector.load %arg8[%c0_150, %c0_151] : memref<8x1xf32, #tpu.memory_space<vmem>>, vector<8x1xf32>
    %166 = vector.broadcast %165 : vector<8x1xf32> to vector<8x64xf32>
    %167 = arith.mulf %164, %166 : vector<8x64xf32>
    %c0_152 = arith.constant 0 : index
    %c0_153 = arith.constant 0 : index
    %168 = vector.load %arg9[%c0_152, %c0_153] : memref<8x1xf32, #tpu.memory_space<vmem>>, vector<8x1xf32>
    %169 = vector.broadcast %168 : vector<8x1xf32> to vector<8x64xf32>
    %170 = arith.addf %167, %169 : vector<8x64xf32>
    %c0_154 = arith.constant 0 : index
    %c0_155 = arith.constant 0 : index
    %c0_156 = arith.constant 0 : index
    %c0_157 = arith.constant 0 : index
    %171 = vector.load %arg10[%c0_154, %c0_155, %c0_156, %c0_157] : memref<1x8x8x4xbf16, #tpu.memory_space<vmem>>, vector<1x8x8x4xbf16>
    %172 = vector.shape_cast %171 : vector<1x8x8x4xbf16> to vector<64x4xbf16>
    %c0_158 = arith.constant 0 : index
    %c0_159 = arith.constant 0 : index
    %173 = vector.load %arg11[%c0_158, %c0_159] : memref<8x4xbf16, #tpu.memory_space<vmem>>, vector<8x4xbf16>
    %cst_160 = arith.constant dense<0.000000e+00> : vector<8x64xf32>
    %174 = tpu.matmul %173, %172, %cst_160 {dimension_numbers = #tpu.dot_dimension_numbers<[1], [1], [0], [0], [0, 0, 1, 0], [], []>} : vector<8x4xbf16>, vector<64x4xbf16>, vector<8x64xf32> -> vector<8x64xf32>
    %c0_161 = arith.constant 0 : index
    %c0_162 = arith.constant 0 : index
    %175 = vector.load %arg12[%c0_161, %c0_162] : memref<8x1xf32, #tpu.memory_space<vmem>>, vector<8x1xf32>
    %176 = vector.broadcast %175 : vector<8x1xf32> to vector<8x64xf32>
    %177 = arith.mulf %174, %176 : vector<8x64xf32>
    %c0_163 = arith.constant 0 : index
    %c0_164 = arith.constant 0 : index
    %178 = vector.load %arg13[%c0_163, %c0_164] : memref<8x1xf32, #tpu.memory_space<vmem>>, vector<8x1xf32>
    %179 = vector.broadcast %178 : vector<8x1xf32> to vector<8x64xf32>
    %180 = arith.addf %177, %179 : vector<8x64xf32>
    %181 = arith.addf %170, %180 : vector<8x64xf32>
    %c0_165 = arith.constant 0 : index
    %c0_166 = arith.constant 0 : index
    %c0_167 = arith.constant 0 : index
    %182 = vector.load %arg14[%c0_165, %c0_166, %c0_167] : memref<1x8x64xf32, #tpu.memory_space<vmem>>, vector<1x8x64xf32>
    %183 = vector.shape_cast %182 : vector<1x8x64xf32> to vector<8x64xf32>
    %184 = vector.shape_cast %181 : vector<8x64xf32> to vector<1x8x64xf32>
    tpu.vector_store %arg14[%c0_165, %c0_166, %c0_167], %184 {strides = array<i32>} : memref<1x8x64xf32, #tpu.memory_space<vmem>>, vector<1x8x64xf32>,
    return
  }
  func.func @transform_0(%arg0: i32, %arg1: i32) -> (i32, i32, i32, i32) {
    %c0_i32 = arith.constant 0 : i32
    %c0_i32_0 = arith.constant 0 : i32
    %c0_i32_1 = arith.constant 0 : i32
    %c0_i32_2 = arith.constant 0 : i32
    return %arg0, %c0_i32, %c0_i32_0, %c0_i32_1 : i32, i32, i32, i32
  }
  func.func @transform_1(%arg0: i32, %arg1: i32) -> (i32, i32) {
    %c0_i32 = arith.constant 0 : i32
    %c0_i32_0 = arith.constant 0 : i32
    %c0_i32_1 = arith.constant 0 : i32
    return %c0_i32, %c0_i32_0 : i32, i32
  }
  func.func @transform_2(%arg0: i32, %arg1: i32) -> (i32, i32) {
    %c0_i32 = arith.constant 0 : i32
    %c0_i32_0 = arith.constant 0 : i32
    %c0_i32_1 = arith.constant 0 : i32
    return %c0_i32, %c0_i32_0 : i32, i32
  }
  func.func @transform_3(%arg0: i32, %arg1: i32) -> (i32, i32, i32) {
    %c0_i32 = arith.constant 0 : i32
    %c0_i32_0 = arith.constant 0 : i32
    %c0_i32_1 = arith.constant 0 : i32
    %c0_i32_2 = arith.constant 0 : i32
    return %c0_i32, %c0_i32_0, %c0_i32_1 : i32, i32, i32
  }
  func.func @transform_4(%arg0: i32, %arg1: i32) -> (i32, i32) {
    %c0_i32 = arith.constant 0 : i32
    %c0_i32_0 = arith.constant 0 : i32
    %c0_i32_1 = arith.constant 0 : i32
    return %c0_i32, %c0_i32_0 : i32, i32
  }
  func.func @transform_5(%arg0: i32, %arg1: i32) -> (i32, i32, i32) {
    %c0_i32 = arith.constant 0 : i32
    %c0_i32_0 = arith.constant 0 : i32
    %c0_i32_1 = arith.constant 0 : i32
    %c0_i32_2 = arith.constant 0 : i32
    return %c0_i32, %c0_i32_0, %c0_i32_1 : i32, i32, i32
  }
  func.func @transform_6(%arg0: i32, %arg1: i32) -> (i32, i32) {
    %c0_i32 = arith.constant 0 : i32
    %c0_i32_0 = arith.constant 0 : i32
    %c0_i32_1 = arith.constant 0 : i32
    return %c0_i32, %c0_i32_0 : i32, i32
  }
  func.func @transform_7(%arg0: i32, %arg1: i32) -> (i32, i32) {
    %c0_i32 = arith.constant 0 : i32
    %c0_i32_0 = arith.constant 0 : i32
    %c0_i32_1 = arith.constant 0 : i32
    return %c0_i32, %c0_i32_0 : i32, i32
  }
  func.func @transform_8(%arg0: i32, %arg1: i32) -> (i32, i32, i32, i32) {
    %c0_i32 = arith.constant 0 : i32
    %c0_i32_0 = arith.constant 0 : i32
    %c0_i32_1 = arith.constant 0 : i32
    return %arg0, %arg1, %c0_i32, %c0_i32_0 : i32, i32, i32, i32
  }
  func.func @transform_9(%arg0: i32, %arg1: i32) -> (i32, i32) {
    %c0_i32 = arith.constant 0 : i32
    %c0_i32_0 = arith.constant 0 : i32
    %c0_i32_1 = arith.constant 0 : i32
    return %c0_i32, %c0_i32_0 : i32, i32
  }
  func.func @transform_10(%arg0: i32, %arg1: i32) -> (i32, i32) {
    %c0_i32 = arith.constant 0 : i32
    %c0_i32_0 = arith.constant 0 : i32
    %c0_i32_1 = arith.constant 0 : i32
    return %c0_i32, %c0_i32_0 : i32, i32
  }
  func.func @transform_11(%arg0: i32, %arg1: i32) -> (i32, i32) {
    %c0_i32 = arith.constant 0 : i32
    %c0_i32_0 = arith.constant 0 : i32
    %c0_i32_1 = arith.constant 0 : i32
    return %c0_i32, %c0_i32_0 : i32, i32
  }
  func.func @transform_12(%arg0: i32, %arg1: i32) -> (i32, i32, i32) {
    %c0_i32 = arith.constant 0 : i32
    %c0_i32_0 = arith.constant 0 : i32
    return %arg0, %c0_i32, %arg1 : i32, i32, i32
  }
}

</mosaic_0001>

<bundles_post_ra>
// kernel: tpu_custom_call.1
= control target key start
LH: loop header
LB: loop body
LE: loop exit
PB: predicated region body
PF: predicated region fallthrough
CT: control target
= control target key end

     0   :  { %s7835_s0 = inlined_call_operand.vmem [shape: f32[2,20,18,4], index: 0, kind: input, shape index: {}]   ;;  %s7836_s1 = inlined_call_operand.vmem [shape: f32[1,4], index: 1, kind: input, shape index: {}]   ;;  %s7837_s2 = inlined_call_operand.vmem [shape: f32[1,4], index: 2, kind: input, shape index: {}]   ;;  %s7838_s3 = inlined_call_operand.vmem [shape: bf16[9,4,8], index: 3, kind: input, shape index: {}]   ;;  %s7839_s4 = inlined_call_operand.vmem [shape: f32[1,8], index: 4, kind: input, shape index: {}]   ;;  %s7840_s5 = inlined_call_operand.vmem [shape: bf16[9,8,8], index: 5, kind: input, shape index: {}]   ;;  %s7841_s6 = inlined_call_operand.vmem [shape: f32[8,1], index: 6, kind: input, shape index: {}]   ;;  %s7842_s7 = inlined_call_operand.vmem [shape: f32[8,1], index: 7, kind: input, shape index: {}]   ;;  %s7843_s8 = inlined_call_operand.vmem [shape: bf16[2,8,8,4], index: 8, kind: input, shape index: {}]   ;;  %s7844_s9 = inlined_call_operand.vmem [shape: bf16[8,4], index: 9, kind: input, shape index: {}]   ;;  %s7845_s10 = inlined_call_operand.vmem [shape: f32[8,1], index: 10, kind: input, shape index: {}]   ;;  %s7846_s11 = inlined_call_operand.vmem [shape: f32[8,1], index: 11, kind: input, shape index: {}]   ;;  %s7847_s12 = inlined_call_operand.hbm [shape: f32[2,8,64], index: 12, kind: output, shape index: {}]  }
   0x1   :  { %7853 = sst [smem:[#allocation14_spill]] %s7835_s0 }
   0x2   :  { %7854 = sst [smem:[#allocation15_spill]] %s7836_s1 }
   0x3   :  { %7855 = sst [smem:[#allocation16_spill]] %s7837_s2 }
   0x4   :  { %17 = vsyncpa [#allocation5], 0 }
   0x5   :  { %19 = vsyncpa [#allocation5 + $0x1], 0  ;;  %s6011_s21 = smov 0   ;;  %s6013_s22 = smov 0  }
   0x6   :  { %s6015_s23 = smov 0   ;;  %s6017_s24 = smov 0  }
   0x7   :  { %s6019_s25 = smov 0   ;;  %s6021_s26 = smov 0  }
   0x8 LB: > { %s4635_s27 = sadd.s32 4294967295, %s5940_s26   ;;  %s4636_s28 = sadd.s32 4294967294, %s5940_s26   ;;  %s5940_s26 = sphi %s6021_s26, %s25_s26   ;;  %s5936_s25 = sphi %s6019_s25, %s7880_s25   ;;  %s5932_s24 = sphi %s6017_s24, %s7879_s24   ;;  %s5928_s23 = sphi %s6015_s23, %s7878_s23   ;;  %s5924_s22 = sphi %s6013_s22, %s7877_s22   ;;  %s5920_s21 = sphi %s6011_s21, %s7876_s21  }
   0x9   : > { %s37_s29 = sadd.s32 1, %s5936_s25  ;;  %s310_s30 = sadd.s32 1, %s5928_s23 }
   0xa   : > { %p39_p0 = scmp.ge.s32.totalorder %s37_s29, 2  ;;  %p320_p1 = scmp.ne.s32.totalorder %s5928_s23, %s5924_s22 }
   0xb   : > { %p321_p2 = scmp.eq.s32.totalorder %s4635_s27, 1  ;;  %p326_p3 = scmp.ne.s32.totalorder %s5924_s22, %s5920_s21 }
   0xc   : > { %s7882_s29 = smov (%p39_p0, %s37_s29), 0  ;;  %p327_p5 = scmp.eq.s32.totalorder %s4636_s28, 1 }
   0xd   : > { %7856 = sst [smem:[#allocation7_spill]] %s7882_s29  ;;  %p6051_p4 = por %p321_p2, %p320_p1 }
   0xe   : > { %s305_s14 = ssub.s32 %s5936_s25, %s7882_s29  ;;  %p4639_p6 = scmp.ge.s32.totalorder %s5940_s26, 1 }
   0xf   : > { %p308_p7 = scmp.eq.s32.totalorder %s305_s14, 0  ;;  %p6058_p8 = por %p327_p5, %p326_p3 }
  0x10   : > { %p396_p9 = scmp.lt.s32.totalorder %s5940_s26, 3 }
  0x11   : > { %s6064_s16 = scalar_select %p308_p7, %s5928_s23, %s310_s30  }
  0x12   : > { %p397_p10 = pnand %p4639_p6, %p396_p9 }
  0x14   : > { %400 = sbr.rel (%p397_p10) target bundleno = 1360 (0x550), region = 68 }
  0x19   : > { %v4646_v0 = vld [vmem:[%s7838_s3 + $0x2] sm:$0x3]  ;;  %vm919_vm0 = vcmask 1041408   ;;  %v814_v1 = vld [vmem:[%s7838_s3] sm:$0x3]  ;;  %v7851_v2 = vmov 0.0  }
  0x1a   : > { %5047 = vmatprep.subr.bf16.mxu0 %v7851_v2  ;;  %5117 = vmatprep.subr.bf16.mxu1 %v7851_v2  ;;  %v921_v3 = vsel %vm919_vm0, %v4646_v0, 0  ;;  %v1144_v4 = vsel %vm919_vm0, %v814_v1, 0  ;;  %p447_p11 = scmp.lt.s32.totalorder %s5932_s24, 1  ;;  %vm5943_vm1 = vmmov 0   ;;  %s7859_s1 = sld [smem:[#allocation15_spill]]  ;;  %vm651_vm2 = vcmask 31744  }
  0x1b   : > { %5048 = vmatpush3.bf16.msra.mxu0 %v921_v3  ;;  %5118 = vmatpush3.bf16.msra.mxu1 %v1144_v4  ;;  %s7860_s0 = sld [smem:[#allocation14_spill]]  ;;  %vm654_vm3 = vcmask 25600   ;;  %vm710_vm4 = vcmask 24576   ;;  %vm3631_vm5 = vcmask 57344   ;;  %vm3596_vm7 = vcmask 64512   ;;  %s444_s30 = sand.u32 1, %s5924_s22  }
  0x1c   : > { %5049 = vmatprep.mubr.msk.bf16.mxu0 %vm5943_vm1, %v7851_v2  ;;  %5119 = vmatprep.mubr.msk.bf16.mxu1 %vm5943_vm1, %v7851_v2  ;;  %s6082_s27 = scalar_select %p447_p11, %s5932_s24, 1  ;;  %vm3671_vm9 = vcmask 58368  }
  0x1d   : > { %5187 = vmatprep.subr.bf16.mxu0 %v7851_v2  ;;  %5257 = vmatprep.subr.bf16.mxu1 %v7851_v2  ;;  %s7861_s2 = sld [smem:[#allocation16_spill]]  ;;  %s4640_s14 = sshll.u32 %s444_s30, 3 }
  0x1e   : > { %s5797_s28 = smul.u32 480, %s6082_s27  ;;  %s446_s18 = scalar_lea.vmem [#allocation4], %s4640_s14 }
  0x1f   : > { %s4501_s20 = sshll.u32 %s446_s18, 4  ;;  %s4502_s20 = int_to_ptr.vmem [resolvable:$true] %s4501_s20 }
  0x20   : > { %v6090_v5 = vld [vmem:[%s7859_s1] ss:$0 sm:$0xff] }
  0x21   : > { %s6095_s19 = scalar_lea.vmem %s7860_s0, %s5797_s28  ;;  %s5864_s0 = scalar_lea.vmem %s4502_s20, 128 }
  0x22   : > { %v466_v7 = vld [vmem:[%s6095_s19] sm:$0xff]  ;;  %v467_v8 = vld [vmem:[%s6095_s19 + $0x8] sm:$0xff]  ;;  %v468_v9 = vld [vmem:[%s6095_s19 + $0x10] sm:$0x3]  ;;  %p5865_p12 = scmp.ne.s32.totalorder %s4502_s20, %s5864_s0 }
  0x23   : > { %v6100_v6 = vld [vmem:[%s7861_s2] ss:$0 sm:$0xff]  ;;  %v530_v10 = vmul.f32 %v6090_v5, %v466_v7  ;;  %v531_v11 = vmul.f32 %v6090_v5, %v467_v8  ;;  %v532_v12 = vmul.f32 %v6090_v5, %v468_v9  ;;  %v469_v13 = vld [vmem:[%s6095_s19 + $0x18] sm:$0xff]  ;;  %v471_v15 = vld [vmem:[%s6095_s19 + $0x28] sm:$0x3] }
  0x24   : > { %v470_v14 = vld [vmem:[%s6095_s19 + $0x20] sm:$0xff]  ;;  %v533_v16 = vmul.f32 %v6090_v5, %v469_v13  ;;  %v535_v18 = vmul.f32 %v6090_v5, %v471_v15  ;;  %v472_v19 = vld [vmem:[%s6095_s19 + $0x30] sm:$0xff]  ;;  %v473_v20 = vld [vmem:[%s6095_s19 + $0x38] sm:$0xff]  ;;  %p5866_p13 = pnand %p5865_p12, %p6051_p4 }
  0x25   : > { %v534_v17 = vmul.f32 %v6090_v5, %v470_v14  ;;  %v474_v21 = vld [vmem:[%s6095_s19 + $0x40] sm:$0x3]  ;;  %v594_v22 = vadd.f32 %v6100_v6, %v530_v10  ;;  %v595_v23 = vadd.f32 %v6100_v6, %v531_v11  ;;  %v596_v24 = vadd.f32 %v6100_v6, %v532_v12  ;;  %v475_v26 = vld [vmem:[%s6095_s19 + $0x48] sm:$0xff]  ;;  %v476_v27 = vld [vmem:[%s6095_s19 + $0x50] sm:$0xff] }
  0x26   : > { %v536_v25 = vmul.f32 %v6090_v5, %v472_v19  ;;  %v477_v28 = vld [vmem:[%s6095_s19 + $0x58] sm:$0x3]  ;;  %v597_v29 = vadd.f32 %v6100_v6, %v533_v16  ;;  %v599_v31 = vadd.f32 %v6100_v6, %v535_v18  ;;  %v537_v32 = vmul.f32 %v6090_v5, %v473_v20  ;;  %v478_v33 = vld [vmem:[%s6095_s19 + $0x60] sm:$0xff]  ;;  %v479_v34 = vld [vmem:[%s6095_s19 + $0x68] sm:$0xff]  ;;  %p5867_p0 = pneg %p5866_p13 }
  0x27   : > { %v598_v30 = vadd.f32 %v6100_v6, %v534_v17  ;;  %v480_v35 = vld [vmem:[%s6095_s19 + $0x70] sm:$0x3]  ;;  %652 = vst.msk [vmem:[#allocation2] sm:$0xff] %vm651_vm2, %v594_v22  ;;  %653 = vst.msk [vmem:[#allocation2 + $0x8] sm:$0xff] %vm651_vm2, %v595_v23  ;;  %v538_v36 = vmul.f32 %v6090_v5, %v474_v21  ;;  %v539_v38 = vmul.f32 %v6090_v5, %v475_v26  ;;  %v481_v40 = vld [vmem:[%s6095_s19 + $0x78] sm:$0xff] }
  0x28   : > { %655 = vst.msk [vmem:[#allocation2 + $0x10] sm:$0x3] %vm654_vm3, %v596_v24  ;;  %v600_v37 = vadd.f32 %v6100_v6, %v536_v25  ;;  %v540_v39 = vmul.f32 %v6090_v5, %v476_v27  ;;  %658 = vst.msk [vmem:[#allocation2 + $0x28] sm:$0x3] %vm654_vm3, %v599_v31  ;;  %v601_v41 = vadd.f32 %v6100_v6, %v537_v32  ;;  %v482_v45 = vld [vmem:[%s6095_s19 + $0x80] sm:$0xff]  ;;  %v484_v47 = vld [vmem:[%s6095_s19 + $0x90] sm:$0xff] }
  0x29   : > { %711 = vst.msk [vmem:[#allocation2] sm:$0x1] %vm710_vm4, %v7851_v2  ;;  %730 = vst.msk [vmem:[#allocation2 + $0x11] sm:$0x1] %vm710_vm4, %v7851_v2  ;;  %v541_v42 = vmul.f32 %v6090_v5, %v477_v28  ;;  %v542_v43 = vmul.f32 %v6090_v5, %v478_v33  ;;  %v543_v44 = vmul.f32 %v6090_v5, %v479_v34  ;;  %v483_v46 = vld [vmem:[%s6095_s19 + $0x88] sm:$0x3] }
  0x2a   : > { %754 = vst.msk [vmem:[#allocation2 + $0x8] sm:$0xff] %vm651_vm2, %v7851_v2  ;;  %656 = vst.msk [vmem:[#allocation2 + $0x18] sm:$0xff] %vm651_vm2, %v597_v29  ;;  %v602_v48 = vadd.f32 %v6100_v6, %v538_v36  ;;  %v603_v49 = vadd.f32 %v6100_v6, %v539_v38  ;;  %v604_v50 = vadd.f32 %v6100_v6, %v540_v39  ;;  %v485_v52 = vld [vmem:[%s6095_s19 + $0x98] sm:$0xff]  ;;  %v486_v53 = vld [vmem:[%s6095_s19 + $0xa0] sm:$0x3] }
  0x2b   : > { %657 = vst.msk [vmem:[#allocation2 + $0x20] sm:$0xff] %vm651_vm2, %v598_v30  ;;  %753 = vst.msk [vmem:[#allocation2] sm:$0xff] %vm651_vm2, %v7851_v2  ;;  %v544_v51 = vmul.f32 %v6090_v5, %v480_v35  ;;  %v487_v54 = vld [vmem:[%s6095_s19 + $0xa8] sm:$0xff]  ;;  %v605_v55 = vadd.f32 %v6100_v6, %v541_v42  ;;  %v606_v56 = vadd.f32 %v6100_v6, %v542_v43  ;;  %v488_v59 = vld [vmem:[%s6095_s19 + $0xb0] sm:$0xff] }
  0x2c   : > { %755 = vst.msk [vmem:[#allocation2 + $0x10] sm:$0x3] %vm654_vm3, %v7851_v2  ;;  %v607_v57 = vadd.f32 %v6100_v6, %v543_v44  ;;  %v545_v58 = vmul.f32 %v6090_v5, %v481_v40  ;;  %661 = vst.msk [vmem:[#allocation2 + $0x40] sm:$0x3] %vm654_vm3, %v602_v48  ;;  %v546_v61 = vmul.f32 %v6090_v5, %v482_v45  ;;  %v489_v0 = vld [vmem:[%s6095_s19 + $0xb8] sm:$0x3] }
  0x2d   : > { %712 = vst.msk [vmem:[#allocation2 + $0x18] sm:$0x1] %vm710_vm4, %v7851_v2  ;;  %731 = vst.msk [vmem:[#allocation2 + $0x29] sm:$0x1] %vm710_vm4, %v7851_v2  ;;  %v608_v60 = vadd.f32 %v6100_v6, %v544_v51  ;;  %v547_v62 = vmul.f32 %v6090_v5, %v483_v46  ;;  %v548_v63 = vmul.f32 %v6090_v5, %v484_v47  ;;  %v490_v8 = vld [vmem:[%s6095_s19 + $0xc0] sm:$0xff]  ;;  %v491_v9 = vld [vmem:[%s6095_s19 + $0xc8] sm:$0xff] }
  0x2e   : > { %757 = vst.msk [vmem:[#allocation2 + $0x20] sm:$0xff] %vm651_vm2, %v7851_v2  ;;  %659 = vst.msk [vmem:[#allocation2 + $0x30] sm:$0xff] %vm651_vm2, %v600_v37  ;;  %v609_v1 = vadd.f32 %v6100_v6, %v545_v58  ;;  %v549_v3 = vmul.f32 %v6090_v5, %v485_v52  ;;  %v550_v4 = vmul.f32 %v6090_v5, %v486_v53  ;;  %v492_v10 = vld [vmem:[%s6095_s19 + $0xd0] sm:$0x3]  ;;  %v493_v15 = vld [vmem:[%s6095_s19 + $0xd8] sm:$0xff] }
  0x2f   : > { %756 = vst.msk [vmem:[#allocation2 + $0x18] sm:$0xff] %vm651_vm2, %v7851_v2  ;;  %660 = vst.msk [vmem:[#allocation2 + $0x38] sm:$0xff] %vm651_vm2, %v601_v41  ;;  %v551_v7 = vmul.f32 %v6090_v5, %v487_v54  ;;  %v610_v11 = vadd.f32 %v6100_v6, %v546_v61  ;;  %v611_v12 = vadd.f32 %v6100_v6, %v547_v62  ;;  %v494_v16 = vld [vmem:[%s6095_s19 + $0xe0] sm:$0xff]  ;;  %v495_v17 = vld [vmem:[%s6095_s19 + $0xe8] sm:$0x3] }
  0x30   : > { %758 = vst.msk [vmem:[#allocation2 + $0x28] sm:$0x3] %vm654_vm3, %v7851_v2  ;;  %664 = vst.msk [vmem:[#allocation2 + $0x58] sm:$0x3] %vm654_vm3, %v605_v55  ;;  %v612_v13 = vadd.f32 %v6100_v6, %v548_v63  ;;  %v552_v14 = vmul.f32 %v6090_v5, %v488_v59  ;;  %v613_v18 = vadd.f32 %v6100_v6, %v549_v3  ;;  %v4681_v27 = vld [vmem:[%s7838_s3 + $0x4] sm:$0x3] }
  0x31   : > { %713 = vst.msk [vmem:[#allocation2 + $0x30] sm:$0x1] %vm710_vm4, %v7851_v2  ;;  %732 = vst.msk [vmem:[#allocation2 + $0x41] sm:$0x1] %vm710_vm4, %v7851_v2  ;;  %v614_v19 = vadd.f32 %v6100_v6, %v550_v4  ;;  %v553_v20 = vmul.f32 %v6090_v5, %v489_v0  ;;  %v615_v21 = vadd.f32 %v6100_v6, %v551_v7  ;;  %v764_v22 = vld [vmem:[#allocation2 + $0x8] sm:$0xff]  ;;  %v496_v39 = vld [vmem:[%s6095_s19 + $0xf0] sm:$0xff] }
  0x32   : > { %662 = vst.msk [vmem:[#allocation2 + $0x48] sm:$0xff] %vm651_vm2, %v603_v49  ;;  %663 = vst.msk [vmem:[#allocation2 + $0x50] sm:$0xff] %vm651_vm2, %v604_v50  ;;  %v616_v23 = vadd.f32 %v6100_v6, %v552_v14  ;;  %v554_v24 = vmul.f32 %v6090_v5, %v490_v8  ;;  %v555_v25 = vmul.f32 %v6090_v5, %v491_v9  ;;  %v815_v28 = vld [vmem:[#allocation2 + $0x1] sm:$0xff]  ;;  %v497_v40 = vld [vmem:[%s6095_s19 + $0xf8] sm:$0xff]  ;;  %v1420_v46 = vsel %vm919_vm0, %v4681_v27, 0 }
  0x33   : > { %714 = vst.msk [vmem:[#allocation2 + $0x48] sm:$0x1] %vm710_vm4, %v7851_v2  ;;  %733 = vst.msk [vmem:[#allocation2 + $0x59] sm:$0x1] %vm710_vm4, %v7851_v2  ;;  %v556_v26 = vmul.f32 %v6090_v5, %v492_v10  ;;  %v816_v29 = vld [vmem:[#allocation2 + $0x9] sm:$0xff]  ;;  %v763_v30 = vld [vmem:[#allocation2] sm:$0xff]  ;;  %v617_v31 = vadd.f32 %v6100_v6, %v553_v20  ;;  %v557_v32 = vmul.f32 %v6090_v5, %v493_v15 }
  0x34   : > { %665 = vst.msk [vmem:[#allocation2 + $0x60] sm:$0xff] %vm651_vm2, %v606_v56  ;;  %666 = vst.msk [vmem:[#allocation2 + $0x68] sm:$0xff] %vm651_vm2, %v607_v57  ;;  %v558_v33 = vmul.f32 %v6090_v5, %v494_v16  ;;  %v559_v34 = vmul.f32 %v6090_v5, %v495_v17  ;;  %v849_v35 = vpack.c.bf16 %v816_v29, %v815_v28  ;;  %v498_v44 = vld [vmem:[%s6095_s19 + $0x100] sm:$0x3]  ;;  %v499_v45 = vld [vmem:[%s6095_s19 + $0x108] sm:$0xff] }
  0x35   : > { %667 = vst.msk [vmem:[#allocation2 + $0x70] sm:$0x3] %vm654_vm3, %v608_v60  ;;  %670 = vst.msk [vmem:[#allocation2 + $0x88] sm:$0x3] %vm654_vm3, %v611_v12  ;;  %v797_v36 = vpack.c.bf16 %v764_v22, %v763_v30  ;;  %v618_v37 = vadd.f32 %v6100_v6, %v554_v24  ;;  %v619_v38 = vadd.f32 %v6100_v6, %v555_v25  ;;  %v500_v49 = vld [vmem:[%s6095_s19 + $0x110] sm:$0xff]  ;;  %v766_v53 = vld [vmem:[#allocation2 + $0x20] sm:$0xff] }
  0x36   : > { %715 = vst.msk [vmem:[#allocation2 + $0x60] sm:$0x1] %vm710_vm4, %v7851_v2  ;;  %734 = vst.msk [vmem:[#allocation2 + $0x71] sm:$0x1] %vm710_vm4, %v7851_v2  ;;  %v620_v41 = vadd.f32 %v6100_v6, %v556_v26  ;;  %v621_v42 = vadd.f32 %v6100_v6, %v557_v32  ;;  %v622_v43 = vadd.f32 %v6100_v6, %v558_v33  ;;  %5050 = vmatmul.mubr.msk.bf16.vlgmr.msra.gmra.mxu0 %vm651_vm2, %v849_v35  ;;  %v817_v47 = vld [vmem:[#allocation2 + $0x19] sm:$0xff]  ;;  %v503_v62 = vld [vmem:[%s6095_s19 + $0x128] sm:$0xff] }
  0x37   : > { %668 = vst.msk [vmem:[#allocation2 + $0x78] sm:$0xff] %vm651_vm2, %v609_v1  ;;  %669 = vst.msk [vmem:[#allocation2 + $0x80] sm:$0xff] %vm651_vm2, %v610_v11  ;;  %5120 = vmatmul.mubr.msk.bf16.vlgmr.msra.gmra.mxu1 %vm651_vm2, %v797_v36  ;;  %v623_v48 = vadd.f32 %v6100_v6, %v559_v34  ;;  %v501_v50 = vld [vmem:[%s6095_s19 + $0x118] sm:$0x3]  ;;  %5053 = vmatprep.mubr.msk.bf16.mxu0 %vm5943_vm1, %v7851_v2  ;;  %v818_v51 = vld [vmem:[#allocation2 + $0x21] sm:$0xff]  ;;  %v560_v54 = vmul.f32 %v6090_v5, %v496_v39 }
  0x38   : > { %716 = vst.msk [vmem:[#allocation2 + $0x78] sm:$0x1] %vm710_vm4, %v7851_v2  ;;  %735 = vst.msk [vmem:[#allocation2 + $0x89] sm:$0x1] %vm710_vm4, %v7851_v2  ;;  %5123 = vmatprep.mubr.msk.bf16.mxu1 %vm5943_vm1, %v7851_v2  ;;  %v765_v52 = vld [vmem:[#allocation2 + $0x18] sm:$0xff]  ;;  %v561_v55 = vmul.f32 %v6090_v5, %v497_v40  ;;  %v562_v56 = vmul.f32 %v6090_v5, %v498_v44  ;;  %v563_v57 = vmul.f32 %v6090_v5, %v499_v45  ;;  %v502_v58 = vld [vmem:[%s6095_s19 + $0x120] sm:$0xff] }
  0x39   : > { %671 = vst.msk [vmem:[#allocation2 + $0x90] sm:$0xff] %vm651_vm2, %v612_v13  ;;  %672 = vst.msk [vmem:[#allocation2 + $0x98] sm:$0xff] %vm651_vm2, %v613_v18  ;;  %5188 = vmatpush3.bf16.msra.mxu0 %v1420_v46  ;;  %v624_v59 = vadd.f32 %v6100_v6, %v560_v54  ;;  %v564_v61 = vmul.f32 %v6090_v5, %v500_v49  ;;  %v850_v63 = vpack.c.bf16 %v818_v51, %v817_v47  ;;  %v504_v4 = vld [vmem:[%s6095_s19 + $0x130] sm:$0x3]  ;;  %v505_v7 = vld [vmem:[%s6095_s19 + $0x138] sm:$0xff] }
  0x3a   : > { %673 = vst.msk [vmem:[#allocation2 + $0xa0] sm:$0x3] %vm654_vm3, %v614_v19  ;;  %676 = vst.msk [vmem:[#allocation2 + $0xb8] sm:$0x3] %vm654_vm3, %v617_v31  ;;  %v625_v60 = vadd.f32 %v6100_v6, %v561_v55  ;;  %5327 = vmatprep.subr.bf16.mxu0 %v7851_v2  ;;  %v6300_v0 = vpack.c.bf16 %v766_v53, %v765_v52  ;;  %v626_v1 = vadd.f32 %v6100_v6, %v562_v56  ;;  %v506_v11 = vld [vmem:[%s6095_s19 + $0x140] sm:$0xff]  ;;  %v819_v17 = vld [vmem:[#allocation2 + $0x31] sm:$0xff] }
  0x3b   : > { %717 = vst.msk [vmem:[#allocation2 + $0x90] sm:$0x1] %vm710_vm4, %v7851_v2  ;;  %736 = vst.msk [vmem:[#allocation2 + $0xa1] sm:$0x1] %vm710_vm4, %v7851_v2  ;;  %v565_v3 = vmul.f32 %v6090_v5, %v501_v50  ;;  %v627_v8 = vadd.f32 %v6100_v6, %v563_v57  ;;  %v628_v9 = vadd.f32 %v6100_v6, %v564_v61  ;;  %v820_v18 = vld [vmem:[#allocation2 + $0x39] sm:$0xff]  ;;  %v508_v27 = vld [vmem:[%s6095_s19 + $0x150] sm:$0xff] }
  0x3c   : > { %674 = vst.msk [vmem:[#allocation2 + $0xa8] sm:$0xff] %vm651_vm2, %v615_v21  ;;  %675 = vst.msk [vmem:[#allocation2 + $0xb0] sm:$0xff] %vm651_vm2, %v616_v23  ;;  %v566_v10 = vmul.f32 %v6090_v5, %v502_v58  ;;  %v567_v13 = vmul.f32 %v6090_v5, %v503_v62  ;;  %v568_v14 = vmul.f32 %v6090_v5, %v504_v4  ;;  %v767_v21 = vld [vmem:[#allocation2 + $0x30] sm:$0xff]  ;;  %v768_v22 = vld [vmem:[#allocation2 + $0x38] sm:$0xff] }
  0x3d   : > { %718 = vst.msk [vmem:[#allocation2 + $0xa8] sm:$0x1] %vm710_vm4, %v7851_v2  ;;  %737 = vst.msk [vmem:[#allocation2 + $0xb9] sm:$0x1] %vm710_vm4, %v7851_v2  ;;  %v629_v12 = vadd.f32 %v6100_v6, %v565_v3  ;;  %v569_v16 = vmul.f32 %v6090_v5, %v505_v7  ;;  %v570_v20 = vmul.f32 %v6090_v5, %v506_v11  ;;  %v507_v24 = vld [vmem:[%s6095_s19 + $0x148] sm:$0x3] }
  0x3e   : > { %677 = vst.msk [vmem:[#allocation2 + $0xc0] sm:$0xff] %vm651_vm2, %v618_v37  ;;  %678 = vst.msk [vmem:[#allocation2 + $0xc8] sm:$0xff] %vm651_vm2, %v619_v38  ;;  %v630_v15 = vadd.f32 %v6100_v6, %v566_v10  ;;  %5054 = vmatmul.mubr.msk.bf16.gmra.mxu0 %vm651_vm2, %v850_v63  ;;  %v631_v19 = vadd.f32 %v6100_v6, %v567_v13  ;;  %v632_v23 = vadd.f32 %v6100_v6, %v568_v14  ;;  %v509_v28 = vld [vmem:[%s6095_s19 + $0x158] sm:$0xff]  ;;  %v510_v31 = vld [vmem:[%s6095_s19 + $0x160] sm:$0x3] }
  0x3f   : > { %679 = vst.msk [vmem:[#allocation2 + $0xd0] sm:$0x3] %vm654_vm3, %v620_v41  ;;  %682 = vst.msk [vmem:[#allocation2 + $0xe8] sm:$0x3] %vm654_vm3, %v623_v48  ;;  %5124 = vmatmul.mubr.msk.bf16.gmra.mxu1 %vm651_vm2, %v6300_v0  ;;  %5057 = vmatprep.mubr.msk.bf16.mxu0 %vm5943_vm1, %v7851_v2  ;;  %v633_v25 = vadd.f32 %v6100_v6, %v569_v16  ;;  %v634_v26 = vadd.f32 %v6100_v6, %v570_v20  ;;  %v511_v34 = vld [vmem:[%s6095_s19 + $0x168] sm:$0xff]  ;;  %v512_v35 = vld [vmem:[%s6095_s19 + $0x170] sm:$0xff] }
  0x40   : > { %719 = vst.msk [vmem:[#allocation2 + $0xc0] sm:$0x1] %vm710_vm4, %v7851_v2  ;;  %738 = vst.msk [vmem:[#allocation2 + $0xd1] sm:$0x1] %vm710_vm4, %v7851_v2  ;;  %5127 = vmatprep.mubr.msk.bf16.mxu1 %vm5943_vm1, %v7851_v2  ;;  %v851_v29 = vpack.c.bf16 %v820_v18, %v819_v17  ;;  %v571_v30 = vmul.f32 %v6090_v5, %v507_v24  ;;  %v572_v32 = vmul.f32 %v6090_v5, %v508_v27  ;;  %v513_v38 = vld [vmem:[%s6095_s19 + $0x178] sm:$0x3] }
  0x41   : > { %680 = vst.msk [vmem:[#allocation2 + $0xd8] sm:$0xff] %vm651_vm2, %v621_v42  ;;  %681 = vst.msk [vmem:[#allocation2 + $0xe0] sm:$0xff] %vm651_vm2, %v622_v43  ;;  %v573_v33 = vmul.f32 %v6090_v5, %v509_v28  ;;  %v6355_v36 = vpack.c.bf16 %v768_v22, %v767_v21  ;;  %v574_v37 = vmul.f32 %v6090_v5, %v510_v31  ;;  %v514_v45 = vld [vmem:[%s6095_s19 + $0x180] sm:$0xff]  ;;  %v515_v48 = vld [vmem:[%s6095_s19 + $0x188] sm:$0xff] }
  0x42   : > { %720 = vst.msk [vmem:[#allocation2 + $0xd8] sm:$0x1] %vm710_vm4, %v7851_v2  ;;  %739 = vst.msk [vmem:[#allocation2 + $0xe9] sm:$0x1] %vm710_vm4, %v7851_v2  ;;  %v575_v39 = vmul.f32 %v6090_v5, %v511_v34  ;;  %v576_v40 = vmul.f32 %v6090_v5, %v512_v35  ;;  %v635_v41 = vadd.f32 %v6100_v6, %v571_v30  ;;  %v516_v51 = vld [vmem:[%s6095_s19 + $0x190] sm:$0x3] }
  0x43   : > { %683 = vst.msk [vmem:[#allocation2 + $0xf0] sm:$0xff] %vm651_vm2, %v624_v59  ;;  %684 = vst.msk [vmem:[#allocation2 + $0xf8] sm:$0xff] %vm651_vm2, %v625_v60  ;;  %v636_v42 = vadd.f32 %v6100_v6, %v572_v32  ;;  %v637_v43 = vadd.f32 %v6100_v6, %v573_v33  ;;  %v577_v44 = vmul.f32 %v6090_v5, %v513_v38  ;;  %v821_v54 = vld [vmem:[#allocation2 + $0x49] sm:$0xff]  ;;  %v4699_v56 = vld [vmem:[%s7838_s3 + $0x6] sm:$0x3] }
  0x44   : > { %685 = vst.msk [vmem:[#allocation2 + $0x100] sm:$0x3] %vm654_vm3, %v626_v1  ;;  %688 = vst.msk [vmem:[#allocation2 + $0x118] sm:$0x3] %vm654_vm3, %v629_v12  ;;  %v638_v46 = vadd.f32 %v6100_v6, %v574_v37  ;;  %v639_v47 = vadd.f32 %v6100_v6, %v575_v39  ;;  %v640_v49 = vadd.f32 %v6100_v6, %v576_v40  ;;  %v822_v57 = vld [vmem:[#allocation2 + $0x51] sm:$0xff]  ;;  %v769_v58 = vld [vmem:[#allocation2 + $0x48] sm:$0xff] }
  0x45   : > { %721 = vst.msk [vmem:[#allocation2 + $0xf0] sm:$0x1] %vm710_vm4, %v7851_v2  ;;  %740 = vst.msk [vmem:[#allocation2 + $0x101] sm:$0x1] %vm710_vm4, %v7851_v2  ;;  %v641_v50 = vadd.f32 %v6100_v6, %v577_v44  ;;  %v578_v52 = vmul.f32 %v6090_v5, %v514_v45  ;;  %v579_v53 = vmul.f32 %v6090_v5, %v515_v48  ;;  %v770_v59 = vld [vmem:[#allocation2 + $0x50] sm:$0xff]  ;;  %v1731_v62 = vsel %vm919_vm0, %v4699_v56, 0 }
  0x46   : > { %686 = vst.msk [vmem:[#allocation2 + $0x108] sm:$0xff] %vm651_vm2, %v627_v8  ;;  %687 = vst.msk [vmem:[#allocation2 + $0x110] sm:$0xff] %vm651_vm2, %v628_v9  ;;  %5058 = vmatmul.mubr.msk.bf16.gmra.mxu0 %vm651_vm2, %v851_v29  ;;  %v580_v55 = vmul.f32 %v6090_v5, %v516_v51  ;;  %5258 = vmatpush3.bf16.msra.mxu1 %v1731_v62  ;;  %v852_v1 = vpack.c.bf16 %v822_v57, %v821_v54  ;;  %v823_v4 = vld [vmem:[#allocation2 + $0x61] sm:$0xff]  ;;  %v824_v7 = vld [vmem:[#allocation2 + $0x69] sm:$0xff] }
  0x47   : > { %722 = vst.msk [vmem:[#allocation2 + $0x108] sm:$0x1] %vm710_vm4, %v7851_v2  ;;  %741 = vst.msk [vmem:[#allocation2 + $0x119] sm:$0x1] %vm710_vm4, %v7851_v2  ;;  %5128 = vmatmul.mubr.msk.bf16.gmra.mxu1 %vm651_vm2, %v6355_v36  ;;  %5061 = vmatprep.mubr.msk.bf16.mxu0 %vm5943_vm1, %v7851_v2  ;;  %v642_v60 = vadd.f32 %v6100_v6, %v578_v52  ;;  %v643_v61 = vadd.f32 %v6100_v6, %v579_v53  ;;  %v771_v8 = vld [vmem:[#allocation2 + $0x60] sm:$0xff]  ;;  %v772_v9 = vld [vmem:[#allocation2 + $0x68] sm:$0xff] }
  0x48   : > { %689 = vst.msk [vmem:[#allocation2 + $0x120] sm:$0xff] %vm651_vm2, %v630_v15  ;;  %690 = vst.msk [vmem:[#allocation2 + $0x128] sm:$0xff] %vm651_vm2, %v631_v19  ;;  %5131 = vmatprep.mubr.msk.bf16.mxu1 %vm5943_vm1, %v7851_v2  ;;  %v644_v63 = vadd.f32 %v6100_v6, %v580_v55  ;;  %5397 = vmatprep.subr.bf16.mxu1 %v7851_v2  ;;  %v6415_v3 = vpack.c.bf16 %v770_v59, %v769_v58  ;;  %v825_v12 = vld [vmem:[#allocation2 + $0x79] sm:$0xff]  ;;  %v826_v13 = vld [vmem:[#allocation2 + $0x81] sm:$0xff] }
  0x49   : > { %723 = vst.msk [vmem:[#allocation2 + $0x120] sm:$0x1] %vm710_vm4, %v7851_v2  ;;  %v853_v10 = vpack.c.bf16 %v824_v7, %v823_v4  ;;  %v6429_v11 = vpack.c.bf16 %v772_v9, %v771_v8  ;;  %v773_v14 = vld [vmem:[#allocation2 + $0x78] sm:$0xff]  ;;  %v774_v15 = vld [vmem:[#allocation2 + $0x80] sm:$0xff]  ;;  %v854_v16 = vpack.c.bf16 %v826_v13, %v825_v12  ;;  %v775_v20 = vld [vmem:[#allocation2 + $0x90] sm:$0xff] }
  0x4a   : > { %691 = vst.msk [vmem:[#allocation2 + $0x130] sm:$0x3] %vm654_vm3, %v632_v23  ;;  %694 = vst.msk [vmem:[#allocation2 + $0x148] sm:$0x3] %vm654_vm3, %v635_v41  ;;  %v6438_v17 = vpack.c.bf16 %v774_v15, %v773_v14  ;;  %v827_v18 = vld [vmem:[#allocation2 + $0x91] sm:$0xff]  ;;  %v828_v19 = vld [vmem:[#allocation2 + $0x99] sm:$0xff] }
  0x4b   : > { %742 = vst.msk [vmem:[#allocation2 + $0x131] sm:$0x1] %vm710_vm4, %v7851_v2  ;;  %743 = vst.msk [vmem:[#allocation2 + $0x149] sm:$0x1] %vm710_vm4, %v7851_v2  ;;  %v776_v21 = vld [vmem:[#allocation2 + $0x98] sm:$0xff]  ;;  %v855_v22 = vpack.c.bf16 %v828_v19, %v827_v18  ;;  %v829_v24 = vld [vmem:[#allocation2 + $0xa9] sm:$0xff] }
  0x4c   : > { %692 = vst.msk [vmem:[#allocation2 + $0x138] sm:$0xff] %vm651_vm2, %v633_v25  ;;  %693 = vst.msk [vmem:[#allocation2 + $0x140] sm:$0xff] %vm651_vm2, %v634_v26  ;;  %v6447_v23 = vpack.c.bf16 %v776_v21, %v775_v20  ;;  %v830_v25 = vld [vmem:[#allocation2 + $0xb1] sm:$0xff]  ;;  %v777_v26 = vld [vmem:[#allocation2 + $0xa8] sm:$0xff] }
  0x4d   : > { %724 = vst.msk [vmem:[#allocation2 + $0x138] sm:$0x1] %vm710_vm4, %v7851_v2  ;;  %v778_v27 = vld [vmem:[#allocation2 + $0xb0] sm:$0xff]  ;;  %v856_v28 = vpack.c.bf16 %v830_v25, %v829_v24  ;;  %v831_v30 = vld [vmem:[#allocation2 + $0xc1] sm:$0xff]  ;;  %v833_v37 = vld [vmem:[#allocation2 + $0xd9] sm:$0xff] }
  0x4e   : > { %695 = vst.msk [vmem:[#allocation2 + $0x150] sm:$0xff] %vm651_vm2, %v636_v42  ;;  %696 = vst.msk [vmem:[#allocation2 + $0x158] sm:$0xff] %vm651_vm2, %v637_v43  ;;  %5062 = vmatmul.mubr.msk.bf16.gmra.mxu0 %vm651_vm2, %v852_v1  ;;  %v6456_v29 = vpack.c.bf16 %v778_v27, %v777_v26  ;;  %v832_v31 = vld [vmem:[#allocation2 + $0xc9] sm:$0xff]  ;;  %v779_v32 = vld [vmem:[#allocation2 + $0xc0] sm:$0xff] }
  0x4f   : > { %697 = vst.msk [vmem:[#allocation2 + $0x160] sm:$0x3] %vm654_vm3, %v638_v46  ;;  %700 = vst.msk [vmem:[#allocation2 + $0x178] sm:$0x3] %vm654_vm3, %v641_v50  ;;  %5132 = vmatmul.mubr.msk.bf16.gmra.mxu1 %vm651_vm2, %v6415_v3  ;;  %5065 = vmatprep.mubr.msk.bf16.mxu0 %vm5943_vm1, %v7851_v2  ;;  %v780_v33 = vld [vmem:[#allocation2 + $0xc8] sm:$0xff]  ;;  %v857_v34 = vpack.c.bf16 %v832_v31, %v831_v30  ;;  %v781_v39 = vld [vmem:[#allocation2 + $0xd8] sm:$0xff] }
  0x50   : > { %725 = vst.msk [vmem:[#allocation2 + $0x150] sm:$0x1] %vm710_vm4, %v7851_v2  ;;  %744 = vst.msk [vmem:[#allocation2 + $0x161] sm:$0x1] %vm710_vm4, %v7851_v2  ;;  %5135 = vmatprep.mubr.msk.bf16.mxu1 %vm5943_vm1, %v7851_v2  ;;  %v6465_v35 = vpack.c.bf16 %v780_v33, %v779_v32  ;;  %v834_v38 = vld [vmem:[#allocation2 + $0xe1] sm:$0xff]  ;;  %v835_v43 = vld [vmem:[#allocation2 + $0xf1] sm:$0xff] }
  0x51   : > { %698 = vst.msk [vmem:[#allocation2 + $0x168] sm:$0xff] %vm651_vm2, %v639_v47  ;;  %699 = vst.msk [vmem:[#allocation2 + $0x170] sm:$0xff] %vm651_vm2, %v640_v49  ;;  %v782_v40 = vld [vmem:[#allocation2 + $0xe0] sm:$0xff]  ;;  %v858_v41 = vpack.c.bf16 %v834_v38, %v833_v37  ;;  %v783_v45 = vld [vmem:[#allocation2 + $0xf0] sm:$0xff] }
  0x52   : > { %726 = vst.msk [vmem:[#allocation2 + $0x168] sm:$0x1] %vm710_vm4, %v7851_v2  ;;  %745 = vst.msk [vmem:[#allocation2 + $0x179] sm:$0x1] %vm710_vm4, %v7851_v2  ;;  %v6474_v42 = vpack.c.bf16 %v782_v40, %v781_v39  ;;  %v836_v44 = vld [vmem:[#allocation2 + $0xf9] sm:$0xff]  ;;  %v837_v49 = vld [vmem:[#allocation2 + $0x109] sm:$0xff] }
  0x53   : > { %701 = vst.msk [vmem:[#allocation2 + $0x180] sm:$0xff] %vm651_vm2, %v642_v60  ;;  %702 = vst.msk [vmem:[#allocation2 + $0x188] sm:$0xff] %vm651_vm2, %v643_v61  ;;  %v784_v46 = vld [vmem:[#allocation2 + $0xf8] sm:$0xff]  ;;  %v859_v47 = vpack.c.bf16 %v836_v44, %v835_v43  ;;  %v785_v51 = vld [vmem:[#allocation2 + $0x108] sm:$0xff] }
  0x54   : > { %703 = vst.msk [vmem:[#allocation2 + $0x190] sm:$0x3] %vm654_vm3, %v644_v63  ;;  %v6483_v48 = vpack.c.bf16 %v784_v46, %v783_v45  ;;  %v838_v50 = vld [vmem:[#allocation2 + $0x111] sm:$0xff]  ;;  %v839_v55 = vld [vmem:[#allocation2 + $0x121] sm:$0xff]  ;;  %v840_v56 = vld [vmem:[#allocation2 + $0x129] sm:$0xff] }
  0x55   : > { %727 = vst.msk [vmem:[#allocation2 + $0x180] sm:$0x1] %vm710_vm4, %v7851_v2  ;;  %746 = vst.msk [vmem:[#allocation2 + $0x191] sm:$0x1] %vm710_vm4, %v7851_v2  ;;  %v786_v52 = vld [vmem:[#allocation2 + $0x110] sm:$0xff]  ;;  %v860_v53 = vpack.c.bf16 %v838_v50, %v837_v49  ;;  %v787_v57 = vld [vmem:[#allocation2 + $0x120] sm:$0xff]  ;;  %v861_v59 = vpack.c.bf16 %v840_v56, %v839_v55 }
  0x56   : > { %5066 = vmatmul.mubr.msk.bf16.gmra.mxu0 %vm651_vm2, %v853_v10  ;;  %v6492_v54 = vpack.c.bf16 %v786_v52, %v785_v51  ;;  %v788_v58 = vld [vmem:[#allocation2 + $0x128] sm:$0xff]  ;;  %v841_v61 = vld [vmem:[#allocation2 + $0x139] sm:$0xff]  ;;  %v843_v8 = vld [vmem:[#allocation2 + $0x151] sm:$0xff] }
  0x57   : > { %5136 = vmatmul.mubr.msk.bf16.gmra.mxu1 %vm651_vm2, %v6429_v11  ;;  %5069 = vmatprep.mubr.msk.bf16.mxu0 %vm5943_vm1, %v7851_v2  ;;  %v6501_v60 = vpack.c.bf16 %v788_v58, %v787_v57  ;;  %v842_v62 = vld [vmem:[#allocation2 + $0x141] sm:$0xff]  ;;  %v789_v63 = vld [vmem:[#allocation2 + $0x138] sm:$0xff]  ;;  %v791_v10 = vld [vmem:[#allocation2 + $0x150] sm:$0xff] }
  0x58   : > { %5139 = vmatprep.mubr.msk.bf16.mxu1 %vm5943_vm1, %v7851_v2  ;;  %v790_v1 = vld [vmem:[#allocation2 + $0x140] sm:$0xff]  ;;  %v862_v4 = vpack.c.bf16 %v842_v62, %v841_v61  ;;  %v792_v12 = vld [vmem:[#allocation2 + $0x158] sm:$0xff]  ;;  %v845_v15 = vld [vmem:[#allocation2 + $0x169] sm:$0xff] }
  0x59   : > { %v6510_v7 = vpack.c.bf16 %v790_v1, %v789_v63  ;;  %v844_v9 = vld [vmem:[#allocation2 + $0x159] sm:$0xff]  ;;  %v6519_v14 = vpack.c.bf16 %v792_v12, %v791_v10  ;;  %v793_v18 = vld [vmem:[#allocation2 + $0x168] sm:$0xff]  ;;  %v794_v19 = vld [vmem:[#allocation2 + $0x170] sm:$0xff] }
  0x5a   : > { %v863_v13 = vpack.c.bf16 %v844_v9, %v843_v8  ;;  %v6528_v21 = vpack.c.bf16 %v794_v19, %v793_v18  ;;  %v796_v26 = vld [vmem:[#allocation2 + $0x188] sm:$0xff]  ;;  %v517_v27 = vld [vmem:[%s6095_s19 + $0x198] sm:$0xff] }
  0x5b   : > { %v848_v24 = vld [vmem:[#allocation2 + $0x189] sm:$0xff]  ;;  %v581_v30 = vmul.f32 %v6090_v5, %v517_v27  ;;  %v1322_v50 = vld [vmem:[#allocation2 + $0x52] sm:$0xff]  ;;  %v1328_v57 = vld [vmem:[#allocation2 + $0x9a] sm:$0xff] }
  0x5c   : > { %v795_v25 = vld [vmem:[#allocation2 + $0x180] sm:$0xff]  ;;  %v1316_v38 = vld [vmem:[#allocation2 + $0xa] sm:$0xff]  ;;  %v4717_v39 = vld [vmem:[%s7838_s3 + $0x8] sm:$0x3] }
  0x5d   : > { %v6540_v32 = vpack.c.bf16 %v796_v26, %v795_v25  ;;  %v2041_v40 = vsel %vm919_vm0, %v4717_v39, 0  ;;  %v1318_v43 = vld [vmem:[#allocation2 + $0x22] sm:$0xff]  ;;  %v4735_v45 = vld [vmem:[%s7838_s3 + $0xa] sm:$0x3] }
  0x5e   : > { %5070 = vmatmul.mubr.msk.bf16.gmra.mxu0 %vm651_vm2, %v854_v16  ;;  %v846_v16 = vld [vmem:[#allocation2 + $0x171] sm:$0xff]  ;;  %v2351_v46 = vsel %vm919_vm0, %v4735_v45, 0  ;;  %v1326_v55 = vld [vmem:[#allocation2 + $0x82] sm:$0xff] }
  0x5f   : > { %5140 = vmatmul.mubr.msk.bf16.gmra.mxu1 %vm651_vm2, %v6438_v17  ;;  %5073 = vmatprep.mubr.msk.bf16.mxu0 %vm5943_vm1, %v7851_v2  ;;  %v864_v20 = vpack.c.bf16 %v846_v16, %v845_v15  ;;  %v1324_v52 = vld [vmem:[#allocation2 + $0x6a] sm:$0xff] }
  0x60   : > { %5143 = vmatprep.mubr.msk.bf16.mxu1 %vm5943_vm1, %v7851_v2 }
  0x66   : > { %5074 = vmatmul.mubr.msk.bf16.gmra.mxu0 %vm651_vm2, %v855_v22  ;;  %v847_v22 = vld [vmem:[#allocation2 + $0x181] sm:$0xff] }
  0x67   : > { %5144 = vmatmul.mubr.msk.bf16.gmra.mxu1 %vm651_vm2, %v6447_v23  ;;  %5077 = vmatprep.mubr.msk.bf16.mxu0 %vm5943_vm1, %v7851_v2  ;;  %v865_v31 = vpack.c.bf16 %v848_v24, %v847_v22  ;;  %v1333_v22 = vld [vmem:[#allocation2 + $0xda] sm:$0xff]  ;;  %v1334_v24 = vld [vmem:[#allocation2 + $0xe2] sm:$0xff] }
  0x68   : > { %5147 = vmatprep.mubr.msk.bf16.mxu1 %vm5943_vm1, %v7851_v2 }
  0x6e   : > { %5078 = vmatmul.mubr.msk.bf16.gmra.mxu0 %vm651_vm2, %v856_v28  ;;  %v518_v28 = vld [vmem:[%s6095_s19 + $0x1a0] sm:$0xff] }
  0x6f   : > { %5148 = vmatmul.mubr.msk.bf16.gmra.mxu1 %vm651_vm2, %v6456_v29  ;;  %5081 = vmatprep.mubr.msk.bf16.mxu0 %vm5943_vm1, %v7851_v2  ;;  %v582_v33 = vmul.f32 %v6090_v5, %v518_v28  ;;  %v1315_v5 = vld [vmem:[#allocation2 + $0x2] sm:$0xff] }
  0x70   : > { %5151 = vmatprep.mubr.msk.bf16.mxu1 %vm5943_vm1, %v7851_v2 }
  0x71   : > { %v646_v37 = vadd.f32 %v6100_v6, %v582_v33 }
  0x73   : > { %705 = vst.msk [vmem:[#allocation2 + $0x1a0] sm:$0xff] %vm651_vm2, %v646_v37 }
  0x76   : > { %5082 = vmatmul.mubr.msk.bf16.gmra.mxu0 %vm651_vm2, %v857_v34  ;;  %v645_v34 = vadd.f32 %v6100_v6, %v581_v30  ;;  %v1349_v6 = vpack.c.bf16 %v1316_v38, %v1315_v5  ;;  %v6659_v30 = vpack.c.bf16 %v1334_v24, %v1333_v22  ;;  %v1335_v38 = vld [vmem:[#allocation2 + $0xf2] sm:$0xff] }
  0x77   : > { %5152 = vmatmul.mubr.msk.bf16.gmra.mxu1 %vm651_vm2, %v6465_v35  ;;  %5085 = vmatprep.mubr.msk.bf16.mxu0 %vm5943_vm1, %v7851_v2 }
  0x78   : > { %5155 = vmatprep.mubr.msk.bf16.mxu1 %vm5943_vm1, %v7851_v2  ;;  %704 = vst.msk [vmem:[#allocation2 + $0x198] sm:$0xff] %vm651_vm2, %v645_v34 }
  0x79   : > { %728 = vst.msk [vmem:[#allocation2 + $0x198] sm:$0x1] %vm710_vm4, %v7851_v2 }
  0x7e   : > { %5086 = vmatmul.mubr.msk.bf16.gmra.mxu0 %vm651_vm2, %v858_v41  ;;  %v1317_v41 = vld [vmem:[#allocation2 + $0x1a] sm:$0xff] }
  0x7f   : > { %5156 = vmatmul.mubr.msk.bf16.gmra.mxu1 %vm651_vm2, %v6474_v42  ;;  %5089 = vmatprep.mubr.msk.bf16.mxu0 %vm5943_vm1, %v7851_v2  ;;  %v6568_v44 = vpack.c.bf16 %v1318_v43, %v1317_v41 }
  0x80   : > { %5159 = vmatprep.mubr.msk.bf16.mxu1 %vm5943_vm1, %v7851_v2 }
  0x86   : > { %5090 = vmatmul.mubr.msk.bf16.gmra.mxu0 %vm651_vm2, %v859_v47  ;;  %v1320_v47 = vld [vmem:[#allocation2 + $0x3a] sm:$0xff] }
  0x87   : > { %5160 = vmatmul.mubr.msk.bf16.gmra.mxu1 %vm651_vm2, %v6483_v48  ;;  %5093 = vmatprep.mubr.msk.bf16.mxu0 %vm5943_vm1, %v7851_v2 }
  0x88   : > { %5163 = vmatprep.mubr.msk.bf16.mxu1 %vm5943_vm1, %v7851_v2 }
  0x8e   : > { %5094 = vmatmul.mubr.msk.bf16.gmra.mxu0 %vm651_vm2, %v860_v53 }
  0x8f   : > { %5164 = vmatmul.mubr.msk.bf16.gmra.mxu1 %vm651_vm2, %v6492_v54  ;;  %5097 = vmatprep.mubr.msk.bf16.mxu0 %vm5943_vm1, %v7851_v2 }
  0x90   : > { %5167 = vmatprep.mubr.msk.bf16.mxu1 %vm5943_vm1, %v7851_v2 }
  0x96   : > { %5098 = vmatmul.mubr.msk.bf16.gmra.mxu0 %vm651_vm2, %v861_v59  ;;  %v1330_v59 = vld [vmem:[#allocation2 + $0xb2] sm:$0xff] }
  0x97   : > { %5168 = vmatmul.mubr.msk.bf16.gmra.mxu1 %vm651_vm2, %v6501_v60  ;;  %5101 = vmatprep.mubr.msk.bf16.mxu0 %vm5943_vm1, %v7851_v2 }
  0x98   : > { %5171 = vmatprep.mubr.msk.bf16.mxu1 %vm5943_vm1, %v7851_v2 }
  0x9e   : > { %5102 = vmatmul.mubr.msk.bf16.gmra.mxu0 %vm651_vm2, %v862_v4  ;;  %v1332_v4 = vld [vmem:[#allocation2 + $0xca] sm:$0xff] }
  0x9f   : > { %5172 = vmatmul.mubr.msk.bf16.gmra.mxu1 %vm651_vm2, %v6510_v7  ;;  %5105 = vmatprep.mubr.msk.bf16.mxu0 %vm5943_vm1, %v7851_v2 }
  0xa0   : > { %5175 = vmatprep.mubr.msk.bf16.mxu1 %vm5943_vm1, %v7851_v2 }
  0xa6   : > { %5106 = vmatmul.mubr.msk.bf16.gmra.mxu0 %vm651_vm2, %v863_v13 }
  0xa7   : > { %5176 = vmatmul.mubr.msk.bf16.gmra.mxu1 %vm651_vm2, %v6519_v14  ;;  %5109 = vmatprep.mubr.msk.bf16.mxu0 %vm5943_vm1, %v7851_v2 }
  0xa8   : > { %5179 = vmatprep.mubr.msk.bf16.mxu1 %vm5943_vm1, %v7851_v2 }
  0xae   : > { %5110 = vmatmul.mubr.msk.bf16.gmra.mxu0 %vm651_vm2, %v864_v20 }
  0xaf   : > { %5180 = vmatmul.mubr.msk.bf16.gmra.mxu1 %vm651_vm2, %v6528_v21  ;;  %5113 = vmatprep.mubr.msk.bf16.mxu0 %vm5943_vm1, %v7851_v2 }
  0xb0   : > { %5183 = vmatprep.mubr.msk.bf16.mxu1 %vm5943_vm1, %v7851_v2 }
  0xb6   : > { %5114 = vmatmul.mubr.msk.bf16.gmra.mxu0 %vm651_vm2, %v865_v31 }
  0xb7   : > { %5184 = vmatmul.mubr.msk.bf16.gmra.mxu1 %vm651_vm2, %v6540_v32  ;;  %5189 = vmatprep.mubr.msk.bf16.mxu0 %vm5943_vm1, %v7851_v2 }
  0xb8   : > { %5259 = vmatprep.mubr.msk.bf16.mxu1 %vm5943_vm1, %v7851_v2 }
  0xbe   : > { %5190 = vmatmul.mubr.msk.bf16.vlgmr.msra.gmra.mxu0 %vm651_vm2, %v1349_v6  ;;  %v1336_v6 = vld [vmem:[#allocation2 + $0xfa] sm:$0xff] }
  0xbf   : > { %5260 = vmatmul.mubr.msk.bf16.vlgmr.msra.gmra.mxu1 %vm651_vm2, %v6300_v0  ;;  %5193 = vmatprep.mubr.msk.bf16.mxu0 %vm5943_vm1, %v7851_v2  ;;  %v1319_v0 = vld [vmem:[#allocation2 + $0x32] sm:$0xff]  ;;  %v6673_v45 = vpack.c.bf16 %v1336_v6, %v1335_v38 }
  0xc0   : > { %5263 = vmatprep.mubr.msk.bf16.mxu1 %vm5943_vm1, %v7851_v2  ;;  %5328 = vmatpush3.bf16.msra.mxu0 %v2041_v40  ;;  %v6583_v49 = vpack.c.bf16 %v1320_v47, %v1319_v0 }
  0xc1   : > { %5467 = vmatprep.subr.bf16.mxu0 %v7851_v2  ;;  %5398 = vmatpush3.bf16.msra.mxu1 %v2351_v46 }
  0xc2   : > { %5537 = vmatprep.subr.bf16.mxu1 %v7851_v2 }
  0xc6   : > { %5194 = vmatmul.mubr.msk.bf16.gmra.mxu0 %vm651_vm2, %v6568_v44 }
  0xc7   : > { %5264 = vmatmul.mubr.msk.bf16.gmra.mxu1 %vm651_vm2, %v6355_v36  ;;  %5197 = vmatprep.mubr.msk.bf16.mxu0 %vm5943_vm1, %v7851_v2  ;;  %v1321_v36 = vld [vmem:[#allocation2 + $0x4a] sm:$0xff] }
  0xc8   : > { %5267 = vmatprep.mubr.msk.bf16.mxu1 %vm5943_vm1, %v7851_v2  ;;  %v6593_v51 = vpack.c.bf16 %v1322_v50, %v1321_v36 }
  0xce   : > { %5198 = vmatmul.mubr.msk.bf16.gmra.mxu0 %vm651_vm2, %v6583_v49 }
  0xcf   : > { %5268 = vmatmul.mubr.msk.bf16.gmra.mxu1 %vm651_vm2, %v6415_v3  ;;  %5201 = vmatprep.mubr.msk.bf16.mxu0 %vm5943_vm1, %v7851_v2  ;;  %v1323_v3 = vld [vmem:[#allocation2 + $0x62] sm:$0xff] }
  0xd0   : > { %5271 = vmatprep.mubr.msk.bf16.mxu1 %vm5943_vm1, %v7851_v2  ;;  %v6603_v53 = vpack.c.bf16 %v1324_v52, %v1323_v3  ;;  %v1337_v3 = vld [vmem:[#allocation2 + $0x10a] sm:$0xff]  ;;  %v1338_v52 = vld [vmem:[#allocation2 + $0x112] sm:$0xff] }
  0xd6   : > { %5202 = vmatmul.mubr.msk.bf16.gmra.mxu0 %vm651_vm2, %v6593_v51 }
  0xd7   : > { %5272 = vmatmul.mubr.msk.bf16.gmra.mxu1 %vm651_vm2, %v6429_v11  ;;  %5205 = vmatprep.mubr.msk.bf16.mxu0 %vm5943_vm1, %v7851_v2  ;;  %v1325_v11 = vld [vmem:[#allocation2 + $0x7a] sm:$0xff] }
  0xd8   : > { %5275 = vmatprep.mubr.msk.bf16.mxu1 %vm5943_vm1, %v7851_v2  ;;  %v6613_v56 = vpack.c.bf16 %v1326_v55, %v1325_v11 }
  0xde   : > { %5206 = vmatmul.mubr.msk.bf16.gmra.mxu0 %vm651_vm2, %v6603_v53 }
  0xdf   : > { %5276 = vmatmul.mubr.msk.bf16.gmra.mxu1 %vm651_vm2, %v6438_v17  ;;  %5209 = vmatprep.mubr.msk.bf16.mxu0 %vm5943_vm1, %v7851_v2  ;;  %v1327_v17 = vld [vmem:[#allocation2 + $0x92] sm:$0xff] }
  0xe0   : > { %5279 = vmatprep.mubr.msk.bf16.mxu1 %vm5943_vm1, %v7851_v2  ;;  %v6623_v58 = vpack.c.bf16 %v1328_v57, %v1327_v17 }
  0xe6   : > { %5210 = vmatmul.mubr.msk.bf16.gmra.mxu0 %vm651_vm2, %v6613_v56 }
  0xe7   : > { %5280 = vmatmul.mubr.msk.bf16.gmra.mxu1 %vm651_vm2, %v6447_v23  ;;  %5213 = vmatprep.mubr.msk.bf16.mxu0 %vm5943_vm1, %v7851_v2  ;;  %v1329_v23 = vld [vmem:[#allocation2 + $0xaa] sm:$0xff] }
  0xe8   : > { %5283 = vmatprep.mubr.msk.bf16.mxu1 %vm5943_vm1, %v7851_v2  ;;  %v6633_v61 = vpack.c.bf16 %v1330_v59, %v1329_v23  ;;  %v6687_v23 = vpack.c.bf16 %v1338_v52, %v1337_v3 }
  0xee   : > { %5214 = vmatmul.mubr.msk.bf16.gmra.mxu0 %vm651_vm2, %v6623_v58 }
  0xef   : > { %5284 = vmatmul.mubr.msk.bf16.gmra.mxu1 %vm651_vm2, %v6456_v29  ;;  %5217 = vmatprep.mubr.msk.bf16.mxu0 %vm5943_vm1, %v7851_v2  ;;  %v1331_v29 = vld [vmem:[#allocation2 + $0xc2] sm:$0xff] }
  0xf0   : > { %5287 = vmatprep.mubr.msk.bf16.mxu1 %vm5943_vm1, %v7851_v2  ;;  %v6645_v13 = vpack.c.bf16 %v1332_v4, %v1331_v29 }
  0xf6   : > { %v957_v62 = vpop.f32.mrf.mxu0  ;;  %5218 = vmatmul.mubr.msk.bf16.gmra.mxu0 %vm651_vm2, %v6633_v61 }
  0xf7   : > { %v1180_v63 = vpop.f32.mrf.mxu1  ;;  %5288 = vmatmul.mubr.msk.bf16.gmra.mxu1 %vm651_vm2, %v6465_v35  ;;  %5221 = vmatprep.mubr.msk.bf16.mxu0 %vm5943_vm1, %v7851_v2 }
  0xf8   : > { %v6639_v1 = vadd.f32 %v1180_v63, %v957_v62  ;;  %5291 = vmatprep.mubr.msk.bf16.mxu1 %vm5943_vm1, %v7851_v2  ;;  %v5051_v8 = vpop.f32.mrf.mxu0 }
  0xf9   : > { %v5121_v9 = vpop.f32.mrf.mxu1  ;;  %v1339_v8 = vld [vmem:[#allocation2 + $0x122] sm:$0xff] }
  0xfa   : > { %v960_v10 = vpop.f32.mrf.mxu0  ;;  %v1340_v9 = vld [vmem:[#allocation2 + $0x12a] sm:$0xff] }
  0xfb   : > { %v1183_v12 = vpop.f32.mrf.mxu1 }
  0xfc   : > { %v6647_v15 = vadd.f32 %v1183_v12, %v960_v10  ;;  %v5052_v16 = vpop.f32.mrf.mxu0 }
  0xfd   : > { %v5122_v35 = vpop.f32.mrf.mxu1 }
  0xfe   : > { %v965_v18 = vpop.f32.mrf.mxu0  ;;  %5222 = vmatmul.mubr.msk.bf16.gmra.mxu0 %vm651_vm2, %v6645_v13 }
  0xff   : > { %v1188_v19 = vpop.f32.mrf.mxu1  ;;  %5292 = vmatmul.mubr.msk.bf16.gmra.mxu1 %vm651_vm2, %v6474_v42  ;;  %5225 = vmatprep.mubr.msk.bf16.mxu0 %vm5943_vm1, %v7851_v2 }
 0x100   : > { %v6653_v20 = vadd.f32 %v1188_v19, %v965_v18  ;;  %5295 = vmatprep.mubr.msk.bf16.mxu1 %vm5943_vm1, %v7851_v2  ;;  %v5055_v25 = vpop.f32.mrf.mxu0  ;;  %v6701_v18 = vpack.c.bf16 %v1340_v9, %v1339_v8 }
 0x101   : > { %v5125_v26 = vpop.f32.mrf.mxu1 }
 0x102   : > { %v968_v27 = vpop.f32.mrf.mxu0 }
 0x103   : > { %v1191_v28 = vpop.f32.mrf.mxu1 }
 0x104   : > { %v6661_v31 = vadd.f32 %v1191_v28, %v968_v27  ;;  %v5056_v33 = vpop.f32.mrf.mxu0  ;;  %v1341_v27 = vld [vmem:[#allocation2 + $0x13a] sm:$0xff]  ;;  %v1342_v28 = vld [vmem:[#allocation2 + $0x142] sm:$0xff] }
 0x105   : > { %v5126_v42 = vpop.f32.mrf.mxu1  ;;  %v6715_v38 = vpack.c.bf16 %v1342_v28, %v1341_v27  ;;  %v1348_v27 = vld [vmem:[#allocation2 + $0x18a] sm:$0xff] }
 0x106   : > { %v973_v34 = vpop.f32.mrf.mxu0  ;;  %5226 = vmatmul.mubr.msk.bf16.gmra.mxu0 %vm651_vm2, %v6659_v30 }
 0x107   : > { %v1196_v37 = vpop.f32.mrf.mxu1  ;;  %5296 = vmatmul.mubr.msk.bf16.gmra.mxu1 %vm651_vm2, %v6483_v48  ;;  %5229 = vmatprep.mubr.msk.bf16.mxu0 %vm5943_vm1, %v7851_v2 }
 0x108   : > { %v6667_v5 = vadd.f32 %v1196_v37, %v973_v34  ;;  %5299 = vmatprep.mubr.msk.bf16.mxu1 %vm5943_vm1, %v7851_v2  ;;  %v5059_v39 = vpop.f32.mrf.mxu0 }
 0x109   : > { %v5129_v40 = vpop.f32.mrf.mxu1 }
 0x10a   : > { %v976_v41 = vpop.f32.mrf.mxu0 }
 0x10b   : > { %v1199_v43 = vpop.f32.mrf.mxu1 }
 0x10c   : > { %v6675_v46 = vadd.f32 %v1199_v43, %v976_v41  ;;  %v5060_v0 = vpop.f32.mrf.mxu0 }
 0x10d   : > { %v5130_v48 = vpop.f32.mrf.mxu1  ;;  %v1343_v0 = vld [vmem:[#allocation2 + $0x152] sm:$0xff] }
 0x10e   : > { %v981_v47 = vpop.f32.mrf.mxu0  ;;  %5230 = vmatmul.mubr.msk.bf16.gmra.mxu0 %vm651_vm2, %v6673_v45  ;;  %v1344_v48 = vld [vmem:[#allocation2 + $0x15a] sm:$0xff] }
 0x10f   : > { %v1204_v36 = vpop.f32.mrf.mxu1  ;;  %5300 = vmatmul.mubr.msk.bf16.gmra.mxu1 %vm651_vm2, %v6492_v54  ;;  %5233 = vmatprep.mubr.msk.bf16.mxu0 %vm5943_vm1, %v7851_v2 }
 0x110   : > { %v6681_v50 = vadd.f32 %v1204_v36, %v981_v47  ;;  %5303 = vmatprep.mubr.msk.bf16.mxu1 %vm5943_vm1, %v7851_v2  ;;  %v5063_v11 = vpop.f32.mrf.mxu0 }
 0x111   : > { %v5133_v55 = vpop.f32.mrf.mxu1  ;;  %v6729_v11 = vpack.c.bf16 %v1344_v48, %v1343_v0 }
 0x112   : > { %v984_v17 = vpop.f32.mrf.mxu0 }
 0x113   : > { %v1207_v57 = vpop.f32.mrf.mxu1 }
 0x114   : > { %v6689_v59 = vadd.f32 %v1207_v57, %v984_v17  ;;  %v5064_v62 = vpop.f32.mrf.mxu0 }
 0x115   : > { %v5134_v54 = vpop.f32.mrf.mxu1 }
 0x116   : > { %v989_v63 = vpop.f32.mrf.mxu0  ;;  %5234 = vmatmul.mubr.msk.bf16.gmra.mxu0 %vm651_vm2, %v6687_v23 }
 0x117   : > { %v1212_v29 = vpop.f32.mrf.mxu1  ;;  %5304 = vmatmul.mubr.msk.bf16.gmra.mxu1 %vm651_vm2, %v6501_v60  ;;  %5237 = vmatprep.mubr.msk.bf16.mxu0 %vm5943_vm1, %v7851_v2 }
 0x118   : > { %v6695_v4 = vadd.f32 %v1212_v29, %v989_v63  ;;  %5307 = vmatprep.mubr.msk.bf16.mxu1 %vm5943_vm1, %v7851_v2  ;;  %v5067_v10 = vpop.f32.mrf.mxu0  ;;  %v1345_v63 = vld [vmem:[#allocation2 + $0x16a] sm:$0xff]  ;;  %v1346_v29 = vld [vmem:[#allocation2 + $0x172] sm:$0xff] }
 0x119   : > { %v5137_v12 = vpop.f32.mrf.mxu1 }
 0x11a   : > { %v992_v16 = vpop.f32.mrf.mxu0 }
 0x11b   : > { %v1215_v35 = vpop.f32.mrf.mxu1 }
 0x11c   : > { %v6703_v19 = vadd.f32 %v1215_v35, %v992_v16  ;;  %v5068_v22 = vpop.f32.mrf.mxu0  ;;  %v6743_v16 = vpack.c.bf16 %v1346_v29, %v1345_v63  ;;  %v1936_v63 = vld [vmem:[#allocation2 + $0x19] sm:$0xff]  ;;  %v1937_v29 = vld [vmem:[#allocation2 + $0x21] sm:$0xff] }
 0x11d   : > { %v5138_v60 = vpop.f32.mrf.mxu1 }
 0x11e   : > { %v997_v24 = vpop.f32.mrf.mxu0  ;;  %5238 = vmatmul.mubr.msk.bf16.gmra.mxu0 %vm651_vm2, %v6701_v18 }
 0x11f   : > { %v1220_v25 = vpop.f32.mrf.mxu1  ;;  %5308 = vmatmul.mubr.msk.bf16.gmra.mxu1 %vm651_vm2, %v6510_v7  ;;  %5241 = vmatprep.mubr.msk.bf16.mxu0 %vm5943_vm1, %v7851_v2 }
 0x120   : > { %v6709_v26 = vadd.f32 %v1220_v25, %v997_v24  ;;  %5311 = vmatprep.mubr.msk.bf16.mxu1 %vm5943_vm1, %v7851_v2  ;;  %v5071_v33 = vpop.f32.mrf.mxu0  ;;  %v1347_v25 = vld [vmem:[#allocation2 + $0x182] sm:$0xff] }
 0x121   : > { %v5141_v42 = vpop.f32.mrf.mxu1  ;;  %v1658_v33 = vld [vmem:[#allocation2 + $0x198] sm:$0xff]  ;;  %v6764_v0 = vpack.c.bf16 %v1348_v27, %v1347_v25 }
 0x122   : > { %v1000_v34 = vpop.f32.mrf.mxu0  ;;  %v1659_v42 = vld [vmem:[#allocation2 + $0x1a0] sm:$0xff] }
 0x123   : > { %v1223_v37 = vpop.f32.mrf.mxu1  ;;  %v1676_v48 = vpack.c.bf16 %v1659_v42, %v1658_v33 }
 0x124   : > { %v6717_v6 = vadd.f32 %v1223_v37, %v1000_v34  ;;  %v5072_v39 = vpop.f32.mrf.mxu0  ;;  %v519_v34 = vld [vmem:[%s6095_s19 + $0x1a8] sm:$0x3] }
 0x125   : > { %v5142_v7 = vpop.f32.mrf.mxu1 }
 0x126   : > { %v1005_v40 = vpop.f32.mrf.mxu0  ;;  %5242 = vmatmul.mubr.msk.bf16.gmra.mxu0 %vm651_vm2, %v6715_v38  ;;  %v6761_v7 = vld [vmem:[%s7859_s1] ss:$0 sm:$0xff] }
 0x127   : > { %v1228_v41 = vpop.f32.mrf.mxu1  ;;  %5312 = vmatmul.mubr.msk.bf16.gmra.mxu1 %vm651_vm2, %v6519_v14  ;;  %5245 = vmatprep.mubr.msk.bf16.mxu0 %vm5943_vm1, %v7851_v2 }
 0x128   : > { %v6723_v43 = vadd.f32 %v1228_v41, %v1005_v40  ;;  %5315 = vmatprep.mubr.msk.bf16.mxu1 %vm5943_vm1, %v7851_v2  ;;  %v5075_v47 = vpop.f32.mrf.mxu0 }
 0x129   : > { %v5145_v36 = vpop.f32.mrf.mxu1  ;;  %v6769_v47 = vld [vmem:[%s7861_s2] ss:$0 sm:$0xff] }
 0x12a   : > { %v1008_v3 = vpop.f32.mrf.mxu0 }
 0x12b   : > { %v1231_v52 = vpop.f32.mrf.mxu1 }
 0x12c   : > { %v6731_v55 = vadd.f32 %v1231_v52, %v1008_v3  ;;  %v5076_v17 = vpop.f32.mrf.mxu0 }
 0x12d   : > { %v5146_v14 = vpop.f32.mrf.mxu1 }
 0x12e   : > { %v1013_v57 = vpop.f32.mrf.mxu0  ;;  %5246 = vmatmul.mubr.msk.bf16.gmra.mxu0 %vm651_vm2, %v6729_v11 }
 0x12f   : > { %v1236_v62 = vpop.f32.mrf.mxu1  ;;  %5316 = vmatmul.mubr.msk.bf16.gmra.mxu1 %vm651_vm2, %v6528_v21  ;;  %5249 = vmatprep.mubr.msk.bf16.mxu0 %vm5943_vm1, %v7851_v2 }
 0x130   : > { %v6737_v54 = vadd.f32 %v1236_v62, %v1013_v57  ;;  %5319 = vmatprep.mubr.msk.bf16.mxu1 %vm5943_vm1, %v7851_v2  ;;  %v5079_v8 = vpop.f32.mrf.mxu0 }
 0x131   : > { %v5149_v9 = vpop.f32.mrf.mxu1 }
 0x132   : > { %v1016_v10 = vpop.f32.mrf.mxu0 }
 0x133   : > { %v1239_v12 = vpop.f32.mrf.mxu1 }
 0x134   : > { %v6745_v35 = vadd.f32 %v1239_v12, %v1016_v10  ;;  %v5080_v21 = vpop.f32.mrf.mxu0 }
 0x135   : > { %v5150_v22 = vpop.f32.mrf.mxu1  ;;  %v1970_v21 = vpack.c.bf16 %v1937_v29, %v1936_v63 }
 0x136   : > { %v1021_v60 = vpop.f32.mrf.mxu0  ;;  %5250 = vmatmul.mubr.msk.bf16.gmra.mxu0 %vm651_vm2, %v6743_v16  ;;  %v4753_v22 = vld [vmem:[%s7838_s3 + $0xc] sm:$0x3] }
 0x137   : > { %v1244_v24 = vpop.f32.mrf.mxu1  ;;  %5320 = vmatmul.mubr.msk.bf16.gmra.mxu1 %vm651_vm2, %v6540_v32  ;;  %5253 = vmatprep.mubr.msk.bf16.mxu0 %vm5943_vm1, %v7851_v2  ;;  %v583_v32 = vmul.f32 %v6761_v7, %v519_v34  ;;  %v2662_v27 = vsel %vm919_vm0, %v4753_v22, 0 }
 0x138   : > { %v6751_v28 = vadd.f32 %v1244_v24, %v1021_v60  ;;  %5323 = vmatprep.mubr.msk.bf16.mxu1 %vm5943_vm1, %v7851_v2  ;;  %v5083_v37 = vpop.f32.mrf.mxu0 }
 0x139   : > { %v5153_v39 = vpop.f32.mrf.mxu1  ;;  %v647_v36 = vadd.f32 %v6769_v47, %v583_v32  ;;  %v1938_v37 = vld [vmem:[#allocation2 + $0x31] sm:$0xff] }
 0x13a   : > { %v1024_v40 = vpop.f32.mrf.mxu0  ;;  %v1939_v39 = vld [vmem:[#allocation2 + $0x39] sm:$0xff] }
 0x13b   : > { %v1247_v41 = vpop.f32.mrf.mxu1  ;;  %706 = vst.msk [vmem:[#allocation2 + $0x1a8] sm:$0x3] %vm654_vm3, %v647_v36  ;;  %v6802_v36 = vpack.c.bf16 %v1939_v39, %v1938_v37 }
 0x13c   : > { %v6772_v3 = vadd.f32 %v1247_v41, %v1024_v40  ;;  %v5084_v52 = vpop.f32.mrf.mxu0  ;;  %747 = vst.msk [vmem:[#allocation2 + $0x1a9] sm:$0x1] %vm710_vm4, %v7851_v2 }
 0x13d   : > { %v5154_v17 = vpop.f32.mrf.mxu1  ;;  %v4771_v52 = vld [vmem:[%s7838_s3 + $0xe] sm:$0x3] }
 0x13e   : > { %v1029_v14 = vpop.f32.mrf.mxu0  ;;  %5254 = vmatmul.mubr.msk.bf16.gmra.mxu0 %vm651_vm2, %v6764_v0 }
 0x13f   : > { %v1252_v57 = vpop.f32.mrf.mxu1  ;;  %5324 = vmatmul.mubr.msk.bf16.gmra.mxu1 %vm651_vm2, %v1676_v48  ;;  %5329 = vmatprep.mubr.msk.bf16.mxu0 %vm5943_vm1, %v7851_v2 }
 0x140   : > { %v6780_v62 = vadd.f32 %v1252_v57, %v1029_v14  ;;  %5399 = vmatprep.mubr.msk.bf16.mxu1 %vm5943_vm1, %v7851_v2  ;;  %v5087_v8 = vpop.f32.mrf.mxu0  ;;  %v2972_v57 = vsel %vm919_vm0, %v4771_v52, 0 }
 0x141   : > { %v5157_v9 = vpop.f32.mrf.mxu1 }
 0x142   : > { %v1032_v10 = vpop.f32.mrf.mxu0  ;;  %v1940_v9 = vld [vmem:[#allocation2 + $0x49] sm:$0xff] }
 0x143   : > { %v1255_v12 = vpop.f32.mrf.mxu1 }
 0x144   : > { %v6789_v60 = vadd.f32 %v1255_v12, %v1032_v10  ;;  %v5088_v24 = vpop.f32.mrf.mxu0  ;;  %v1941_v10 = vld [vmem:[#allocation2 + $0x51] sm:$0xff] }
 0x145   : > { %v5158_v25 = vpop.f32.mrf.mxu1 }
 0x146   : > { %v1037_v33 = vpop.f32.mrf.mxu0  ;;  %5330 = vmatmul.mubr.msk.bf16.vlgmr.msra.gmra.mxu0 %vm651_vm2, %v1970_v21  ;;  %v6821_v25 = vpack.c.bf16 %v1941_v10, %v1940_v9 }
 0x147   : > { %v1260_v42 = vpop.f32.mrf.mxu1  ;;  %5400 = vmatmul.mubr.msk.bf16.vlgmr.msra.gmra.mxu1 %vm651_vm2, %v6568_v44  ;;  %5333 = vmatprep.mubr.msk.bf16.mxu0 %vm5943_vm1, %v7851_v2 }
 0x148   : > { %v6795_v34 = vadd.f32 %v1260_v42, %v1037_v33  ;;  %5403 = vmatprep.mubr.msk.bf16.mxu1 %vm5943_vm1, %v7851_v2  ;;  %v5091_v32 = vpop.f32.mrf.mxu0  ;;  %5468 = vmatpush3.bf16.msra.mxu0 %v2662_v27 }
 0x149   : > { %v5161_v40 = vpop.f32.mrf.mxu1  ;;  %5607 = vmatprep.subr.bf16.mxu0 %v7851_v2  ;;  %5538 = vmatpush3.bf16.msra.mxu1 %v2972_v57  ;;  %v1942_v32 = vld [vmem:[#allocation2 + $0x61] sm:$0xff] }
 0x14a   : > { %v1040_v41 = vpop.f32.mrf.mxu0  ;;  %5677 = vmatprep.subr.bf16.mxu1 %v7851_v2  ;;  %v1943_v40 = vld [vmem:[#allocation2 + $0x69] sm:$0xff] }
 0x14b   : > { %v1263_v48 = vpop.f32.mrf.mxu1 }
 0x14c   : > { %v6804_v44 = vadd.f32 %v1263_v48, %v1040_v41  ;;  %v5092_v17 = vpop.f32.mrf.mxu0 }
 0x14d   : > { %v5162_v14 = vpop.f32.mrf.mxu1 }
 0x14e   : > { %v1045_v63 = vpop.f32.mrf.mxu0  ;;  %5334 = vmatmul.mubr.msk.bf16.gmra.mxu0 %vm651_vm2, %v6802_v36  ;;  %v6835_v14 = vpack.c.bf16 %v1943_v40, %v1942_v32 }
 0x14f   : > { %v1268_v29 = vpop.f32.mrf.mxu1  ;;  %5404 = vmatmul.mubr.msk.bf16.gmra.mxu1 %vm651_vm2, %v6583_v49  ;;  %5337 = vmatprep.mubr.msk.bf16.mxu0 %vm5943_vm1, %v7851_v2 }
 0x150   : > { %v6814_v8 = vadd.f32 %v1268_v29, %v1045_v63  ;;  %5407 = vmatprep.mubr.msk.bf16.mxu1 %vm5943_vm1, %v7851_v2  ;;  %v5095_v12 = vpop.f32.mrf.mxu0 }
 0x151   : > { %v5165_v21 = vpop.f32.mrf.mxu1  ;;  %v1944_v12 = vld [vmem:[#allocation2 + $0x79] sm:$0xff] }
 0x152   : > { %v1048_v22 = vpop.f32.mrf.mxu0  ;;  %v1945_v21 = vld [vmem:[#allocation2 + $0x81] sm:$0xff] }
 0x153   : > { %v1271_v24 = vpop.f32.mrf.mxu1 }
 0x154   : > { %v6823_v27 = vadd.f32 %v1271_v24, %v1048_v22  ;;  %v5096_v49 = vpop.f32.mrf.mxu0 }
 0x155   : > { %v5166_v33 = vpop.f32.mrf.mxu1 }
 0x156   : > { %v1053_v42 = vpop.f32.mrf.mxu0  ;;  %5338 = vmatmul.mubr.msk.bf16.gmra.mxu0 %vm651_vm2, %v6821_v25 }
 0x157   : > { %v1276_v37 = vpop.f32.mrf.mxu1  ;;  %5408 = vmatmul.mubr.msk.bf16.gmra.mxu1 %vm651_vm2, %v6593_v51  ;;  %5341 = vmatprep.mubr.msk.bf16.mxu0 %vm5943_vm1, %v7851_v2 }
 0x158   : > { %v6829_v39 = vadd.f32 %v1276_v37, %v1053_v42  ;;  %5411 = vmatprep.mubr.msk.bf16.mxu1 %vm5943_vm1, %v7851_v2  ;;  %v5099_v41 = vpop.f32.mrf.mxu0  ;;  %v6849_v42 = vpack.c.bf16 %v1945_v21, %v1944_v12 }
 0x159   : > { %v5169_v48 = vpop.f32.mrf.mxu1 }
 0x15a   : > { %v1056_v52 = vpop.f32.mrf.mxu0 }
 0x15b   : > { %v1279_v17 = vpop.f32.mrf.mxu1 }
 0x15c   : > { %v6837_v57 = vadd.f32 %v1279_v17, %v1056_v52  ;;  %v5100_v63 = vpop.f32.mrf.mxu0  ;;  %v1946_v52 = vld [vmem:[#allocation2 + $0x91] sm:$0xff]  ;;  %v1947_v17 = vld [vmem:[#allocation2 + $0x99] sm:$0xff] }
 0x15d   : > { %v5170_v51 = vpop.f32.mrf.mxu1  ;;  %v6863_v12 = vpack.c.bf16 %v1947_v17, %v1946_v52 }
 0x15e   : > { %v1061_v29 = vpop.f32.mrf.mxu0  ;;  %5342 = vmatmul.mubr.msk.bf16.gmra.mxu0 %vm651_vm2, %v6835_v14 }
 0x15f   : > { %v1284_v9 = vpop.f32.mrf.mxu1  ;;  %5412 = vmatmul.mubr.msk.bf16.gmra.mxu1 %vm651_vm2, %v6603_v53  ;;  %5345 = vmatprep.mubr.msk.bf16.mxu0 %vm5943_vm1, %v7851_v2 }
 0x160   : > { %v6843_v10 = vadd.f32 %v1284_v9, %v1061_v29  ;;  %5415 = vmatprep.mubr.msk.bf16.mxu1 %vm5943_vm1, %v7851_v2  ;;  %v5103_v22 = vpop.f32.mrf.mxu0 }
 0x161   : > { %v5173_v24 = vpop.f32.mrf.mxu1 }
 0x162   : > { %v1064_v49 = vpop.f32.mrf.mxu0 }
 0x163   : > { %v1287_v33 = vpop.f32.mrf.mxu1 }
 0x164   : > { %v6851_v37 = vadd.f32 %v1287_v33, %v1064_v49  ;;  %v5104_v32 = vpop.f32.mrf.mxu0 }
 0x165   : > { %v5174_v53 = vpop.f32.mrf.mxu1  ;;  %v1948_v32 = vld [vmem:[#allocation2 + $0xa9] sm:$0xff] }
 0x166   : > { %v1069_v40 = vpop.f32.mrf.mxu0  ;;  %5346 = vmatmul.mubr.msk.bf16.gmra.mxu0 %vm651_vm2, %v6849_v42  ;;  %v1949_v53 = vld [vmem:[#allocation2 + $0xb1] sm:$0xff] }
 0x167   : > { %v1292_v41 = vpop.f32.mrf.mxu1  ;;  %5416 = vmatmul.mubr.msk.bf16.gmra.mxu1 %vm651_vm2, %v6613_v56  ;;  %5349 = vmatprep.mubr.msk.bf16.mxu0 %vm5943_vm1, %v7851_v2 }
 0x168   : > { %v6857_v48 = vadd.f32 %v1292_v41, %v1069_v40  ;;  %5419 = vmatprep.mubr.msk.bf16.mxu1 %vm5943_vm1, %v7851_v2  ;;  %v5107_v63 = vpop.f32.mrf.mxu0 }
 0x169   : > { %v5177_v51 = vpop.f32.mrf.mxu1  ;;  %v6877_v63 = vpack.c.bf16 %v1949_v53, %v1948_v32 }
 0x16a   : > { %v1072_v29 = vpop.f32.mrf.mxu0 }
 0x16b   : > { %v1295_v9 = vpop.f32.mrf.mxu1 }
 0x16c   : > { %v6865_v21 = vadd.f32 %v1295_v9, %v1072_v29  ;;  %v5108_v22 = vpop.f32.mrf.mxu0 }
 0x16d   : > { %v5178_v56 = vpop.f32.mrf.mxu1 }
 0x16e   : > { %v1077_v24 = vpop.f32.mrf.mxu0  ;;  %5350 = vmatmul.mubr.msk.bf16.gmra.mxu0 %vm651_vm2, %v6863_v12 }
 0x16f   : > { %v1300_v49 = vpop.f32.mrf.mxu1  ;;  %5420 = vmatmul.mubr.msk.bf16.gmra.mxu1 %vm651_vm2, %v6623_v58  ;;  %5353 = vmatprep.mubr.msk.bf16.mxu0 %vm5943_vm1, %v7851_v2 }
 0x170   : > { %v6871_v33 = vadd.f32 %v1300_v49, %v1077_v24  ;;  %5423 = vmatprep.mubr.msk.bf16.mxu1 %vm5943_vm1, %v7851_v2  ;;  %v5111_v40 = vpop.f32.mrf.mxu0  ;;  %v1950_v24 = vld [vmem:[#allocation2 + $0xc1] sm:$0xff]  ;;  %v1951_v49 = vld [vmem:[#allocation2 + $0xc9] sm:$0xff] }
 0x171   : > { %v5181_v41 = vpop.f32.mrf.mxu1 }
 0x172   : > { %v1080_v52 = vpop.f32.mrf.mxu0 }
 0x173   : > { %v1303_v17 = vpop.f32.mrf.mxu1 }
 0x174   : > { %v6879_v51 = vadd.f32 %v1303_v17, %v1080_v52  ;;  %v5112_v29 = vpop.f32.mrf.mxu0  ;;  %v6891_v52 = vpack.c.bf16 %v1951_v49, %v1950_v24  ;;  %v1953_v24 = vld [vmem:[#allocation2 + $0xe1] sm:$0xff] }
 0x175   : > { %v5182_v58 = vpop.f32.mrf.mxu1 }
 0x176   : > { %v1085_v9 = vpop.f32.mrf.mxu0  ;;  %5354 = vmatmul.mubr.msk.bf16.gmra.mxu0 %vm651_vm2, %v6877_v63  ;;  %7863 = vst [vmem:[#allocation9_spill] sm:$0xff] %v6891_v52 }
 0x177   : > { %v1308_v22 = vpop.f32.mrf.mxu1  ;;  %5424 = vmatmul.mubr.msk.bf16.gmra.mxu1 %vm651_vm2, %v6633_v61  ;;  %5357 = vmatprep.mubr.msk.bf16.mxu0 %vm5943_vm1, %v7851_v2 }
 0x178   : > { %v6885_v56 = vadd.f32 %v1308_v22, %v1085_v9  ;;  %5427 = vmatprep.mubr.msk.bf16.mxu1 %vm5943_vm1, %v7851_v2  ;;  %v5115_v32 = vpop.f32.mrf.mxu0 }
 0x179   : > { %v5185_v53 = vpop.f32.mrf.mxu1  ;;  %v1952_v32 = vld [vmem:[#allocation2 + $0xd9] sm:$0xff] }
 0x17a   : > { %7862 = vst [vmem:[#allocation8_spill] sm:$0xff] %v6885_v56  ;;  %v1088_v40 = vpop.f32.mrf.mxu0 }
 0x17b   : > { %v1311_v41 = vpop.f32.mrf.mxu1 }
 0x17c   : > { %v6893_v17 = vadd.f32 %v1311_v41, %v1088_v40  ;;  %v5116_v29 = vpop.f32.mrf.mxu0 }
 0x17d   : > { %v5186_v61 = vpop.f32.mrf.mxu1 }
 0x17e   : > { %7864 = vst [vmem:[#allocation10_spill] sm:$0xff] %v6893_v17  ;;  %v1456_v58 = vpop.f32.mrf.mxu0  ;;  %5358 = vmatmul.mubr.msk.bf16.gmra.mxu0 %vm651_vm2, %v6891_v52  ;;  %v6906_v61 = vpack.c.bf16 %v1953_v24, %v1952_v32  ;;  %v1955_v32 = vld [vmem:[#allocation2 + $0xf9] sm:$0xff] }
 0x17f   : > { %v1767_v9 = vpop.f32.mrf.mxu1  ;;  %5428 = vmatmul.mubr.msk.bf16.gmra.mxu1 %vm651_vm2, %v6645_v13  ;;  %v1591_v22 = vadd.f32 %v1456_v58, %v6639_v1  ;;  %5361 = vmatprep.mubr.msk.bf16.mxu0 %vm5943_vm1, %v7851_v2 }
 0x180   : > { %5431 = vmatprep.mubr.msk.bf16.mxu1 %vm5943_vm1, %v7851_v2  ;;  %v5191_v49 = vpop.f32.mrf.mxu0 }
 0x181   : > { %v5261_v53 = vpop.f32.mrf.mxu1  ;;  %v6904_v40 = vadd.f32 %v1767_v9, %v1591_v22  ;;  %v1954_v22 = vld [vmem:[#allocation2 + $0xf1] sm:$0xff] }
 0x182   : > { %v1459_v41 = vpop.f32.mrf.mxu0 }
 0x183   : > { %v1770_v29 = vpop.f32.mrf.mxu1  ;;  %v1592_v13 = vadd.f32 %v1459_v41, %v6647_v15  ;;  %v6922_v41 = vpack.c.bf16 %v1955_v32, %v1954_v22  ;;  %v1957_v22 = vld [vmem:[#allocation2 + $0x111] sm:$0xff] }
 0x184   : > { %v5192_v17 = vpop.f32.mrf.mxu0 }
 0x185   : > { %v5262_v1 = vpop.f32.mrf.mxu1  ;;  %v6909_v58 = vadd.f32 %v1770_v29, %v1592_v13 }
 0x186   : > { %v1464_v56 = vpop.f32.mrf.mxu0  ;;  %5362 = vmatmul.mubr.msk.bf16.gmra.mxu0 %vm651_vm2, %v6906_v61 }
 0x187   : > { %v1775_v52 = vpop.f32.mrf.mxu1  ;;  %5432 = vmatmul.mubr.msk.bf16.gmra.mxu1 %vm651_vm2, %v6659_v30  ;;  %v1593_v9 = vadd.f32 %v1464_v56, %v6653_v20  ;;  %5365 = vmatprep.mubr.msk.bf16.mxu0 %vm5943_vm1, %v7851_v2 }
 0x188   : > { %5435 = vmatprep.mubr.msk.bf16.mxu1 %vm5943_vm1, %v7851_v2  ;;  %v5195_v15 = vpop.f32.mrf.mxu0 }
 0x189   : > { %v5265_v17 = vpop.f32.mrf.mxu1  ;;  %v6920_v24 = vadd.f32 %v1775_v52, %v1593_v9  ;;  %v1956_v9 = vld [vmem:[#allocation2 + $0x109] sm:$0xff] }
 0x18a   : > { %v1467_v49 = vpop.f32.mrf.mxu0 }
 0x18b   : > { %v1778_v53 = vpop.f32.mrf.mxu1  ;;  %v1594_v30 = vadd.f32 %v1467_v49, %v6661_v31 }
 0x18c   : > { %v5196_v29 = vpop.f32.mrf.mxu0 }
 0x18d   : > { %v5266_v20 = vpop.f32.mrf.mxu1  ;;  %v6925_v56 = vadd.f32 %v1778_v53, %v1594_v30  ;;  %v6938_v53 = vpack.c.bf16 %v1957_v22, %v1956_v9  ;;  %v1959_v9 = vld [vmem:[#allocation2 + $0x129] sm:$0xff] }
 0x18e   : > { %v1472_v13 = vpop.f32.mrf.mxu0  ;;  %5366 = vmatmul.mubr.msk.bf16.gmra.mxu0 %vm651_vm2, %v6922_v41 }
 0x18f   : > { %v1783_v1 = vpop.f32.mrf.mxu1  ;;  %5436 = vmatmul.mubr.msk.bf16.gmra.mxu1 %vm651_vm2, %v6673_v45  ;;  %v1595_v52 = vadd.f32 %v1472_v13, %v6667_v5  ;;  %5369 = vmatprep.mubr.msk.bf16.mxu0 %vm5943_vm1, %v7851_v2 }
 0x190   : > { %5439 = vmatprep.mubr.msk.bf16.mxu1 %vm5943_vm1, %v7851_v2  ;;  %v5199_v31 = vpop.f32.mrf.mxu0 }
 0x191   : > { %v5269_v32 = vpop.f32.mrf.mxu1  ;;  %v6936_v15 = vadd.f32 %v1783_v1, %v1595_v52  ;;  %v1958_v52 = vld [vmem:[#allocation2 + $0x121] sm:$0xff] }
 0x192   : > { %v1475_v17 = vpop.f32.mrf.mxu0 }
 0x193   : > { %v1786_v49 = vpop.f32.mrf.mxu1  ;;  %v1596_v45 = vadd.f32 %v1475_v17, %v6675_v46 }
 0x194   : > { %v5200_v30 = vpop.f32.mrf.mxu0 }
 0x195   : > { %v5270_v5 = vpop.f32.mrf.mxu1  ;;  %v6941_v29 = vadd.f32 %v1786_v49, %v1596_v45  ;;  %v6954_v49 = vpack.c.bf16 %v1959_v9, %v1958_v52  ;;  %v1961_v52 = vld [vmem:[#allocation2 + $0x141] sm:$0xff] }
 0x196   : > { %v1480_v20 = vpop.f32.mrf.mxu0  ;;  %5370 = vmatmul.mubr.msk.bf16.gmra.mxu0 %vm651_vm2, %v6938_v53 }
 0x197   : > { %v1791_v13 = vpop.f32.mrf.mxu1  ;;  %5440 = vmatmul.mubr.msk.bf16.gmra.mxu1 %vm651_vm2, %v6687_v23  ;;  %v1597_v1 = vadd.f32 %v1480_v20, %v6681_v50  ;;  %5373 = vmatprep.mubr.msk.bf16.mxu0 %vm5943_vm1, %v7851_v2 }
 0x198   : > { %5443 = vmatprep.mubr.msk.bf16.mxu1 %vm5943_vm1, %v7851_v2  ;;  %v5203_v46 = vpop.f32.mrf.mxu0 }
 0x199   : > { %v5273_v22 = vpop.f32.mrf.mxu1  ;;  %v6952_v31 = vadd.f32 %v1791_v13, %v1597_v1  ;;  %v1960_v1 = vld [vmem:[#allocation2 + $0x139] sm:$0xff] }
 0x19a   : > { %v1483_v32 = vpop.f32.mrf.mxu0 }
 0x19b   : > { %v1794_v17 = vpop.f32.mrf.mxu1  ;;  %v1598_v23 = vadd.f32 %v1483_v32, %v6689_v59 }
 0x19c   : > { %v5204_v45 = vpop.f32.mrf.mxu0 }
 0x19d   : > { %v5274_v50 = vpop.f32.mrf.mxu1  ;;  %v6957_v30 = vadd.f32 %v1794_v17, %v1598_v23  ;;  %v6970_v17 = vpack.c.bf16 %v1961_v52, %v1960_v1  ;;  %v1963_v1 = vld [vmem:[#allocation2 + $0x159] sm:$0xff] }
 0x19e   : > { %v1488_v5 = vpop.f32.mrf.mxu0  ;;  %5374 = vmatmul.mubr.msk.bf16.gmra.mxu0 %vm651_vm2, %v6954_v49 }
 0x19f   : > { %v1799_v20 = vpop.f32.mrf.mxu1  ;;  %5444 = vmatmul.mubr.msk.bf16.gmra.mxu1 %vm651_vm2, %v6701_v18  ;;  %v1599_v13 = vadd.f32 %v1488_v5, %v6695_v4  ;;  %5377 = vmatprep.mubr.msk.bf16.mxu0 %vm5943_vm1, %v7851_v2 }
 0x1a0   : > { %5447 = vmatprep.mubr.msk.bf16.mxu1 %vm5943_vm1, %v7851_v2  ;;  %v5207_v59 = vpop.f32.mrf.mxu0 }
 0x1a1   : > { %v5277_v9 = vpop.f32.mrf.mxu1  ;;  %v6968_v46 = vadd.f32 %v1799_v20, %v1599_v13  ;;  %v1962_v13 = vld [vmem:[#allocation2 + $0x151] sm:$0xff] }
 0x1a2   : > { %v1491_v22 = vpop.f32.mrf.mxu0 }
 0x1a3   : > { %v1802_v32 = vpop.f32.mrf.mxu1  ;;  %v1600_v18 = vadd.f32 %v1491_v22, %v6703_v19 }
 0x1a4   : > { %v5208_v23 = vpop.f32.mrf.mxu0 }
 0x1a5   : > { %v5278_v4 = vpop.f32.mrf.mxu1  ;;  %v6973_v45 = vadd.f32 %v1802_v32, %v1600_v18  ;;  %v6986_v32 = vpack.c.bf16 %v1963_v1, %v1962_v13  ;;  %v1965_v13 = vld [vmem:[#allocation2 + $0x171] sm:$0xff] }
 0x1a6   : > { %v1496_v50 = vpop.f32.mrf.mxu0  ;;  %5378 = vmatmul.mubr.msk.bf16.gmra.mxu0 %vm651_vm2, %v6970_v17 }
 0x1a7   : > { %v1807_v5 = vpop.f32.mrf.mxu1  ;;  %5448 = vmatmul.mubr.msk.bf16.gmra.mxu1 %vm651_vm2, %v6715_v38  ;;  %v1601_v20 = vadd.f32 %v1496_v50, %v6709_v26  ;;  %5381 = vmatprep.mubr.msk.bf16.mxu0 %vm5943_vm1, %v7851_v2 }
 0x1a8   : > { %5451 = vmatprep.mubr.msk.bf16.mxu1 %vm5943_vm1, %v7851_v2  ;;  %v5211_v19 = vpop.f32.mrf.mxu0 }
 0x1a9   : > { %v5281_v52 = vpop.f32.mrf.mxu1  ;;  %v6984_v59 = vadd.f32 %v1807_v5, %v1601_v20  ;;  %v1964_v20 = vld [vmem:[#allocation2 + $0x169] sm:$0xff] }
 0x1aa   : > { %v1499_v9 = vpop.f32.mrf.mxu0 }
 0x1ab   : > { %v1810_v22 = vpop.f32.mrf.mxu1  ;;  %v1602_v38 = vadd.f32 %v1499_v9, %v6717_v6 }
 0x1ac   : > { %v5212_v18 = vpop.f32.mrf.mxu0 }
 0x1ad   : > { %v5282_v26 = vpop.f32.mrf.mxu1  ;;  %v6989_v23 = vadd.f32 %v1810_v22, %v1602_v38  ;;  %v7002_v22 = vpack.c.bf16 %v1965_v13, %v1964_v20 }
 0x1ae   : > { %v1504_v4 = vpop.f32.mrf.mxu0  ;;  %5382 = vmatmul.mubr.msk.bf16.gmra.mxu0 %vm651_vm2, %v6986_v32 }
 0x1af   : > { %v1815_v50 = vpop.f32.mrf.mxu1  ;;  %5452 = vmatmul.mubr.msk.bf16.gmra.mxu1 %vm651_vm2, %v6729_v11  ;;  %v1603_v5 = vadd.f32 %v1504_v4, %v6723_v43  ;;  %5385 = vmatprep.mubr.msk.bf16.mxu0 %vm5943_vm1, %v7851_v2 }
 0x1b0   : > { %5455 = vmatprep.mubr.msk.bf16.mxu1 %vm5943_vm1, %v7851_v2  ;;  %v5215_v6 = vpop.f32.mrf.mxu0 }
 0x1b1   : > { %v5285_v1 = vpop.f32.mrf.mxu1  ;;  %v7000_v19 = vadd.f32 %v1815_v50, %v1603_v5  ;;  %v1966_v5 = vld [vmem:[#allocation2 + $0x181] sm:$0xff] }
 0x1b2   : > { %v1507_v52 = vpop.f32.mrf.mxu0 }
 0x1b3   : > { %v1818_v9 = vpop.f32.mrf.mxu1  ;;  %v1604_v11 = vadd.f32 %v1507_v52, %v6731_v55  ;;  %v1967_v55 = vld [vmem:[#allocation2 + $0x189] sm:$0xff] }
 0x1b4   : > { %v5216_v38 = vpop.f32.mrf.mxu0 }
 0x1b5   : > { %v5286_v43 = vpop.f32.mrf.mxu1  ;;  %v7005_v18 = vadd.f32 %v1818_v9, %v1604_v11  ;;  %v7018_v9 = vpack.c.bf16 %v1967_v55, %v1966_v5  ;;  %v521_v5 = vld [vmem:[%s6095_s19 + $0x1b8] sm:$0xff] }
 0x1b6   : > { %v1512_v26 = vpop.f32.mrf.mxu0  ;;  %5386 = vmatmul.mubr.msk.bf16.gmra.mxu0 %vm651_vm2, %v7002_v22  ;;  %v520_v43 = vld [vmem:[%s6095_s19 + $0x1b0] sm:$0xff] }
 0x1b7   : > { %v1823_v4 = vpop.f32.mrf.mxu1  ;;  %5456 = vmatmul.mubr.msk.bf16.gmra.mxu1 %vm651_vm2, %v6743_v16  ;;  %v1605_v50 = vadd.f32 %v1512_v26, %v6737_v54  ;;  %5389 = vmatprep.mubr.msk.bf16.mxu0 %vm5943_vm1, %v7851_v2  ;;  %7866 = vst [vmem:[#allocation12_spill] sm:$0xff] %v7018_v9  ;;  %v584_v55 = vmul.f32 %v6761_v7, %v520_v43 }
 0x1b8   : > { %5459 = vmatprep.mubr.msk.bf16.mxu1 %vm5943_vm1, %v7851_v2  ;;  %v5219_v20 = vpop.f32.mrf.mxu0 }
 0x1b9   : > { %v5289_v13 = vpop.f32.mrf.mxu1  ;;  %v7016_v6 = vadd.f32 %v1823_v4, %v1605_v50  ;;  %v1968_v4 = vld [vmem:[#allocation2 + $0x199] sm:$0xff]  ;;  %v1969_v50 = vld [vmem:[#allocation2 + $0x1a1] sm:$0xff] }
 0x1ba   : > { %v1515_v1 = vpop.f32.mrf.mxu0  ;;  %v2278_v13 = vld [vmem:[#allocation2 + $0x19a] sm:$0xff] }
 0x1bb   : > { %7865 = vst [vmem:[#allocation11_spill] sm:$0xff] %v7016_v6  ;;  %v1826_v52 = vpop.f32.mrf.mxu1  ;;  %v1606_v16 = vadd.f32 %v1515_v1, %v6745_v35  ;;  %v2279_v1 = vld [vmem:[#allocation2 + $0x1a2] sm:$0xff] }
 0x1bc   : > { %v5220_v54 = vpop.f32.mrf.mxu0 }
 0x1bd   : > { %v5290_v11 = vpop.f32.mrf.mxu1  ;;  %v7021_v38 = vadd.f32 %v1826_v52, %v1606_v16  ;;  %v585_v52 = vmul.f32 %v6761_v7, %v521_v5  ;;  %v522_v16 = vld [vmem:[%s6095_s19 + $0x1c0] sm:$0x3]  ;;  %s4834_s19 = sshll.u32 %s6082_s27, 5 }
 0x1be   : > { %v1520_v26 = vpop.f32.mrf.mxu0  ;;  %5390 = vmatmul.mubr.msk.bf16.gmra.mxu0 %vm651_vm2, %v7018_v9  ;;  %v648_v11 = vadd.f32 %v6769_v47, %v584_v55  ;;  %v7042_v9 = vpack.c.bf16 %v1969_v50, %v1968_v4  ;;  %v7868_v55 = vmov 0.0   ;;  %v2558_v50 = vld [vmem:[#allocation2 + $0x38] sm:$0xff]  ;;  %s7686_s17 = scalar_lea.vmem %s7843_s8, %s4834_s19  ;;  %s4487_s19 = scalar_lea.sflag [#allocation5], %s444_s30 }
 0x1bf   : > { %7867 = vst [vmem:[#allocation13_spill] sm:$0xff] %v7021_v38  ;;  %v1831_v20 = vpop.f32.mrf.mxu1  ;;  %5460 = vmatmul.mubr.msk.bf16.gmra.mxu1 %vm651_vm2, %v6764_v0  ;;  %v1607_v35 = vadd.f32 %v1520_v26, %v6751_v28  ;;  %5393 = vmatprep.mubr.msk.bf16.mxu0 %vm5943_vm1, %v7851_v2  ;;  %v586_v38 = vmul.f32 %v6761_v7, %v522_v16  ;;  %3632 = vst.msk [vmem:[#allocation3] sm:$0x1] %vm3631_vm5, %v7868_v55 }
 0x1c0   : > { %5463 = vmatprep.mubr.msk.bf16.mxu1 %vm5943_vm1, %v7851_v2  ;;  %v5223_v54 = vpop.f32.mrf.mxu0  ;;  %v649_v28 = vadd.f32 %v6769_v47, %v585_v52  ;;  %v2296_v2 = vpack.c.bf16 %v2279_v1, %v2278_v13  ;;  %707 = vst.msk [vmem:[#allocation2 + $0x1b0] sm:$0xff] %vm651_vm2, %v648_v11 }
 0x1c1   : > { %v5293_v0 = vpop.f32.mrf.mxu1  ;;  %v7039_v43 = vadd.f32 %v1831_v20, %v1607_v35  ;;  %v650_v5 = vadd.f32 %v6769_v47, %v586_v38  ;;  %729 = vst.msk [vmem:[#allocation2 + $0x1b0] sm:$0x1] %vm710_vm4, %v7868_v55 }
 0x1c2   : > { %v1523_v26 = vpop.f32.mrf.mxu0  ;;  %708 = vst.msk [vmem:[#allocation2 + $0x1b8] sm:$0xff] %vm651_vm2, %v649_v28  ;;  %760 = vst.msk [vmem:[#allocation2 + $0x1b0] sm:$0xff] %vm651_vm2, %v7868_v55  ;;  %v4789_v0 = vld [vmem:[%s7838_s3 + $0x10] sm:$0x3] }
 0x1c3   : > { %v1834_v6 = vpop.f32.mrf.mxu1  ;;  %v1608_v54 = vadd.f32 %v1523_v26, %v6772_v3  ;;  %761 = vst.msk [vmem:[#allocation2 + $0x1b8] sm:$0xff] %vm651_vm2, %v7868_v55 }
 0x1c4   : > { %v5224_v7 = vpop.f32.mrf.mxu0  ;;  %709 = vst.msk [vmem:[#allocation2 + $0x1c0] sm:$0x3] %vm654_vm3, %v650_v5  ;;  %v3282_v5 = vsel %vm919_vm0, %v4789_v0, 0 }
 0x1c5   : > { %v5294_v20 = vpop.f32.mrf.mxu1  ;;  %v7055_v4 = vadd.f32 %v1834_v6, %v1608_v54  ;;  %748 = vst.msk [vmem:[#allocation2 + $0x1c1] sm:$0x1] %vm710_vm4, %v7868_v55  ;;  %v2557_v6 = vld [vmem:[#allocation2 + $0x30] sm:$0xff] }
 0x1c6   : > { %v1528_v47 = vpop.f32.mrf.mxu0  ;;  %5394 = vmatmul.mubr.msk.bf16.gmra.mxu0 %vm651_vm2, %v7042_v9  ;;  %762 = vst.msk [vmem:[#allocation2 + $0x1c0] sm:$0x3] %vm654_vm3, %v7868_v55 }
 0x1c7   : > { %v1839_v3 = vpop.f32.mrf.mxu1  ;;  %5464 = vmatmul.mubr.msk.bf16.gmra.mxu1 %vm651_vm2, %v2296_v2  ;;  %v1609_v38 = vadd.f32 %v1528_v47, %v6780_v62  ;;  %5469 = vmatprep.mubr.msk.bf16.mxu0 %vm5943_vm1, %v7868_v55  ;;  %v2591_v2 = vpack.c.bf16 %v2558_v50, %v2557_v6  ;;  %v2559_v47 = vld [vmem:[#allocation2 + $0x48] sm:$0xff]  ;;  %3633 = vst.msk [vmem:[#allocation3 + $0x18] sm:$0x1] %vm3631_vm5, %v7868_v55  ;;  %3634 = vst.msk [vmem:[#allocation3 + $0x30] sm:$0x1] %vm3631_vm5, %v7868_v55 }
 0x1c8   : > { %5539 = vmatprep.mubr.msk.bf16.mxu1 %vm5943_vm1, %v7868_v55  ;;  %v5227_v35 = vpop.f32.mrf.mxu0  ;;  %3635 = vst.msk [vmem:[#allocation3 + $0x48] sm:$0x1] %vm3631_vm5, %v7868_v55  ;;  %3636 = vst.msk [vmem:[#allocation3 + $0x60] sm:$0x1] %vm3631_vm5, %v7868_v55 }
 0x1c9   : > { %v5297_v13 = vpop.f32.mrf.mxu1  ;;  %v7069_v1 = vadd.f32 %v1839_v3, %v1609_v38  ;;  %3637 = vst.msk [vmem:[#allocation3 + $0x78] sm:$0x1] %vm3631_vm5, %v7868_v55  ;;  %3638 = vst.msk [vmem:[#allocation3 + $0x90] sm:$0x1] %vm3631_vm5, %v7868_v55 }
 0x1ca   : > { %v1531_v52 = vpop.f32.mrf.mxu0  ;;  %3639 = vst.msk [vmem:[#allocation3 + $0xa8] sm:$0x1] %vm3631_vm5, %v7868_v55  ;;  %3640 = vst.msk [vmem:[#allocation3 + $0xc0] sm:$0x1] %vm3631_vm5, %v7868_v55 }
 0x1cb   : > { %v1842_v16 = vpop.f32.mrf.mxu1  ;;  %v1610_v62 = vadd.f32 %v1531_v52, %v6789_v60  ;;  %v2560_v60 = vld [vmem:[#allocation2 + $0x50] sm:$0xff]  ;;  %3641 = vst.msk [vmem:[#allocation3 + $0xd8] sm:$0x1] %vm3631_vm5, %v7868_v55  ;;  %3642 = vst.msk [vmem:[#allocation3 + $0xf0] sm:$0x1] %vm3631_vm5, %v7868_v55 }
 0x1cc   : > { %v5228_v11 = vpop.f32.mrf.mxu0  ;;  %3643 = vst.msk [vmem:[#allocation3 + $0x108] sm:$0x1] %vm3631_vm5, %v7868_v55  ;;  %3644 = vst.msk [vmem:[#allocation3 + $0x120] sm:$0x1] %vm3631_vm5, %v7868_v55 }
 0x1cd   : > { %v5298_v28 = vpop.f32.mrf.mxu1  ;;  %v7075_v26 = vadd.f32 %v1842_v16, %v1610_v62  ;;  %v2561_v11 = vld [vmem:[#allocation2 + $0x60] sm:$0xff]  ;;  %3645 = vst.msk [vmem:[#allocation3 + $0x138] sm:$0x1] %vm3631_vm5, %v7868_v55  ;;  %3646 = vst.msk [vmem:[#allocation3 + $0x150] sm:$0x1] %vm3631_vm5, %v7868_v55 }
 0x1ce   : > { %v1536_v54 = vpop.f32.mrf.mxu0  ;;  %5470 = vmatmul.mubr.msk.bf16.vlgmr.msra.gmra.mxu0 %vm651_vm2, %v2591_v2  ;;  %v2562_v28 = vld [vmem:[#allocation2 + $0x68] sm:$0xff]  ;;  %3647 = vst.msk [vmem:[#allocation3 + $0x168] sm:$0x1] %vm3631_vm5, %v7868_v55  ;;  %3648 = vst.msk [vmem:[#allocation3 + $0x180] sm:$0x1] %vm3631_vm5, %v7868_v55 }
 0x1cf   : > { %v1847_v7 = vpop.f32.mrf.mxu1  ;;  %5540 = vmatmul.mubr.msk.bf16.vlgmr.msra.gmra.mxu1 %vm651_vm2, %v6802_v36  ;;  %v1611_v20 = vadd.f32 %v1536_v54, %v6795_v34  ;;  %5473 = vmatprep.mubr.msk.bf16.mxu0 %vm5943_vm1, %v7868_v55  ;;  %v2592_v36 = vpack.c.bf16 %v2560_v60, %v2559_v47  ;;  %v2593_v47 = vpack.c.bf16 %v2562_v28, %v2561_v11 }
 0x1d0   : > { %5543 = vmatprep.mubr.msk.bf16.mxu1 %vm5943_vm1, %v7868_v55  ;;  %v5231_v3 = vpop.f32.mrf.mxu0  ;;  %5608 = vmatpush3.bf16.msra.mxu0 %v3282_v5 }
 0x1d1   : > { %v5301_v38 = vpop.f32.mrf.mxu1  ;;  %v7086_v6 = vadd.f32 %v1847_v7, %v1611_v20  ;;  %5737 = vmatprep.subr.bf16.mxu0 %v7868_v55 }
 0x1d2   : > { %v1539_v50 = vpop.f32.mrf.mxu0 }
 0x1d3   : > { %v1850_v35 = vpop.f32.mrf.mxu1  ;;  %v1612_v34 = vadd.f32 %v1539_v50, %v6804_v44 }
 0x1d4   : > { %v5232_v13 = vpop.f32.mrf.mxu0 }
 0x1d5   : > { %v5302_v52 = vpop.f32.mrf.mxu1  ;;  %v7090_v16 = vadd.f32 %v1850_v35, %v1612_v34  ;;  %v2564_v34 = vld [vmem:[#allocation2 + $0x80] sm:$0xff] }
 0x1d6   : > { %v1544_v2 = vpop.f32.mrf.mxu0  ;;  %5474 = vmatmul.mubr.msk.bf16.gmra.mxu0 %vm651_vm2, %v2592_v36  ;;  %v2563_v36 = vld [vmem:[#allocation2 + $0x78] sm:$0xff] }
 0x1d7   : > { %v1855_v0 = vpop.f32.mrf.mxu1  ;;  %5544 = vmatmul.mubr.msk.bf16.gmra.mxu1 %vm651_vm2, %v6821_v25  ;;  %v1613_v62 = vadd.f32 %v1544_v2, %v6814_v8  ;;  %5477 = vmatprep.mubr.msk.bf16.mxu0 %vm5943_vm1, %v7868_v55 }
 0x1d8   : > { %5547 = vmatprep.mubr.msk.bf16.mxu1 %vm5943_vm1, %v7868_v55  ;;  %v5235_v44 = vpop.f32.mrf.mxu0 }
 0x1d9   : > { %v5305_v5 = vpop.f32.mrf.mxu1  ;;  %v7100_v54 = vadd.f32 %v1855_v0, %v1613_v62  ;;  %v2594_v62 = vpack.c.bf16 %v2564_v34, %v2563_v36 }
 0x1da   : > { %v1547_v7 = vpop.f32.mrf.mxu0 }
 0x1db   : > { %v1858_v20 = vpop.f32.mrf.mxu1  ;;  %v1614_v60 = vadd.f32 %v1547_v7, %v6823_v27 }
 0x1dc   : > { %v5236_v25 = vpop.f32.mrf.mxu0 }
 0x1dd   : > { %v5306_v3 = vpop.f32.mrf.mxu1  ;;  %v7103_v8 = vadd.f32 %v1858_v20, %v1614_v60  ;;  %v2565_v20 = vld [vmem:[#allocation2 + $0x90] sm:$0xff] }
 0x1de   : > { %v1552_v38 = vpop.f32.mrf.mxu0  ;;  %5478 = vmatmul.mubr.msk.bf16.gmra.mxu0 %vm651_vm2, %v2593_v47  ;;  %v2566_v47 = vld [vmem:[#allocation2 + $0x98] sm:$0xff] }
 0x1df   : > { %v1863_v50 = vpop.f32.mrf.mxu1  ;;  %5548 = vmatmul.mubr.msk.bf16.gmra.mxu1 %vm651_vm2, %v6835_v14  ;;  %v1615_v35 = vadd.f32 %v1552_v38, %v6829_v39  ;;  %5481 = vmatprep.mubr.msk.bf16.mxu0 %vm5943_vm1, %v7868_v55 }
 0x1e0   : > { %5551 = vmatprep.mubr.msk.bf16.mxu1 %vm5943_vm1, %v7868_v55  ;;  %v5239_v27 = vpop.f32.mrf.mxu0 }
 0x1e1   : > { %v5309_v13 = vpop.f32.mrf.mxu1  ;;  %v7113_v52 = vadd.f32 %v1863_v50, %v1615_v35  ;;  %v2595_v50 = vpack.c.bf16 %v2566_v47, %v2565_v20 }
 0x1e2   : > { %v1555_v2 = vpop.f32.mrf.mxu0 }
 0x1e3   : > { %v1866_v0 = vpop.f32.mrf.mxu1  ;;  %v1616_v11 = vadd.f32 %v1555_v2, %v6837_v57  ;;  %v2567_v2 = vld [vmem:[#allocation2 + $0xa8] sm:$0xff] }
 0x1e4   : > { %v5240_v14 = vpop.f32.mrf.mxu0 }
 0x1e5   : > { %v5310_v28 = vpop.f32.mrf.mxu1  ;;  %v7116_v39 = vadd.f32 %v1866_v0, %v1616_v11  ;;  %v2568_v0 = vld [vmem:[#allocation2 + $0xb0] sm:$0xff] }
 0x1e6   : > { %v1560_v44 = vpop.f32.mrf.mxu0  ;;  %5482 = vmatmul.mubr.msk.bf16.gmra.mxu0 %vm651_vm2, %v2594_v62 }
 0x1e7   : > { %v1871_v5 = vpop.f32.mrf.mxu1  ;;  %5552 = vmatmul.mubr.msk.bf16.gmra.mxu1 %vm651_vm2, %v6849_v42  ;;  %v1617_v7 = vadd.f32 %v1560_v44, %v6843_v10  ;;  %5485 = vmatprep.mubr.msk.bf16.mxu0 %vm5943_vm1, %v7868_v55  ;;  %v2596_v44 = vpack.c.bf16 %v2568_v0, %v2567_v2  ;;  %v7869_v0 = vld [vmem:[#allocation9_spill] sm:$0xff] }
 0x1e8   : > { %5555 = vmatprep.mubr.msk.bf16.mxu1 %vm5943_vm1, %v7868_v55  ;;  %v5243_v57 = vpop.f32.mrf.mxu0 }
 0x1e9   : > { %v5313_v60 = vpop.f32.mrf.mxu1  ;;  %v7126_v25 = vadd.f32 %v1871_v5, %v1617_v7 }
 0x1ea   : > { %v1563_v3 = vpop.f32.mrf.mxu0  ;;  %v2569_v60 = vld [vmem:[#allocation2 + $0xc0] sm:$0xff] }
 0x1eb   : > { %v1874_v38 = vpop.f32.mrf.mxu1  ;;  %v1618_v35 = vadd.f32 %v1563_v3, %v6851_v37  ;;  %v2570_v3 = vld [vmem:[#allocation2 + $0xc8] sm:$0xff] }
 0x1ec   : > { %v5244_v42 = vpop.f32.mrf.mxu0 }
 0x1ed   : > { %v5314_v36 = vpop.f32.mrf.mxu1  ;;  %v7129_v10 = vadd.f32 %v1874_v38, %v1618_v35 }
 0x1ee   : > { %v1568_v34 = vpop.f32.mrf.mxu0  ;;  %5486 = vmatmul.mubr.msk.bf16.gmra.mxu0 %vm651_vm2, %v2595_v50  ;;  %v2597_v36 = vpack.c.bf16 %v2570_v3, %v2569_v60 }
 0x1ef   : > { %v1879_v27 = vpop.f32.mrf.mxu1  ;;  %5556 = vmatmul.mubr.msk.bf16.gmra.mxu1 %vm651_vm2, %v6863_v12  ;;  %v1619_v13 = vadd.f32 %v1568_v34, %v6857_v48  ;;  %5489 = vmatprep.mubr.msk.bf16.mxu0 %vm5943_vm1, %v7868_v55 }
 0x1f0   : > { %5559 = vmatprep.mubr.msk.bf16.mxu1 %vm5943_vm1, %v7868_v55  ;;  %v5247_v37 = vpop.f32.mrf.mxu0 }
 0x1f1   : > { %v5317_v62 = vpop.f32.mrf.mxu1  ;;  %v7139_v11 = vadd.f32 %v1879_v27, %v1619_v13  ;;  %v7870_v37 = vld [vmem:[#allocation8_spill] sm:$0xff] }
 0x1f2   : > { %v1571_v14 = vpop.f32.mrf.mxu0 }
 0x1f3   : > { %v1882_v28 = vpop.f32.mrf.mxu1  ;;  %v1620_v5 = vadd.f32 %v1571_v14, %v6865_v21  ;;  %v2571_v14 = vld [vmem:[#allocation2 + $0xd8] sm:$0xff] }
 0x1f4   : > { %v5248_v12 = vpop.f32.mrf.mxu0 }
 0x1f5   : > { %v5318_v7 = vpop.f32.mrf.mxu1  ;;  %v7142_v48 = vadd.f32 %v1882_v28, %v1620_v5  ;;  %v2572_v28 = vld [vmem:[#allocation2 + $0xe0] sm:$0xff] }
 0x1f6   : > { %v1576_v20 = vpop.f32.mrf.mxu0  ;;  %5490 = vmatmul.mubr.msk.bf16.gmra.mxu0 %vm651_vm2, %v2596_v44 }
 0x1f7   : > { %v1887_v47 = vpop.f32.mrf.mxu1  ;;  %5560 = vmatmul.mubr.msk.bf16.gmra.mxu1 %vm651_vm2, %v6877_v63  ;;  %v1621_v57 = vadd.f32 %v1576_v20, %v6871_v33  ;;  %5493 = vmatprep.mubr.msk.bf16.mxu0 %vm5943_vm1, %v7868_v55  ;;  %v2598_v20 = vpack.c.bf16 %v2572_v28, %v2571_v14 }
 0x1f8   : > { %5563 = vmatprep.mubr.msk.bf16.mxu1 %vm5943_vm1, %v7868_v55  ;;  %v5251_v21 = vpop.f32.mrf.mxu0 }
 0x1f9   : > { %v5321_v38 = vpop.f32.mrf.mxu1  ;;  %v7152_v50 = vadd.f32 %v1887_v47, %v1621_v57  ;;  %v7871_v47 = vld [vmem:[#allocation10_spill] sm:$0xff] }
 0x1fa   : > { %v1579_v35 = vpop.f32.mrf.mxu0 }
 0x1fb   : > { %v1890_v42 = vpop.f32.mrf.mxu1  ;;  %v1622_v34 = vadd.f32 %v1579_v35, %v6879_v51 }
 0x1fc   : > { %v5252_v63 = vpop.f32.mrf.mxu0 }
 0x1fd   : > { %v5322_v27 = vpop.f32.mrf.mxu1  ;;  %v7155_v33 = vadd.f32 %v1890_v42, %v1622_v34  ;;  %v2574_v34 = vld [vmem:[#allocation2 + $0xf8] sm:$0xff] }
 0x1fe   : > { %v1584_v13 = vpop.f32.mrf.mxu0  ;;  %5494 = vmatmul.mubr.msk.bf16.gmra.mxu0 %vm651_vm2, %v2597_v36  ;;  %v2573_v36 = vld [vmem:[#allocation2 + $0xf0] sm:$0xff] }
 0x1ff   : > { %v1895_v2 = vpop.f32.mrf.mxu1  ;;  %5564 = vmatmul.mubr.msk.bf16.gmra.mxu1 %vm651_vm2, %v7869_v0  ;;  %v1623_v62 = vadd.f32 %v1584_v13, %v7870_v37  ;;  %5497 = vmatprep.mubr.msk.bf16.mxu0 %vm5943_vm1, %v7868_v55  ;;  %v2599_v37 = vpack.c.bf16 %v2574_v34, %v2573_v36 }
 0x200   : > { %5567 = vmatprep.mubr.msk.bf16.mxu1 %vm5943_vm1, %v7868_v55  ;;  %v5255_v51 = vpop.f32.mrf.mxu0 }
 0x201   : > { %v5325_v44 = vpop.f32.mrf.mxu1  ;;  %v7165_v5 = vadd.f32 %v1895_v2, %v1623_v62 }
 0x202   : > { %v1587_v12 = vpop.f32.mrf.mxu0 }
 0x203   : > { %v1898_v7 = vpop.f32.mrf.mxu1  ;;  %v1624_v57 = vadd.f32 %v1587_v12, %v7871_v47  ;;  %v2575_v12 = vld [vmem:[#allocation2 + $0x108] sm:$0xff] }
 0x204   : > { %v5256_v60 = vpop.f32.mrf.mxu0 }
 0x205   : > { %v5326_v3 = vpop.f32.mrf.mxu1  ;;  %v7168_v21 = vadd.f32 %v1898_v7, %v1624_v57  ;;  %v2576_v7 = vld [vmem:[#allocation2 + $0x110] sm:$0xff] }
 0x206   : > { %v2077_v38 = vpop.f32.mrf.mxu0  ;;  %5498 = vmatmul.mubr.msk.bf16.gmra.mxu0 %vm651_vm2, %v2598_v20  ;;  %v2600_v3 = vpack.c.bf16 %v2576_v7, %v2575_v12  ;;  %v2579_v7 = vld [vmem:[#allocation2 + $0x138] sm:$0xff] }
 0x207   : > { %v2387_v35 = vpop.f32.mrf.mxu1  ;;  %5568 = vmatmul.mubr.msk.bf16.gmra.mxu1 %vm651_vm2, %v6906_v61  ;;  %v2212_v42 = vadd.f32 %v2077_v38, %v6904_v40  ;;  %5501 = vmatprep.mubr.msk.bf16.mxu0 %vm5943_vm1, %v7868_v55 }
 0x208   : > { %5571 = vmatprep.mubr.msk.bf16.mxu1 %vm5943_vm1, %v7868_v55  ;;  %v5331_v63 = vpop.f32.mrf.mxu0 }
 0x209   : > { %v5401_v27 = vpop.f32.mrf.mxu1  ;;  %v7178_v13 = vadd.f32 %v2387_v35, %v2212_v42  ;;  %v2577_v63 = vld [vmem:[#allocation2 + $0x120] sm:$0xff] }
 0x20a   : > { %v2080_v2 = vpop.f32.mrf.mxu0  ;;  %v2578_v27 = vld [vmem:[#allocation2 + $0x128] sm:$0xff] }
 0x20b   : > { %v2390_v0 = vpop.f32.mrf.mxu1  ;;  %v2213_v62 = vadd.f32 %v2080_v2, %v6909_v58 }
 0x20c   : > { %v5332_v61 = vpop.f32.mrf.mxu0 }
 0x20d   : > { %v5402_v14 = vpop.f32.mrf.mxu1  ;;  %v7181_v40 = vadd.f32 %v2390_v0, %v2213_v62  ;;  %v2601_v61 = vpack.c.bf16 %v2578_v27, %v2577_v63  ;;  %v2581_v63 = vld [vmem:[#allocation2 + $0x150] sm:$0xff]  ;;  %v2582_v27 = vld [vmem:[#allocation2 + $0x158] sm:$0xff] }
 0x20e   : > { %v2085_v28 = vpop.f32.mrf.mxu0  ;;  %5502 = vmatmul.mubr.msk.bf16.gmra.mxu0 %vm651_vm2, %v2599_v37 }
 0x20f   : > { %v2395_v51 = vpop.f32.mrf.mxu1  ;;  %5572 = vmatmul.mubr.msk.bf16.gmra.mxu1 %vm651_vm2, %v6922_v41  ;;  %v2214_v44 = vadd.f32 %v2085_v28, %v6920_v24  ;;  %5505 = vmatprep.mubr.msk.bf16.mxu0 %vm5943_vm1, %v7868_v55 }
 0x210   : > { %5575 = vmatprep.mubr.msk.bf16.mxu1 %vm5943_vm1, %v7868_v55  ;;  %v5335_v58 = vpop.f32.mrf.mxu0 }
 0x211   : > { %v5405_v20 = vpop.f32.mrf.mxu1  ;;  %v7191_v47 = vadd.f32 %v2395_v51, %v2214_v44  ;;  %v2580_v58 = vld [vmem:[#allocation2 + $0x140] sm:$0xff] }
 0x212   : > { %v2088_v57 = vpop.f32.mrf.mxu0 }
 0x213   : > { %v2398_v60 = vpop.f32.mrf.mxu1  ;;  %v2215_v38 = vadd.f32 %v2088_v57, %v6925_v56 }
 0x214   : > { %v5336_v41 = vpop.f32.mrf.mxu0 }
 0x215   : > { %v5406_v35 = vpop.f32.mrf.mxu1  ;;  %v7194_v24 = vadd.f32 %v2398_v60, %v2215_v38  ;;  %v2602_v38 = vpack.c.bf16 %v2580_v58, %v2579_v7  ;;  %v2584_v7 = vld [vmem:[#allocation2 + $0x170] sm:$0xff] }
 0x216   : > { %v2093_v42 = vpop.f32.mrf.mxu0  ;;  %5506 = vmatmul.mubr.msk.bf16.gmra.mxu0 %vm651_vm2, %v2600_v3 }
 0x217   : > { %v2403_v36 = vpop.f32.mrf.mxu1  ;;  %5576 = vmatmul.mubr.msk.bf16.gmra.mxu1 %vm651_vm2, %v6938_v53  ;;  %v2216_v34 = vadd.f32 %v2093_v42, %v6936_v15  ;;  %5509 = vmatprep.mubr.msk.bf16.mxu0 %vm5943_vm1, %v7868_v55 }
 0x218   : > { %5579 = vmatprep.mubr.msk.bf16.mxu1 %vm5943_vm1, %v7868_v55  ;;  %v5339_v56 = vpop.f32.mrf.mxu0 }
 0x219   : > { %v5409_v2 = vpop.f32.mrf.mxu1  ;;  %v7204_v0 = vadd.f32 %v2403_v36, %v2216_v34 }
 0x21a   : > { %v2096_v37 = vpop.f32.mrf.mxu0 }
 0x21b   : > { %v2406_v62 = vpop.f32.mrf.mxu1  ;;  %v2217_v14 = vadd.f32 %v2096_v37, %v6941_v29 }
 0x21c   : > { %v5340_v53 = vpop.f32.mrf.mxu0 }
 0x21d   : > { %v5410_v28 = vpop.f32.mrf.mxu1  ;;  %v7207_v15 = vadd.f32 %v2406_v62, %v2217_v14 }
 0x21e   : > { %v2101_v51 = vpop.f32.mrf.mxu0  ;;  %5510 = vmatmul.mubr.msk.bf16.gmra.mxu0 %vm651_vm2, %v2601_v61  ;;  %v2603_v61 = vpack.c.bf16 %v2582_v27, %v2581_v63 }
 0x21f   : > { %v2411_v44 = vpop.f32.mrf.mxu1  ;;  %5580 = vmatmul.mubr.msk.bf16.gmra.mxu1 %vm651_vm2, %v6954_v49  ;;  %v2218_v12 = vadd.f32 %v2101_v51, %v6952_v31  ;;  %5513 = vmatprep.mubr.msk.bf16.mxu0 %vm5943_vm1, %v7868_v55 }
 0x220   : > { %5583 = vmatprep.mubr.msk.bf16.mxu1 %vm5943_vm1, %v7868_v55  ;;  %v5343_v29 = vpop.f32.mrf.mxu0 }
 0x221   : > { %v5413_v20 = vpop.f32.mrf.mxu1  ;;  %v7217_v57 = vadd.f32 %v2411_v44, %v2218_v12  ;;  %v2583_v12 = vld [vmem:[#allocation2 + $0x168] sm:$0xff] }
 0x222   : > { %v2104_v60 = vpop.f32.mrf.mxu0 }
 0x223   : > { %v2414_v3 = vpop.f32.mrf.mxu1  ;;  %v2219_v41 = vadd.f32 %v2104_v60, %v6957_v30 }
 0x224   : > { %v5344_v49 = vpop.f32.mrf.mxu0 }
 0x225   : > { %v5414_v35 = vpop.f32.mrf.mxu1  ;;  %v7220_v31 = vadd.f32 %v2414_v3, %v2219_v41  ;;  %v2604_v3 = vpack.c.bf16 %v2584_v7, %v2583_v12  ;;  %v2588_v12 = vld [vmem:[#allocation2 + $0x1a0] sm:$0xff] }
 0x226   : > { %v2109_v42 = vpop.f32.mrf.mxu0  ;;  %5514 = vmatmul.mubr.msk.bf16.gmra.mxu0 %vm651_vm2, %v2602_v38 }
 0x227   : > { %v2419_v36 = vpop.f32.mrf.mxu1  ;;  %5584 = vmatmul.mubr.msk.bf16.gmra.mxu1 %vm651_vm2, %v6970_v17  ;;  %v2220_v34 = vadd.f32 %v2109_v42, %v6968_v46  ;;  %5517 = vmatprep.mubr.msk.bf16.mxu0 %vm5943_vm1, %v7868_v55 }
 0x228   : > { %5587 = vmatprep.mubr.msk.bf16.mxu1 %vm5943_vm1, %v7868_v55  ;;  %v5347_v30 = vpop.f32.mrf.mxu0 }
 0x229   : > { %v5417_v56 = vpop.f32.mrf.mxu1  ;;  %v7230_v2 = vadd.f32 %v2419_v36, %v2220_v34  ;;  %v2585_v36 = vld [vmem:[#allocation2 + $0x180] sm:$0xff]  ;;  %v2586_v34 = vld [vmem:[#allocation2 + $0x188] sm:$0xff] }
 0x22a   : > { %v2112_v37 = vpop.f32.mrf.mxu0 }
 0x22b   : > { %v2422_v62 = vpop.f32.mrf.mxu1  ;;  %v2221_v14 = vadd.f32 %v2112_v37, %v6973_v45  ;;  %v2605_v37 = vpack.c.bf16 %v2586_v34, %v2585_v36  ;;  %v2589_v36 = vld [vmem:[#allocation2 + $0x1b0] sm:$0xff] }
 0x22c   : > { %v5348_v17 = vpop.f32.mrf.mxu0 }
 0x22d   : > { %v5418_v53 = vpop.f32.mrf.mxu1  ;;  %v7233_v46 = vadd.f32 %v2422_v62, %v2221_v14 }
 0x22e   : > { %v2117_v28 = vpop.f32.mrf.mxu0  ;;  %5518 = vmatmul.mubr.msk.bf16.gmra.mxu0 %vm651_vm2, %v2603_v61  ;;  %v7872_v53 = vld [vmem:[#allocation12_spill] sm:$0xff] }
 0x22f   : > { %v2427_v51 = vpop.f32.mrf.mxu1  ;;  %5588 = vmatmul.mubr.msk.bf16.gmra.mxu1 %vm651_vm2, %v6986_v32  ;;  %v2222_v44 = vadd.f32 %v2117_v28, %v6984_v59  ;;  %5521 = vmatprep.mubr.msk.bf16.mxu0 %vm5943_vm1, %v7868_v55  ;;  %v7873_v28 = vld [vmem:[#allocation11_spill] sm:$0xff] }
 0x230   : > { %5591 = vmatprep.mubr.msk.bf16.mxu1 %vm5943_vm1, %v7868_v55  ;;  %v5351_v45 = vpop.f32.mrf.mxu0 }
 0x231   : > { %v5421_v58 = vpop.f32.mrf.mxu1  ;;  %v7243_v29 = vadd.f32 %v2427_v51, %v2222_v44  ;;  %v2587_v44 = vld [vmem:[#allocation2 + $0x198] sm:$0xff] }
 0x232   : > { %v2120_v20 = vpop.f32.mrf.mxu0 }
 0x233   : > { %v2430_v60 = vpop.f32.mrf.mxu1  ;;  %v2223_v38 = vadd.f32 %v2120_v20, %v6989_v23 }
 0x234   : > { %v5352_v32 = vpop.f32.mrf.mxu0 }
 0x235   : > { %v5422_v41 = vpop.f32.mrf.mxu1  ;;  %v7246_v59 = vadd.f32 %v2430_v60, %v2223_v38  ;;  %v2606_v60 = vpack.c.bf16 %v2588_v12, %v2587_v44 }
 0x236   : > { %v2125_v49 = vpop.f32.mrf.mxu0  ;;  %5522 = vmatmul.mubr.msk.bf16.gmra.mxu0 %vm651_vm2, %v2604_v3  ;;  %v7874_v3 = vld [vmem:[#allocation13_spill] sm:$0xff] }
 0x237   : > { %v2435_v35 = vpop.f32.mrf.mxu1  ;;  %5592 = vmatmul.mubr.msk.bf16.gmra.mxu1 %vm651_vm2, %v7002_v22  ;;  %v2224_v42 = vadd.f32 %v2125_v49, %v7000_v19  ;;  %5525 = vmatprep.mubr.msk.bf16.mxu0 %vm5943_vm1, %v7868_v55 }
 0x238   : > { %5595 = vmatprep.mubr.msk.bf16.mxu1 %vm5943_vm1, %v7868_v55  ;;  %v5355_v23 = vpop.f32.mrf.mxu0 }
 0x239   : > { %v5425_v63 = vpop.f32.mrf.mxu1  ;;  %v7256_v27 = vadd.f32 %v2435_v35, %v2224_v42  ;;  %v2590_v23 = vld [vmem:[#allocation2 + $0x1b8] sm:$0xff] }
 0x23a   : > { %v2128_v30 = vpop.f32.mrf.mxu0  ;;  %v2899_v63 = vld [vmem:[#allocation2 + $0x1b1] sm:$0xff] }
 0x23b   : > { %v2438_v56 = vpop.f32.mrf.mxu1  ;;  %v2225_v62 = vadd.f32 %v2128_v30, %v7005_v18  ;;  %v2900_v30 = vld [vmem:[#allocation2 + $0x1b9] sm:$0xff] }
 0x23c   : > { %v5356_v22 = vpop.f32.mrf.mxu0 }
 0x23d   : > { %v5426_v61 = vpop.f32.mrf.mxu1  ;;  %v7259_v19 = vadd.f32 %v2438_v56, %v2225_v62 }
 0x23e   : > { %v2133_v14 = vpop.f32.mrf.mxu0  ;;  %5526 = vmatmul.mubr.msk.bf16.gmra.mxu0 %vm651_vm2, %v2605_v37 }
 0x23f   : > { %v2443_v17 = vpop.f32.mrf.mxu1  ;;  %5596 = vmatmul.mubr.msk.bf16.gmra.mxu1 %vm651_vm2, %v7872_v53  ;;  %v2226_v51 = vadd.f32 %v2133_v14, %v7873_v28  ;;  %5529 = vmatprep.mubr.msk.bf16.mxu0 %vm5943_vm1, %v7868_v55  ;;  %v2607_v14 = vpack.c.bf16 %v2590_v23, %v2589_v36  ;;  %v3179_v23 = vld [vmem:[#allocation2 + $0x4a] sm:$0xff] }
 0x240   : > { %5599 = vmatprep.mubr.msk.bf16.mxu1 %vm5943_vm1, %v7868_v55  ;;  %v5359_v18 = vpop.f32.mrf.mxu0 }
 0x241   : > { %v5429_v7 = vpop.f32.mrf.mxu1  ;;  %v7269_v45 = vadd.f32 %v2443_v17, %v2226_v51  ;;  %v3177_v18 = vld [vmem:[#allocation2 + $0x32] sm:$0xff] }
 0x242   : > { %v2136_v58 = vpop.f32.mrf.mxu0  ;;  %v3178_v7 = vld [vmem:[#allocation2 + $0x3a] sm:$0xff] }
 0x243   : > { %v2446_v20 = vpop.f32.mrf.mxu1  ;;  %v2227_v38 = vadd.f32 %v2136_v58, %v7874_v3 }
 0x244   : > { %v5360_v32 = vpop.f32.mrf.mxu0 }
 0x245   : > { %v5430_v41 = vpop.f32.mrf.mxu1  ;;  %v7272_v49 = vadd.f32 %v2446_v20, %v2227_v38  ;;  %v3211_v38 = vpack.c.bf16 %v3178_v7, %v3177_v18 }
 0x246   : > { %v2141_v35 = vpop.f32.mrf.mxu0  ;;  %5530 = vmatmul.mubr.msk.bf16.gmra.mxu0 %vm651_vm2, %v2606_v60 }
 0x247   : > { %v2451_v42 = vpop.f32.mrf.mxu1  ;;  %5600 = vmatmul.mubr.msk.bf16.gmra.mxu1 %vm651_vm2, %v7042_v9  ;;  %v2228_v34 = vadd.f32 %v2141_v35, %v7039_v43  ;;  %5533 = vmatprep.mubr.msk.bf16.mxu0 %vm5943_vm1, %v7868_v55  ;;  %v2917_v9 = vpack.c.bf16 %v2900_v30, %v2899_v63  ;;  %v3180_v63 = vld [vmem:[#allocation2 + $0x52] sm:$0xff] }
 0x248   : > { %5603 = vmatprep.mubr.msk.bf16.mxu1 %vm5943_vm1, %v7868_v55  ;;  %v5363_v56 = vpop.f32.mrf.mxu0 }
 0x249   : > { %v5433_v37 = vpop.f32.mrf.mxu1  ;;  %v7282_v62 = vadd.f32 %v2451_v42, %v2228_v34 }
 0x24a   : > { %v2144_v22 = vpop.f32.mrf.mxu0 }
 0x24b   : > { %v2454_v61 = vpop.f32.mrf.mxu1  ;;  %v2229_v17 = vadd.f32 %v2144_v22, %v7055_v4 }
 0x24c   : > { %v5364_v43 = vpop.f32.mrf.mxu0 }
 0x24d   : > { %v5434_v53 = vpop.f32.mrf.mxu1  ;;  %v7285_v28 = vadd.f32 %v2454_v61, %v2229_v17  ;;  %v3212_v61 = vpack.c.bf16 %v3180_v63, %v3179_v23 }
 0x24e   : > { %v2149_v51 = vpop.f32.mrf.mxu0  ;;  %5534 = vmatmul.mubr.msk.bf16.gmra.mxu0 %vm651_vm2, %v2607_v14 }
 0x24f   : > { %v2459_v44 = vpop.f32.mrf.mxu1  ;;  %5604 = vmatmul.mubr.msk.bf16.gmra.mxu1 %vm651_vm2, %v2917_v9  ;;  %v2230_v12 = vadd.f32 %v2149_v51, %v7069_v1  ;;  %5609 = vmatprep.mubr.msk.bf16.mxu0 %vm5943_vm1, %v7868_v55 }
 0x250   : > { %5685 = vmatprep.mubr.msk.bf16.mxu1 %vm5943_vm1, %v7868_v55  ;;  %v5367_v4 = vpop.f32.mrf.mxu0 }
 0x251   : > { %v5437_v58 = vpop.f32.mrf.mxu1  ;;  %v7294_v20 = vadd.f32 %v2459_v44, %v2230_v12  ;;  %v3181_v44 = vld [vmem:[#allocation2 + $0x62] sm:$0xff]  ;;  %v3182_v12 = vld [vmem:[#allocation2 + $0x6a] sm:$0xff] }
 0x252   : > { %v2152_v60 = vpop.f32.mrf.mxu0 }
 0x253   : > { %v2462_v3 = vpop.f32.mrf.mxu1  ;;  %v2231_v32 = vadd.f32 %v2152_v60, %v7075_v26  ;;  %v3213_v60 = vpack.c.bf16 %v3182_v12, %v3181_v44 }
 0x254   : > { %v5368_v41 = vpop.f32.mrf.mxu0 }
 0x255   : > { %v5438_v35 = vpop.f32.mrf.mxu1  ;;  %v7297_v1 = vadd.f32 %v2462_v3, %v2231_v32 }
 0x256   : > { %v2157_v42 = vpop.f32.mrf.mxu0  ;;  %5610 = vmatmul.mubr.msk.bf16.vlgmr.msra.gmra.mxu0 %vm651_vm2, %v3211_v38 }
 0x257   : > { %v2467_v36 = vpop.f32.mrf.mxu1  ;;  %v2232_v34 = vadd.f32 %v2157_v42, %v7086_v6  ;;  %5613 = vmatprep.mubr.msk.bf16.mxu0 %vm5943_vm1, %v7868_v55 }
 0x258   : > { %v5371_v30 = vpop.f32.mrf.mxu0 }
 0x259   : > { %v5441_v56 = vpop.f32.mrf.mxu1  ;;  %v7303_v37 = vadd.f32 %v2467_v36, %v2232_v34  ;;  %v3183_v36 = vld [vmem:[#allocation2 + $0x7a] sm:$0xff]  ;;  %v3184_v34 = vld [vmem:[#allocation2 + $0x82] sm:$0xff] }
 0x25a   : > { %v2160_v26 = vpop.f32.mrf.mxu0 }
 0x25b   : > { %v2470_v22 = vpop.f32.mrf.mxu1  ;;  %v2233_v14 = vadd.f32 %v2160_v26, %v7090_v16  ;;  %v3214_v26 = vpack.c.bf16 %v3184_v34, %v3183_v36 }
 0x25c   : > { %v5372_v9 = vpop.f32.mrf.mxu0 }
 0x25d   : > { %v5442_v17 = vpop.f32.mrf.mxu1  ;;  %v7306_v43 = vadd.f32 %v2470_v22, %v2233_v14 }
 0x25e   : > { %v2165_v53 = vpop.f32.mrf.mxu0  ;;  %5614 = vmatmul.mubr.msk.bf16.gmra.mxu0 %vm651_vm2, %v3212_v61 }
 0x25f   : > { %v2475_v6 = vpop.f32.mrf.mxu1  ;;  %v2234_v51 = vadd.f32 %v2165_v53, %v7100_v54  ;;  %5617 = vmatprep.mubr.msk.bf16.mxu0 %vm5943_vm1, %v7868_v55 }
 0x260   : > { %v5375_v18 = vpop.f32.mrf.mxu0 }
 0x261   : > { %v5445_v7 = vpop.f32.mrf.mxu1  ;;  %v7312_v4 = vadd.f32 %v2475_v6, %v2234_v51  ;;  %v3185_v6 = vld [vmem:[#allocation2 + $0x92] sm:$0xff]  ;;  %v3186_v51 = vld [vmem:[#allocation2 + $0x9a] sm:$0xff] }
 0x262   : > { %v2168_v16 = vpop.f32.mrf.mxu0 }
 0x263   : > { %v2478_v58 = vpop.f32.mrf.mxu1  ;;  %v2235_v3 = vadd.f32 %v2168_v16, %v7103_v8  ;;  %v3215_v16 = vpack.c.bf16 %v3186_v51, %v3185_v6 }
 0x264   : > { %v5376_v38 = vpop.f32.mrf.mxu0 }
 0x265   : > { %v5446_v32 = vpop.f32.mrf.mxu1  ;;  %v7315_v41 = vadd.f32 %v2478_v58, %v2235_v3 }
 0x266   : > { %v2173_v35 = vpop.f32.mrf.mxu0  ;;  %5618 = vmatmul.mubr.msk.bf16.gmra.mxu0 %vm651_vm2, %v3213_v60 }
 0x267   : > { %v2483_v54 = vpop.f32.mrf.mxu1  ;;  %v2236_v42 = vadd.f32 %v2173_v35, %v7113_v52  ;;  %5621 = vmatprep.mubr.msk.bf16.mxu0 %vm5943_vm1, %v7868_v55 }
 0x268   : > { %v5379_v23 = vpop.f32.mrf.mxu0 }
 0x269   : > { %v5449_v63 = vpop.f32.mrf.mxu1  ;;  %v7321_v30 = vadd.f32 %v2483_v54, %v2236_v42  ;;  %v3187_v54 = vld [vmem:[#allocation2 + $0xaa] sm:$0xff]  ;;  %v3188_v42 = vld [vmem:[#allocation2 + $0xb2] sm:$0xff] }
 0x26a   : > { %v2176_v8 = vpop.f32.mrf.mxu0 }
 0x26b   : > { %v2486_v56 = vpop.f32.mrf.mxu1  ;;  %v2237_v22 = vadd.f32 %v2176_v8, %v7116_v39  ;;  %v3216_v8 = vpack.c.bf16 %v3188_v42, %v3187_v54 }
 0x26c   : > { %v5380_v61 = vpop.f32.mrf.mxu0 }
 0x26d   : > { %v5450_v14 = vpop.f32.mrf.mxu1  ;;  %v7324_v9 = vadd.f32 %v2486_v56, %v2237_v22 }
 0x26e   : > { %v2181_v17 = vpop.f32.mrf.mxu0  ;;  %5622 = vmatmul.mubr.msk.bf16.gmra.mxu0 %vm651_vm2, %v3214_v26 }
 0x26f   : > { %v2491_v52 = vpop.f32.mrf.mxu1  ;;  %v2238_v53 = vadd.f32 %v2181_v17, %v7126_v25  ;;  %5625 = vmatprep.mubr.msk.bf16.mxu0 %vm5943_vm1, %v7868_v55 }
 0x270   : > { %v5383_v44 = vpop.f32.mrf.mxu0 }
 0x271   : > { %v5453_v12 = vpop.f32.mrf.mxu1  ;;  %v7330_v18 = vadd.f32 %v2491_v52, %v2238_v53  ;;  %v3189_v52 = vld [vmem:[#allocation2 + $0xc2] sm:$0xff]  ;;  %v3190_v53 = vld [vmem:[#allocation2 + $0xca] sm:$0xff] }
 0x272   : > { %v2184_v39 = vpop.f32.mrf.mxu0 }
 0x273   : > { %v2494_v7 = vpop.f32.mrf.mxu1  ;;  %v2239_v58 = vadd.f32 %v2184_v39, %v7129_v10  ;;  %v3217_v39 = vpack.c.bf16 %v3190_v53, %v3189_v52 }
 0x274   : > { %v5384_v60 = vpop.f32.mrf.mxu0 }
 0x275   : > { %v5454_v3 = vpop.f32.mrf.mxu1  ;;  %v7333_v38 = vadd.f32 %v2494_v7, %v2239_v58 }
 0x276   : > { %v2189_v32 = vpop.f32.mrf.mxu0  ;;  %5626 = vmatmul.mubr.msk.bf16.gmra.mxu0 %vm651_vm2, %v3215_v16 }
 0x277   : > { %v2499_v25 = vpop.f32.mrf.mxu1  ;;  %v2240_v35 = vadd.f32 %v2189_v32, %v7139_v11  ;;  %5629 = vmatprep.mubr.msk.bf16.mxu0 %vm5943_vm1, %v7868_v55 }
 0x278   : > { %v5387_v36 = vpop.f32.mrf.mxu0 }
 0x279   : > { %v5457_v34 = vpop.f32.mrf.mxu1  ;;  %v7339_v23 = vadd.f32 %v2499_v25, %v2240_v35  ;;  %v3191_v25 = vld [vmem:[#allocation2 + $0xda] sm:$0xff]  ;;  %v3192_v35 = vld [vmem:[#allocation2 + $0xe2] sm:$0xff] }
 0x27a   : > { %v2192_v10 = vpop.f32.mrf.mxu0 }
 0x27b   : > { %v2502_v63 = vpop.f32.mrf.mxu1  ;;  %v2241_v56 = vadd.f32 %v2192_v10, %v7142_v48  ;;  %v3218_v10 = vpack.c.bf16 %v3192_v35, %v3191_v25 }
 0x27c   : > { %v5388_v26 = vpop.f32.mrf.mxu0 }
 0x27d   : > { %v5458_v22 = vpop.f32.mrf.mxu1  ;;  %v7342_v61 = vadd.f32 %v2502_v63, %v2241_v56 }
 0x27e   : > { %v2197_v14 = vpop.f32.mrf.mxu0  ;;  %5630 = vmatmul.mubr.msk.bf16.gmra.mxu0 %vm651_vm2, %v3216_v8 }
 0x27f   : > { %v2507_v11 = vpop.f32.mrf.mxu1  ;;  %v2242_v17 = vadd.f32 %v2197_v14, %v7152_v50  ;;  %5633 = vmatprep.mubr.msk.bf16.mxu0 %vm5943_vm1, %v7868_v55 }
 0x280   : > { %v5391_v6 = vpop.f32.mrf.mxu0 }
 0x281   : > { %v5461_v51 = vpop.f32.mrf.mxu1  ;;  %v7348_v44 = vadd.f32 %v2507_v11, %v2242_v17  ;;  %v3193_v11 = vld [vmem:[#allocation2 + $0xf2] sm:$0xff]  ;;  %v3194_v17 = vld [vmem:[#allocation2 + $0xfa] sm:$0xff] }
 0x282   : > { %v2200_v48 = vpop.f32.mrf.mxu0 }
 0x283   : > { %v2510_v12 = vpop.f32.mrf.mxu1  ;;  %v2243_v7 = vadd.f32 %v2200_v48, %v7155_v33  ;;  %v3219_v48 = vpack.c.bf16 %v3194_v17, %v3193_v11 }
 0x284   : > { %v5392_v16 = vpop.f32.mrf.mxu0 }
 0x285   : > { %v5462_v58 = vpop.f32.mrf.mxu1  ;;  %v7351_v60 = vadd.f32 %v2510_v12, %v2243_v7 }
 0x286   : > { %v2205_v3 = vpop.f32.mrf.mxu0  ;;  %5634 = vmatmul.mubr.msk.bf16.gmra.mxu0 %vm651_vm2, %v3217_v39 }
 0x287   : > { %v2515_v50 = vpop.f32.mrf.mxu1  ;;  %v2244_v32 = vadd.f32 %v2205_v3, %v7165_v5  ;;  %5637 = vmatprep.mubr.msk.bf16.mxu0 %vm5943_vm1, %v7868_v55 }
 0x288   : > { %v5395_v54 = vpop.f32.mrf.mxu0 }
 0x289   : > { %v5465_v42 = vpop.f32.mrf.mxu1  ;;  %v7357_v36 = vadd.f32 %v2515_v50, %v2244_v32  ;;  %v3195_v50 = vld [vmem:[#allocation2 + $0x10a] sm:$0xff]  ;;  %v3196_v32 = vld [vmem:[#allocation2 + $0x112] sm:$0xff] }
 0x28a   : > { %v2208_v33 = vpop.f32.mrf.mxu0 }
 0x28b   : > { %v2518_v34 = vpop.f32.mrf.mxu1  ;;  %v2245_v63 = vadd.f32 %v2208_v33, %v7168_v21  ;;  %v3220_v33 = vpack.c.bf16 %v3196_v32, %v3195_v50 }
 0x28c   : > { %v5396_v8 = vpop.f32.mrf.mxu0 }
 0x28d   : > { %v5466_v56 = vpop.f32.mrf.mxu1  ;;  %v7360_v26 = vadd.f32 %v2518_v34, %v2245_v63 }
 0x28e   : > { %v2698_v22 = vpop.f32.mrf.mxu0  ;;  %5638 = vmatmul.mubr.msk.bf16.gmra.mxu0 %vm651_vm2, %v3218_v10 }
 0x28f   : > { %v3008_v5 = vpop.f32.mrf.mxu1  ;;  %v2833_v14 = vadd.f32 %v2698_v22, %v7178_v13  ;;  %5641 = vmatprep.mubr.msk.bf16.mxu0 %vm5943_vm1, %v7868_v55  ;;  %v3197_v22 = vld [vmem:[#allocation2 + $0x122] sm:$0xff] }
 0x290   : > { %v5471_v52 = vpop.f32.mrf.mxu0 }
 0x291   : > { %v5541_v53 = vpop.f32.mrf.mxu1  ;;  %v7366_v6 = vadd.f32 %v3008_v5, %v2833_v14  ;;  %v3198_v5 = vld [vmem:[#allocation2 + $0x12a] sm:$0xff] }
 0x292   : > { %v2701_v21 = vpop.f32.mrf.mxu0 }
 0x293   : > { %v3011_v51 = vpop.f32.mrf.mxu1  ;;  %v2834_v12 = vadd.f32 %v2701_v21, %v7181_v40  ;;  %v3221_v21 = vpack.c.bf16 %v3198_v5, %v3197_v22 }
 0x294   : > { %v5472_v39 = vpop.f32.mrf.mxu0 }
 0x295   : > { %v5542_v7 = vpop.f32.mrf.mxu1  ;;  %v7369_v16 = vadd.f32 %v3011_v51, %v2834_v12 }
 0x296   : > { %v2706_v58 = vpop.f32.mrf.mxu0  ;;  %5642 = vmatmul.mubr.msk.bf16.gmra.mxu0 %vm651_vm2, %v3219_v48 }
 0x297   : > { %v3016_v13 = vpop.f32.mrf.mxu1  ;;  %v2835_v3 = vadd.f32 %v2706_v58, %v7191_v47  ;;  %5645 = vmatprep.mubr.msk.bf16.mxu0 %vm5943_vm1, %v7868_v55 }
 0x298   : > { %v5475_v25 = vpop.f32.mrf.mxu0 }
 0x299   : > { %v5545_v35 = vpop.f32.mrf.mxu1  ;;  %v7375_v54 = vadd.f32 %v3016_v13, %v2835_v3  ;;  %v3199_v13 = vld [vmem:[#allocation2 + $0x13a] sm:$0xff]  ;;  %v3200_v3 = vld [vmem:[#allocation2 + $0x142] sm:$0xff] }
 0x29a   : > { %v2709_v40 = vpop.f32.mrf.mxu0 }
 0x29b   : > { %v3019_v42 = vpop.f32.mrf.mxu1  ;;  %v2836_v34 = vadd.f32 %v2709_v40, %v7194_v24  ;;  %v3222_v40 = vpack.c.bf16 %v3200_v3, %v3199_v13 }
 0x29c   : > { %v5476_v10 = vpop.f32.mrf.mxu0 }
 0x29d   : > { %v5546_v63 = vpop.f32.mrf.mxu1  ;;  %v7378_v8 = vadd.f32 %v3019_v42, %v2836_v34 }
 0x29e   : > { %v2714_v47 = vpop.f32.mrf.mxu0  ;;  %5646 = vmatmul.mubr.msk.bf16.gmra.mxu0 %vm651_vm2, %v3220_v33 }
 0x29f   : > { %v3024_v24 = vpop.f32.mrf.mxu1  ;;  %v2837_v56 = vadd.f32 %v2714_v47, %v7204_v0  ;;  %5649 = vmatprep.mubr.msk.bf16.mxu0 %vm5943_vm1, %v7868_v55 }
 0x2a0   : > { %v5479_v14 = vpop.f32.mrf.mxu0 }
 0x2a1   : > { %v5549_v11 = vpop.f32.mrf.mxu1  ;;  %v7418_v17 = vadd.f32 %v3024_v24, %v2837_v56  ;;  %v3201_v24 = vld [vmem:[#allocation2 + $0x152] sm:$0xff]  ;;  %v3202_v56 = vld [vmem:[#allocation2 + $0x15a] sm:$0xff] }
 0x2a2   : > { %v2717_v52 = vpop.f32.mrf.mxu0 }
 0x2a3   : > { %v3027_v53 = vpop.f32.mrf.mxu1  ;;  %v2838_v51 = vadd.f32 %v2717_v52, %v7207_v15  ;;  %v3223_v52 = vpack.c.bf16 %v3202_v56, %v3201_v24 }
 0x2a4   : > { %v5480_v48 = vpop.f32.mrf.mxu0 }
 0x2a5   : > { %v5550_v12 = vpop.f32.mrf.mxu1  ;;  %v7421_v39 = vadd.f32 %v3027_v53, %v2838_v51 }
 0x2a6   : > { %v2722_v7 = vpop.f32.mrf.mxu0  ;;  %5650 = vmatmul.mubr.msk.bf16.gmra.mxu0 %vm651_vm2, %v3221_v21 }
 0x2a7   : > { %v3032_v0 = vpop.f32.mrf.mxu1  ;;  %v2839_v58 = vadd.f32 %v2722_v7, %v7217_v57  ;;  %5653 = vmatprep.mubr.msk.bf16.mxu0 %vm5943_vm1, %v7868_v55 }
 0x2a8   : > { %v5483_v50 = vpop.f32.mrf.mxu0 }
 0x2a9   : > { %v5553_v32 = vpop.f32.mrf.mxu1  ;;  %v7427_v25 = vadd.f32 %v3032_v0, %v2839_v58  ;;  %v3203_v0 = vld [vmem:[#allocation2 + $0x16a] sm:$0xff]  ;;  %v3204_v58 = vld [vmem:[#allocation2 + $0x172] sm:$0xff] }
 0x2aa   : > { %v2725_v15 = vpop.f32.mrf.mxu0 }
 0x2ab   : > { %v3035_v35 = vpop.f32.mrf.mxu1  ;;  %v2840_v42 = vadd.f32 %v2725_v15, %v7220_v31  ;;  %v3224_v15 = vpack.c.bf16 %v3204_v58, %v3203_v0 }
 0x2ac   : > { %v5484_v33 = vpop.f32.mrf.mxu0 }
 0x2ad   : > { %v5554_v34 = vpop.f32.mrf.mxu1  ;;  %v7430_v10 = vadd.f32 %v3035_v35, %v2840_v42 }
 0x2ae   : > { %v2730_v63 = vpop.f32.mrf.mxu0  ;;  %5654 = vmatmul.mubr.msk.bf16.gmra.mxu0 %vm651_vm2, %v3222_v40 }
 0x2af   : > { %v3040_v57 = vpop.f32.mrf.mxu1  ;;  %v2841_v47 = vadd.f32 %v2730_v63, %v7230_v2  ;;  %5657 = vmatprep.mubr.msk.bf16.mxu0 %vm5943_vm1, %v7868_v55 }
 0x2b0   : > { %v5487_v22 = vpop.f32.mrf.mxu0 }
 0x2b1   : > { %v5557_v5 = vpop.f32.mrf.mxu1  ;;  %v7436_v14 = vadd.f32 %v3040_v57, %v2841_v47  ;;  %v3205_v57 = vld [vmem:[#allocation2 + $0x182] sm:$0xff]  ;;  %v3206_v47 = vld [vmem:[#allocation2 + $0x18a] sm:$0xff] }
 0x2b2   : > { %v2733_v31 = vpop.f32.mrf.mxu0 }
 0x2b3   : > { %v3043_v11 = vpop.f32.mrf.mxu1  ;;  %v2842_v53 = vadd.f32 %v2733_v31, %v7233_v46  ;;  %v3225_v31 = vpack.c.bf16 %v3206_v47, %v3205_v57 }
 0x2b4   : > { %v5488_v21 = vpop.f32.mrf.mxu0 }
 0x2b5   : > { %v5558_v51 = vpop.f32.mrf.mxu1  ;;  %v7439_v48 = vadd.f32 %v3043_v11, %v2842_v53 }
 0x2b6   : > { %v2738_v12 = vpop.f32.mrf.mxu0  ;;  %5658 = vmatmul.mubr.msk.bf16.gmra.mxu0 %vm651_vm2, %v3223_v52 }
 0x2b7   : > { %v3048_v2 = vpop.f32.mrf.mxu1  ;;  %v2843_v7 = vadd.f32 %v2738_v12, %v7243_v29  ;;  %5661 = vmatprep.mubr.msk.bf16.mxu0 %vm5943_vm1, %v7868_v55 }
 0x2b8   : > { %v5491_v13 = vpop.f32.mrf.mxu0 }
 0x2b9   : > { %v5561_v3 = vpop.f32.mrf.mxu1  ;;  %v7445_v50 = vadd.f32 %v3048_v2, %v2843_v7  ;;  %v3207_v2 = vld [vmem:[#allocation2 + $0x19a] sm:$0xff]  ;;  %v3208_v7 = vld [vmem:[#allocation2 + $0x1a2] sm:$0xff] }
 0x2ba   : > { %v2741_v46 = vpop.f32.mrf.mxu0 }
 0x2bb   : > { %v3051_v32 = vpop.f32.mrf.mxu1  ;;  %v2844_v35 = vadd.f32 %v2741_v46, %v7246_v59  ;;  %v3226_v46 = vpack.c.bf16 %v3208_v7, %v3207_v2 }
 0x2bc   : > { %v5492_v40 = vpop.f32.mrf.mxu0 }
 0x2bd   : > { %v5562_v42 = vpop.f32.mrf.mxu1  ;;  %v7448_v33 = vadd.f32 %v3051_v32, %v2844_v35 }
 0x2be   : > { %v2746_v34 = vpop.f32.mrf.mxu0  ;;  %5662 = vmatmul.mubr.msk.bf16.gmra.mxu0 %vm651_vm2, %v3224_v15 }
 0x2bf   : > { %v3056_v29 = vpop.f32.mrf.mxu1  ;;  %v2845_v63 = vadd.f32 %v2746_v34, %v7256_v27  ;;  %5665 = vmatprep.mubr.msk.bf16.mxu0 %vm5943_vm1, %v7868_v55 }
 0x2c0   : > { %v5495_v24 = vpop.f32.mrf.mxu0 }
 0x2c1   : > { %v5565_v56 = vpop.f32.mrf.mxu1  ;;  %v7454_v22 = vadd.f32 %v3056_v29, %v2845_v63  ;;  %v3209_v29 = vld [vmem:[#allocation2 + $0x1b2] sm:$0xff]  ;;  %v3210_v63 = vld [vmem:[#allocation2 + $0x1ba] sm:$0xff] }
 0x2c2   : > { %v2749_v59 = vpop.f32.mrf.mxu0 }
 0x2c3   : > { %v3059_v5 = vpop.f32.mrf.mxu1  ;;  %v2846_v11 = vadd.f32 %v2749_v59, %v7259_v19  ;;  %v3227_v59 = vpack.c.bf16 %v3210_v63, %v3209_v29 }
 0x2c4   : > { %v5496_v52 = vpop.f32.mrf.mxu0 }
 0x2c5   : > { %v5566_v53 = vpop.f32.mrf.mxu1  ;;  %v7457_v21 = vadd.f32 %v3059_v5, %v2846_v11 }
 0x2c6   : > { %v2754_v51 = vpop.f32.mrf.mxu0  ;;  %5666 = vmatmul.mubr.msk.bf16.gmra.mxu0 %vm651_vm2, %v3225_v31 }
 0x2c7   : > { %v3064_v27 = vpop.f32.mrf.mxu1  ;;  %v2847_v12 = vadd.f32 %v2754_v51, %v7269_v45  ;;  %5669 = vmatprep.mubr.msk.bf16.mxu0 %vm5943_vm1, %v7868_v55 }
 0x2c8   : > { %v5499_v0 = vpop.f32.mrf.mxu0 }
 0x2c9   : > { %v5569_v58 = vpop.f32.mrf.mxu1  ;;  %v7463_v13 = vadd.f32 %v3064_v27, %v2847_v12 }
 0x2ca   : > { %v2757_v19 = vpop.f32.mrf.mxu0 }
 0x2cb   : > { %v3067_v3 = vpop.f32.mrf.mxu1  ;;  %v2848_v32 = vadd.f32 %v2757_v19, %v7272_v49 }
 0x2cc   : > { %v5500_v15 = vpop.f32.mrf.mxu0 }
 0x2cd   : > { %v5570_v35 = vpop.f32.mrf.mxu1  ;;  %v7466_v40 = vadd.f32 %v3067_v3, %v2848_v32 }
 0x2ce   : > { %v2762_v42 = vpop.f32.mrf.mxu0  ;;  %5670 = vmatmul.mubr.msk.bf16.gmra.mxu0 %vm651_vm2, %v3226_v46 }
 0x2cf   : > { %v3072_v45 = vpop.f32.mrf.mxu1  ;;  %v2849_v34 = vadd.f32 %v2762_v42, %v7282_v62  ;;  %5673 = vmatprep.mubr.msk.bf16.mxu0 %vm5943_vm1, %v7868_v55 }
 0x2d0   : > { %v5503_v57 = vpop.f32.mrf.mxu0 }
 0x2d1   : > { %v5573_v47 = vpop.f32.mrf.mxu1  ;;  %v7472_v24 = vadd.f32 %v3072_v45, %v2849_v34 }
 0x2d2   : > { %v2765_v49 = vpop.f32.mrf.mxu0 }
 0x2d3   : > { %v3075_v56 = vpop.f32.mrf.mxu1  ;;  %v2850_v5 = vadd.f32 %v2765_v49, %v7285_v28 }
 0x2d4   : > { %v5504_v31 = vpop.f32.mrf.mxu0 }
 0x2d5   : > { %v5574_v11 = vpop.f32.mrf.mxu1  ;;  %v7475_v52 = vadd.f32 %v3075_v56, %v2850_v5 }
 0x2d6   : > { %v2770_v53 = vpop.f32.mrf.mxu0  ;;  %5674 = vmatmul.mubr.msk.bf16.gmra.mxu0 %vm651_vm2, %v3227_v59 }
 0x2d7   : > { %v3080_v62 = vpop.f32.mrf.mxu1  ;;  %v2851_v51 = vadd.f32 %v2770_v53, %v7294_v20  ;;  %5745 = vmatprep.mubr.msk.bf16.mxu0 %vm5943_vm1, %v7868_v55 }
 0x2d8   : > { %v5507_v27 = vpop.f32.mrf.mxu0 }
 0x2d9   : > { %v5577_v12 = vpop.f32.mrf.mxu1  ;;  %v7481_v2 = vadd.f32 %v3080_v62, %v2851_v51 }
 0x2da   : > { %v2773_v7 = vpop.f32.mrf.mxu0 }
 0x2db   : > { %v3083_v0 = vpop.f32.mrf.mxu1  ;;  %v2852_v28 = vadd.f32 %v2773_v7, %v7297_v1 }
 0x2dc   : > { %v5508_v58 = vpop.f32.mrf.mxu0 }
 0x2dd   : > { %v5578_v19 = vpop.f32.mrf.mxu1  ;;  %v7484_v3 = vadd.f32 %v3083_v0, %v2852_v28 }
 0x2de   : > { %v2778_v46 = vpop.f32.mrf.mxu0 }
 0x2df   : > { %v3088_v32 = vpop.f32.mrf.mxu1  ;;  %v2853_v15 = vadd.f32 %v2778_v46, %v7303_v37 }
 0x2e0   : > { %v5511_v20 = vpop.f32.mrf.mxu0 }
 0x2e1   : > { %v5581_v35 = vpop.f32.mrf.mxu1  ;;  %v7487_v42 = vadd.f32 %v3088_v32, %v2853_v15 }
 0x2e2   : > { %v2781_v45 = vpop.f32.mrf.mxu0 }
 0x2e3   : > { %v3091_v34 = vpop.f32.mrf.mxu1  ;;  %v2854_v29 = vadd.f32 %v2781_v45, %v7306_v43 }
 0x2e4   : > { %v5512_v63 = vpop.f32.mrf.mxu0 }
 0x2e5   : > { %v5582_v57 = vpop.f32.mrf.mxu1  ;;  %v7490_v47 = vadd.f32 %v3091_v34, %v2854_v29 }
 0x2e6   : > { %v2786_v1 = vpop.f32.mrf.mxu0 }
 0x2e7   : > { %v3096_v49 = vpop.f32.mrf.mxu1  ;;  %v2855_v56 = vadd.f32 %v2786_v1, %v7312_v4 }
 0x2e8   : > { %v5515_v59 = vpop.f32.mrf.mxu0 }
 0x2e9   : > { %v5585_v5 = vpop.f32.mrf.mxu1  ;;  %v7493_v31 = vadd.f32 %v3096_v49, %v2855_v56 }
 0x2ea   : > { %v2789_v37 = vpop.f32.mrf.mxu0 }
 0x2eb   : > { %v3099_v11 = vpop.f32.mrf.mxu1  ;;  %v2856_v53 = vadd.f32 %v2789_v37, %v7315_v41 }
 0x2ec   : > { %v5516_v62 = vpop.f32.mrf.mxu0 }
 0x2ed   : > { %v5586_v51 = vpop.f32.mrf.mxu1  ;;  %v7496_v27 = vadd.f32 %v3099_v11, %v2856_v53 }
 0x2ee   : > { %v2794_v43 = vpop.f32.mrf.mxu0 }
 0x2ef   : > { %v3104_v12 = vpop.f32.mrf.mxu1  ;;  %v2857_v7 = vadd.f32 %v2794_v43, %v7321_v30 }
 0x2f0   : > { %v5519_v0 = vpop.f32.mrf.mxu0 }
 0x2f1   : > { %v5589_v28 = vpop.f32.mrf.mxu1  ;;  %v7499_v58 = vadd.f32 %v3104_v12, %v2857_v7 }
 0x2f2   : > { %v2797_v4 = vpop.f32.mrf.mxu0 }
 0x2f3   : > { %v3107_v19 = vpop.f32.mrf.mxu1  ;;  %v2858_v46 = vadd.f32 %v2797_v4, %v7324_v9 }
 0x2f4   : > { %v5520_v32 = vpop.f32.mrf.mxu0 }
 0x2f5   : > { %v5590_v15 = vpop.f32.mrf.mxu1  ;;  %v7502_v20 = vadd.f32 %v3107_v19, %v2858_v46 }
 0x2f6   : > { %v2802_v41 = vpop.f32.mrf.mxu0 }
 0x2f7   : > { %v3112_v35 = vpop.f32.mrf.mxu1  ;;  %v2859_v45 = vadd.f32 %v2802_v41, %v7330_v18 }
 0x2f8   : > { %v5523_v34 = vpop.f32.mrf.mxu0 }
 0x2f9   : > { %v5593_v29 = vpop.f32.mrf.mxu1  ;;  %v7505_v63 = vadd.f32 %v3112_v35, %v2859_v45 }
 0x2fa   : > { %v2805_v30 = vpop.f32.mrf.mxu0 }
 0x2fb   : > { %v3115_v57 = vpop.f32.mrf.mxu1  ;;  %v2860_v1 = vadd.f32 %v2805_v30, %v7333_v38 }
 0x2fc   : > { %v5524_v49 = vpop.f32.mrf.mxu0 }
 0x2fd   : > { %v5594_v56 = vpop.f32.mrf.mxu1  ;;  %v7508_v59 = vadd.f32 %v3115_v57, %v2860_v1 }
 0x2fe   : > { %v2810_v9 = vpop.f32.mrf.mxu0 }
 0x2ff   : > { %v3120_v5 = vpop.f32.mrf.mxu1  ;;  %v2861_v37 = vadd.f32 %v2810_v9, %v7339_v23 }
 0x300   : > { %v5527_v11 = vpop.f32.mrf.mxu0 }
 0x301   : > { %v5597_v53 = vpop.f32.mrf.mxu1  ;;  %v7511_v62 = vadd.f32 %v3120_v5, %v2861_v37 }
 0x302   : > { %v2813_v18 = vpop.f32.mrf.mxu0  ;;  %v7531_v53 = vld [vmem:[%s7839_s4] ss:$0 sm:$0xff] }
 0x303   : > { %v3123_v51 = vpop.f32.mrf.mxu1  ;;  %v2862_v43 = vadd.f32 %v2813_v18, %v7342_v61 }
 0x304   : > { %v5528_v12 = vpop.f32.mrf.mxu0 }
 0x305   : > { %v5598_v7 = vpop.f32.mrf.mxu1  ;;  %v7514_v0 = vadd.f32 %v3123_v51, %v2862_v43 }
 0x306   : > { %v2818_v38 = vpop.f32.mrf.mxu0 }
 0x307   : > { %v3128_v28 = vpop.f32.mrf.mxu1  ;;  %v2863_v4 = vadd.f32 %v2818_v38, %v7348_v44 }
 0x308   : > { %v5531_v19 = vpop.f32.mrf.mxu0 }
 0x309   : > { %v5601_v46 = vpop.f32.mrf.mxu1  ;;  %v7517_v32 = vadd.f32 %v3128_v28, %v2863_v4 }
 0x30a   : > { %v2821_v23 = vpop.f32.mrf.mxu0 }
 0x30b   : > { %v3131_v15 = vpop.f32.mrf.mxu1  ;;  %v2864_v41 = vadd.f32 %v2821_v23, %v7351_v60 }
 0x30c   : > { %v5532_v35 = vpop.f32.mrf.mxu0 }
 0x30d   : > { %v5602_v45 = vpop.f32.mrf.mxu1  ;;  %v7520_v34 = vadd.f32 %v3131_v15, %v2864_v41 }
 0x30e   : > { %v2826_v61 = vpop.f32.mrf.mxu0 }
 0x30f   : > { %v3136_v29 = vpop.f32.mrf.mxu1  ;;  %v2865_v30 = vadd.f32 %v2826_v61, %v7357_v36 }
 0x310   : > { %v5535_v57 = vpop.f32.mrf.mxu0 }
 0x311   : > { %v5605_v1 = vpop.f32.mrf.mxu1  ;;  %v7523_v49 = vadd.f32 %v3136_v29, %v2865_v30 }
 0x312   : > { %v2829_v44 = vpop.f32.mrf.mxu0 }
 0x313   : > { %v3139_v56 = vpop.f32.mrf.mxu1  ;;  %v2866_v9 = vadd.f32 %v2829_v44, %v7360_v26 }
 0x314   : > { %v5536_v5 = vpop.f32.mrf.mxu0 }
 0x315   : > { %v5606_v37 = vpop.f32.mrf.mxu1  ;;  %v7526_v11 = vadd.f32 %v3139_v56, %v2866_v9 }
 0x316   : > { %v3318_v60 = vpop.f32.mrf.mxu0 }
 0x317   : > { %v3453_v36 = vadd.f32 %v3318_v60, %v7366_v6 }
 0x318   : > { %v5611_v18 = vpop.f32.mrf.mxu0 }
 0x319   : > { %vm3487_vm6 = vcmp.gt.f32.partialorder %v3453_v36, 0.0  ;;  %v3528_v51 = vmul.f32 %v7531_v53, %v3453_v36 }
 0x31a   : > { %v3321_v43 = vpop.f32.mrf.mxu0 }
 0x31b   : > { %v3562_v12 = vsel %vm3487_vm6, %v3453_v36, %v3528_v51  ;;  %v3454_v26 = vadd.f32 %v3321_v43, %v7369_v16 }
 0x31c   : > { %3597 = vst.msk [vmem:[#allocation3 + $0x1] sm:$0xff] %vm3596_vm7, %v3562_v12  ;;  %v5612_v7 = vpop.f32.mrf.mxu0 }
 0x31d   : > { %3669 = vst.msk [vmem:[#allocation3] sm:$0xff] %vm3596_vm7, %v7868_v55  ;;  %vm3488_vm8 = vcmp.gt.f32.partialorder %v3454_v26, 0.0  ;;  %v3529_v38 = vmul.f32 %v7531_v53, %v3454_v26 }
 0x31e   : > { %v3326_v6 = vpop.f32.mrf.mxu0 }
 0x31f   : > { %v3563_v28 = vsel %vm3488_vm8, %v3454_v26, %v3529_v38  ;;  %v3455_v4 = vadd.f32 %v3326_v6, %v7375_v54 }
 0x320   : > { %3598 = vst.msk [vmem:[#allocation3 + $0x9] sm:$0xff] %vm3596_vm7, %v3563_v28  ;;  %v5615_v19 = vpop.f32.mrf.mxu0 }
 0x321   : > { %3670 = vst.msk [vmem:[#allocation3 + $0x8] sm:$0xff] %vm3596_vm7, %v7868_v55  ;;  %vm3489_vm10 = vcmp.gt.f32.partialorder %v3455_v4, 0.0  ;;  %v3530_v16 = vmul.f32 %v7531_v53, %v3455_v4 }
 0x322   : > { %3672 = vst.msk [vmem:[#allocation3 + $0x10] sm:$0x3] %vm3671_vm9, %v7868_v55  ;;  %v3329_v46 = vpop.f32.mrf.mxu0 }
 0x323   : > { %v3564_v23 = vsel %vm3489_vm10, %v3455_v4, %v3530_v16  ;;  %v3456_v15 = vadd.f32 %v3329_v46, %v7378_v8 }
 0x324   : > { %3599 = vst.msk [vmem:[#allocation3 + $0x19] sm:$0xff] %vm3596_vm7, %v3564_v23  ;;  %v5616_v41 = vpop.f32.mrf.mxu0 }
 0x325   : > { %vm3490_vm11 = vcmp.gt.f32.partialorder %v3456_v15, 0.0  ;;  %v3531_v54 = vmul.f32 %v7531_v53, %v3456_v15 }
 0x326   : > { %v3334_v35 = vpop.f32.mrf.mxu0 }
 0x327   : > { %v3565_v45 = vsel %vm3490_vm11, %v3456_v15, %v3531_v54  ;;  %v3457_v61 = vadd.f32 %v3334_v35, %v7418_v17 }
 0x328   : > { %3600 = vst.msk [vmem:[#allocation3 + $0x21] sm:$0xff] %vm3596_vm7, %v3565_v45  ;;  %v5619_v29 = vpop.f32.mrf.mxu0 }
 0x329   : > { %vm3491_vm12 = vcmp.gt.f32.partialorder %v3457_v61, 0.0  ;;  %v3532_v30 = vmul.f32 %v7531_v53, %v3457_v61 }
 0x32a   : > { %v3337_v57 = vpop.f32.mrf.mxu0 }
 0x32b   : > { %v3566_v1 = vsel %vm3491_vm12, %v3457_v61, %v3532_v30  ;;  %v3458_v8 = vadd.f32 %v3337_v57, %v7421_v39 }
 0x32c   : > { %3601 = vst.msk [vmem:[#allocation3 + $0x31] sm:$0xff] %vm3596_vm7, %v3566_v1  ;;  %v5620_v44 = vpop.f32.mrf.mxu0 }
 0x32d   : > { %vm3492_vm13 = vcmp.gt.f32.partialorder %v3458_v8, 0.0  ;;  %v3533_v56 = vmul.f32 %v7531_v53, %v3458_v8 }
 0x32e   : > { %v3342_v9 = vpop.f32.mrf.mxu0 }
 0x32f   : > { %v3567_v5 = vsel %vm3492_vm13, %v3458_v8, %v3533_v56  ;;  %v3459_v17 = vadd.f32 %v3342_v9, %v7427_v25 }
 0x330   : > { %3602 = vst.msk [vmem:[#allocation3 + $0x39] sm:$0xff] %vm3596_vm7, %v3567_v5  ;;  %v5623_v37 = vpop.f32.mrf.mxu0 }
 0x331   : > { %vm3493_vm14 = vcmp.gt.f32.partialorder %v3459_v17, 0.0  ;;  %v3534_v60 = vmul.f32 %v7531_v53, %v3459_v17 }
 0x332   : > { %v3345_v36 = vpop.f32.mrf.mxu0 }
 0x333   : > { %v3568_v18 = vsel %vm3493_vm14, %v3459_v17, %v3534_v60  ;;  %v3460_v39 = vadd.f32 %v3345_v36, %v7430_v10 }
 0x334   : > { %3603 = vst.msk [vmem:[#allocation3 + $0x49] sm:$0xff] %vm3596_vm7, %v3568_v18  ;;  %v5624_v51 = vpop.f32.mrf.mxu0 }
 0x335   : > { %vm3494_vm15 = vcmp.gt.f32.partialorder %v3460_v39, 0.0  ;;  %v3535_v43 = vmul.f32 %v7531_v53, %v3460_v39 }
 0x336   : > { %v3350_v12 = vpop.f32.mrf.mxu0 }
 0x337   : > { %v3569_v26 = vsel %vm3494_vm15, %v3460_v39, %v3535_v43  ;;  %v3461_v25 = vadd.f32 %v3350_v12, %v7436_v14 }
 0x338   : > { %3604 = vst.msk [vmem:[#allocation3 + $0x51] sm:$0xff] %vm3596_vm7, %v3569_v26  ;;  %v5627_v7 = vpop.f32.mrf.mxu0 }
 0x339   : > { %vm3495_vm0 = vcmp.gt.f32.partialorder %v3461_v25, 0.0  ;;  %v3536_v38 = vmul.f32 %v7531_v53, %v3461_v25 }
 0x33a   : > { %v3353_v6 = vpop.f32.mrf.mxu0 }
 0x33b   : > { %v3570_v28 = vsel %vm3495_vm0, %v3461_v25, %v3536_v38  ;;  %v3462_v10 = vadd.f32 %v3353_v6, %v7439_v48 }
 0x33c   : > { %3605 = vst.msk [vmem:[#allocation3 + $0x61] sm:$0xff] %vm3596_vm7, %v3570_v28  ;;  %v5628_v4 = vpop.f32.mrf.mxu0 }
 0x33d   : > { %vm3496_vm3 = vcmp.gt.f32.partialorder %v3462_v10, 0.0  ;;  %v3537_v19 = vmul.f32 %v7531_v53, %v3462_v10 }
 0x33e   : > { %v3358_v16 = vpop.f32.mrf.mxu0 }
 0x33f   : > { %v3571_v46 = vsel %vm3496_vm3, %v3462_v10, %v3537_v19  ;;  %v3463_v14 = vadd.f32 %v3358_v16, %v7445_v50 }
 0x340   : > { %3606 = vst.msk [vmem:[#allocation3 + $0x69] sm:$0xff] %vm3596_vm7, %v3571_v46  ;;  %v5631_v23 = vpop.f32.mrf.mxu0 }
 0x341   : > { %vm3497_vm4 = vcmp.gt.f32.partialorder %v3463_v14, 0.0  ;;  %v3538_v15 = vmul.f32 %v7531_v53, %v3463_v14 }
 0x342   : > { %v3361_v41 = vpop.f32.mrf.mxu0 }
 0x343   : > { %v3572_v54 = vsel %vm3497_vm4, %v3463_v14, %v3538_v15  ;;  %v3464_v48 = vadd.f32 %v3361_v41, %v7448_v33 }
 0x344   : > { %3607 = vst.msk [vmem:[#allocation3 + $0x79] sm:$0xff] %vm3596_vm7, %v3572_v54  ;;  %v5632_v35 = vpop.f32.mrf.mxu0 }
 0x345   : > { %vm3498_vm5 = vcmp.gt.f32.partialorder %v3464_v48, 0.0  ;;  %v3539_v45 = vmul.f32 %v7531_v53, %v3464_v48 }
 0x346   : > { %v3366_v61 = vpop.f32.mrf.mxu0 }
 0x347   : > { %v3573_v29 = vsel %vm3498_vm5, %v3464_v48, %v3539_v45  ;;  %v3465_v50 = vadd.f32 %v3366_v61, %v7454_v22 }
 0x348   : > { %3608 = vst.msk [vmem:[#allocation3 + $0x81] sm:$0xff] %vm3596_vm7, %v3573_v29  ;;  %v5635_v30 = vpop.f32.mrf.mxu0 }
 0x349   : > { %vm3499_vm6 = vcmp.gt.f32.partialorder %v3465_v50, 0.0  ;;  %v3540_v57 = vmul.f32 %v7531_v53, %v3465_v50 }
 0x34a   : > { %v3369_v1 = vpop.f32.mrf.mxu0 }
 0x34b   : > { %v3574_v8 = vsel %vm3499_vm6, %v3465_v50, %v3540_v57  ;;  %v3466_v33 = vadd.f32 %v3369_v1, %v7457_v21 }
 0x34c   : > { %3609 = vst.msk [vmem:[#allocation3 + $0x91] sm:$0xff] %vm3596_vm7, %v3574_v8  ;;  %v5636_v44 = vpop.f32.mrf.mxu0 }
 0x34d   : > { %vm3500_vm8 = vcmp.gt.f32.partialorder %v3466_v33, 0.0  ;;  %v3541_v56 = vmul.f32 %v7531_v53, %v3466_v33 }
 0x34e   : > { %v3374_v9 = vpop.f32.mrf.mxu0 }
 0x34f   : > { %v3575_v5 = vsel %vm3500_vm8, %v3466_v33, %v3541_v56  ;;  %v3467_v22 = vadd.f32 %v3374_v9, %v7463_v13 }
 0x350   : > { %3610 = vst.msk [vmem:[#allocation3 + $0x99] sm:$0xff] %vm3596_vm7, %v3575_v5  ;;  %v5639_v17 = vpop.f32.mrf.mxu0 }
 0x351   : > { %vm3501_vm9 = vcmp.gt.f32.partialorder %v3467_v22, 0.0  ;;  %v3542_v37 = vmul.f32 %v7531_v53, %v3467_v22 }
 0x352   : > { %v3377_v60 = vpop.f32.mrf.mxu0 }
 0x353   : > { %v3576_v36 = vsel %vm3501_vm9, %v3467_v22, %v3542_v37  ;;  %v3468_v21 = vadd.f32 %v3377_v60, %v7466_v40 }
 0x354   : > { %3611 = vst.msk [vmem:[#allocation3 + $0xa9] sm:$0xff] %vm3596_vm7, %v3576_v36  ;;  %v5640_v18 = vpop.f32.mrf.mxu0 }
 0x355   : > { %vm3502_vm10 = vcmp.gt.f32.partialorder %v3468_v21, 0.0  ;;  %v3543_v39 = vmul.f32 %v7531_v53, %v3468_v21 }
 0x356   : > { %v3382_v51 = vpop.f32.mrf.mxu0 }
 0x357   : > { %v3577_v43 = vsel %vm3502_vm10, %v3468_v21, %v3543_v39  ;;  %v3469_v13 = vadd.f32 %v3382_v51, %v7472_v24 }
 0x358   : > { %3612 = vst.msk [vmem:[#allocation3 + $0xb1] sm:$0xff] %vm3596_vm7, %v3577_v43  ;;  %v5643_v12 = vpop.f32.mrf.mxu0 }
 0x359   : > { %vm3503_vm11 = vcmp.gt.f32.partialorder %v3469_v13, 0.0  ;;  %v3544_v26 = vmul.f32 %v7531_v53, %v3469_v13 }
 0x35a   : > { %v3385_v25 = vpop.f32.mrf.mxu0 }
 0x35b   : > { %v3578_v7 = vsel %vm3503_vm11, %v3469_v13, %v3544_v26  ;;  %v3470_v40 = vadd.f32 %v3385_v25, %v7475_v52 }
 0x35c   : > { %3613 = vst.msk [vmem:[#allocation3 + $0xc1] sm:$0xff] %vm3596_vm7, %v3578_v7  ;;  %v5644_v38 = vpop.f32.mrf.mxu0 }
 0x35d   : > { %vm3504_vm12 = vcmp.gt.f32.partialorder %v3470_v40, 0.0  ;;  %v3545_v6 = vmul.f32 %v7531_v53, %v3470_v40 }
 0x35e   : > { %v3390_v28 = vpop.f32.mrf.mxu0 }
 0x35f   : > { %v3579_v10 = vsel %vm3504_vm12, %v3470_v40, %v3545_v6  ;;  %v3471_v24 = vadd.f32 %v3390_v28, %v7481_v2 }
 0x360   : > { %3614 = vst.msk [vmem:[#allocation3 + $0xc9] sm:$0xff] %vm3596_vm7, %v3579_v10  ;;  %v5647_v4 = vpop.f32.mrf.mxu0 }
 0x361   : > { %vm3505_vm13 = vcmp.gt.f32.partialorder %v3471_v24, 0.0  ;;  %v3546_v19 = vmul.f32 %v7531_v53, %v3471_v24 }
 0x362   : > { %v3393_v16 = vpop.f32.mrf.mxu0 }
 0x363   : > { %v3580_v46 = vsel %vm3505_vm13, %v3471_v24, %v3546_v19  ;;  %v3472_v52 = vadd.f32 %v3393_v16, %v7484_v3 }
 0x364   : > { %3615 = vst.msk [vmem:[#allocation3 + $0xd9] sm:$0xff] %vm3596_vm7, %v3580_v46  ;;  %v5648_v14 = vpop.f32.mrf.mxu0 }
 0x365   : > { %vm3506_vm14 = vcmp.gt.f32.partialorder %v3472_v52, 0.0  ;;  %v3547_v23 = vmul.f32 %v7531_v53, %v3472_v52 }
 0x366   : > { %v3398_v15 = vpop.f32.mrf.mxu0 }
 0x367   : > { %v3581_v41 = vsel %vm3506_vm14, %v3472_v52, %v3547_v23  ;;  %v3473_v2 = vadd.f32 %v3398_v15, %v7487_v42 }
 0x368   : > { %3616 = vst.msk [vmem:[#allocation3 + $0xe1] sm:$0xff] %vm3596_vm7, %v3581_v41  ;;  %v5651_v54 = vpop.f32.mrf.mxu0 }
 0x369   : > { %vm3507_vm15 = vcmp.gt.f32.partialorder %v3473_v2, 0.0  ;;  %v3548_v48 = vmul.f32 %v7531_v53, %v3473_v2 }
 0x36a   : > { %v3401_v35 = vpop.f32.mrf.mxu0 }
 0x36b   : > { %v3582_v45 = vsel %vm3507_vm15, %v3473_v2, %v3548_v48  ;;  %v3474_v3 = vadd.f32 %v3401_v35, %v7490_v47 }
 0x36c   : > { %3617 = vst.msk [vmem:[#allocation3 + $0xf1] sm:$0xff] %vm3596_vm7, %v3582_v45  ;;  %v5652_v61 = vpop.f32.mrf.mxu0 }
 0x36d   : > { %vm3508_vm0 = vcmp.gt.f32.partialorder %v3474_v3, 0.0  ;;  %v3549_v29 = vmul.f32 %v7531_v53, %v3474_v3 }
 0x36e   : > { %v3406_v50 = vpop.f32.mrf.mxu0 }
 0x36f   : > { %v3583_v30 = vsel %vm3508_vm0, %v3474_v3, %v3549_v29  ;;  %v3475_v42 = vadd.f32 %v3406_v50, %v7493_v31 }
 0x370   : > { %3618 = vst.msk [vmem:[#allocation3 + $0xf9] sm:$0xff] %vm3596_vm7, %v3583_v30  ;;  %v5655_v57 = vpop.f32.mrf.mxu0 }
 0x371   : > { %vm3509_vm3 = vcmp.gt.f32.partialorder %v3475_v42, 0.0  ;;  %v3550_v1 = vmul.f32 %v7531_v53, %v3475_v42 }
 0x372   : > { %v3409_v8 = vpop.f32.mrf.mxu0 }
 0x373   : > { %v3584_v33 = vsel %vm3509_vm3, %v3475_v42, %v3550_v1  ;;  %v3476_v47 = vadd.f32 %v3409_v8, %v7496_v27  ;;  %v3702_v1 = vld [vmem:[#allocation3 + $0xc1] ss:$2 sm:$0xff] }
 0x374   : > { %3619 = vst.msk [vmem:[#allocation3 + $0x109] sm:$0xff] %vm3596_vm7, %v3584_v33  ;;  %v5656_v44 = vpop.f32.mrf.mxu0 }
 0x375   : > { %vm3510_vm4 = vcmp.gt.f32.partialorder %v3476_v47, 0.0  ;;  %v3551_v56 = vmul.f32 %v7531_v53, %v3476_v47 }
 0x376   : > { %v3414_v9 = vpop.f32.mrf.mxu0 }
 0x377   : > { %v3585_v5 = vsel %vm3510_vm4, %v3476_v47, %v3551_v56  ;;  %v3477_v31 = vadd.f32 %v3414_v9, %v7499_v58  ;;  %v3704_v42 = vld [vmem:[#allocation3 + $0xf1] ss:$2 sm:$0xff] }
 0x378   : > { %3620 = vst.msk [vmem:[#allocation3 + $0x111] sm:$0xff] %vm3596_vm7, %v3585_v5  ;;  %v5659_v22 = vpop.f32.mrf.mxu0  ;;  %v3713_v8 = vpack.c.bf16 %v3704_v42, %v3702_v1  ;;  %v3700_v5 = vld [vmem:[#allocation3 + $0x91] ss:$2 sm:$0xff] }
 0x379   : > { %vm3511_vm5 = vcmp.gt.f32.partialorder %v3477_v31, 0.0  ;;  %v3552_v17 = vmul.f32 %v7531_v53, %v3477_v31  ;;  %v4068_v22 = vld [vmem:[#allocation3 + $0xda] ss:$2 sm:$0xff]  ;;  %v4216_v42 = vld [vmem:[#allocation3 + $0x31] ss:$2 sm:$0xff] }
 0x37a   : > { %v3417_v37 = vpop.f32.mrf.mxu0 }
 0x37b   : > { %v3586_v60 = vsel %vm3511_vm5, %v3477_v31, %v3552_v17  ;;  %v3478_v27 = vadd.f32 %v3417_v37, %v7502_v20 }
 0x37c   : > { %3621 = vst.msk [vmem:[#allocation3 + $0x121] sm:$0xff] %vm3596_vm7, %v3586_v60  ;;  %v5660_v36 = vpop.f32.mrf.mxu0 }
 0x37d   : > { %vm3512_vm6 = vcmp.gt.f32.partialorder %v3478_v27, 0.0  ;;  %v3553_v21 = vmul.f32 %v7531_v53, %v3478_v27  ;;  %v3694_v36 = vld [vmem:[#allocation3 + $0x1] ss:$2 sm:$0xff] }
 0x37e   : > { %v3422_v18 = vpop.f32.mrf.mxu0 }
 0x37f   : > { %v3587_v39 = vsel %vm3512_vm6, %v3478_v27, %v3553_v21  ;;  %v3479_v58 = vadd.f32 %v3422_v18, %v7505_v63  ;;  %v4070_v31 = vld [vmem:[#allocation3 + $0x10a] ss:$2 sm:$0xff]  ;;  %v3696_v21 = vld [vmem:[#allocation3 + $0x31] ss:$2 sm:$0xff] }
 0x380   : > { %3622 = vst.msk [vmem:[#allocation3 + $0x129] sm:$0xff] %vm3596_vm7, %v3587_v39  ;;  %v5663_v51 = vpop.f32.mrf.mxu0  ;;  %v4079_v37 = vpack.c.bf16 %v4070_v31, %v4068_v22  ;;  %v4066_v18 = vld [vmem:[#allocation3 + $0xaa] ss:$2 sm:$0xff]  ;;  %v4064_v39 = vld [vmem:[#allocation3 + $0x7a] ss:$2 sm:$0xff] }
 0x381   : > { %vm3513_vm8 = vcmp.gt.f32.partialorder %v3479_v58, 0.0  ;;  %v3554_v43 = vmul.f32 %v7531_v53, %v3479_v58  ;;  %v4078_v51 = vpack.c.bf16 %v4066_v18, %v4064_v39  ;;  %v3832_v22 = vld [vmem:[#allocation3 + $0x92] ss:$2 sm:$0xff] }
 0x382   : > { %v3425_v13 = vpop.f32.mrf.mxu0  ;;  %v4091_v27 = vsel %vm3596_vm7, %v4079_v37, 0  ;;  %v3830_v37 = vld [vmem:[#allocation3 + $0x62] ss:$2 sm:$0xff]  ;;  %v3828_v18 = vld [vmem:[#allocation3 + $0x32] ss:$2 sm:$0xff] }
 0x383   : > { %v3588_v12 = vsel %vm3513_vm8, %v3479_v58, %v3554_v43  ;;  %v3480_v20 = vadd.f32 %v3425_v13, %v7508_v59  ;;  %v3711_v58 = vpack.c.bf16 %v3696_v21, %v3694_v36  ;;  %v4088_v13 = vsel %vm3596_vm7, %v4078_v51, 0  ;;  %v3826_v21 = vld [vmem:[#allocation3 + $0x2] ss:$2 sm:$0xff] }
 0x384   : > { %3623 = vst.msk [vmem:[#allocation3 + $0x139] sm:$0xff] %vm3596_vm7, %v3588_v12  ;;  %v5664_v26 = vpop.f32.mrf.mxu0  ;;  %v5860_v39 = vld [vmem:[%s7686_s17 + $0x8] sm:$0xff]  }
 0x385   : > { %vm3514_vm9 = vcmp.gt.f32.partialorder %v3480_v20, 0.0  ;;  %v3555_v25 = vmul.f32 %v7531_v53, %v3480_v20  ;;  %v3719_v43 = vsel %vm3596_vm7, %v3711_v58, 0  ;;  %v3843_v58 = vpack.c.bf16 %v3828_v18, %v3826_v21 }
 0x386   : > { %v3430_v7 = vpop.f32.mrf.mxu0  ;;  %v4421_v51 = vsel %vm651_vm2, %v5860_v39, 0 }
 0x387   : > { %v3589_v40 = vsel %vm3514_vm9, %v3480_v20, %v3555_v25  ;;  %v3481_v63 = vadd.f32 %v3430_v7, %v7511_v62  ;;  %v3706_v48 = vld [vmem:[#allocation3 + $0x121] ss:$2 sm:$0xff]  ;;  %v4062_v20 = vld [vmem:[#allocation3 + $0x4a] ss:$2 sm:$0xff]  ;;  %v4060_v25 = vld [vmem:[#allocation3 + $0x1a] ss:$2 sm:$0xff] }
 0x388   : > { %3624 = vst.msk [vmem:[#allocation3 + $0x141] sm:$0xff] %vm3596_vm7, %v3589_v40  ;;  %v5667_v38 = vpop.f32.mrf.mxu0  ;;  %v3685_v26 = vld [vmem:[#allocation3 + $0x120] ss:$2 sm:$0xff]  ;;  %v4077_v40 = vpack.c.bf16 %v4062_v20, %v4060_v25  ;;  %v5861_v20 = vld [vmem:[%s7686_s17] sm:$0xff]  }
 0x389   : > { %vm3515_vm10 = vcmp.gt.f32.partialorder %v3481_v63, 0.0  ;;  %v3556_v6 = vmul.f32 %v7531_v53, %v3481_v63  ;;  %v4811_v25 = vld [vmem:[%s7840_s5 + $0x8] sm:$0xf] }
 0x38a   : > { %v3433_v28 = vpop.f32.mrf.mxu0 }
 0x38b   : > { %v3590_v10 = vsel %vm3515_vm10, %v3481_v63, %v3556_v6  ;;  %v3482_v59 = vadd.f32 %v3433_v28, %v7514_v0  ;;  %v4808_v63 = vld [vmem:[%s7840_s5 + $0x4] sm:$0xf]  ;;  %v4085_v6 = vsel %vm3596_vm7, %v4077_v40, 0 }
 0x38c   : > { %3625 = vst.msk [vmem:[#allocation3 + $0x151] sm:$0xff] %vm3596_vm7, %v3590_v10  ;;  %v5668_v24 = vpop.f32.mrf.mxu0  ;;  %v3683_v28 = vld [vmem:[#allocation3 + $0xf0] ss:$2 sm:$0xff] }
 0x38d   : > { %vm3516_vm11 = vcmp.gt.f32.partialorder %v3482_v59, 0.0  ;;  %v3557_v4 = vmul.f32 %v7531_v53, %v3482_v59 }
 0x38e   : > { %v3438_v19 = vpop.f32.mrf.mxu0 }
 0x38f   : > { %v3591_v16 = vsel %vm3516_vm11, %v3482_v59, %v3557_v4  ;;  %v3483_v62 = vadd.f32 %v3438_v19, %v7517_v32  ;;  %v4072_v47 = vld [vmem:[#allocation3 + $0x13a] ss:$2 sm:$0xff] }
 0x390   : > { %3626 = vst.msk [vmem:[#allocation3 + $0x159] sm:$0xff] %vm3596_vm7, %v3591_v16  ;;  %v5671_v46 = vpop.f32.mrf.mxu0  ;;  %v3681_v59 = vld [vmem:[#allocation3 + $0xc0] ss:$2 sm:$0xff] }
 0x391   : > { %vm3517_vm12 = vcmp.gt.f32.partialorder %v3483_v62, 0.0  ;;  %v3558_v52 = vmul.f32 %v7531_v53, %v3483_v62  ;;  %v3691_v4 = vpack.c.bf16 %v3683_v28, %v3681_v59  ;;  %v4817_v16 = vld [vmem:[%s7840_s5 + $0x14] sm:$0xf]  ;;  %v3912_v28 = vld [vmem:[#allocation3 + $0xd8] ss:$2 sm:$0xff] }
 0x392   : > { %v3441_v14 = vpop.f32.mrf.mxu0 }
 0x393   : > { %v3592_v23 = vsel %vm3517_vm12, %v3483_v62, %v3558_v52  ;;  %v3484_v0 = vadd.f32 %v3441_v14, %v7520_v34  ;;  %v3780_v62 = vsel %vm3596_vm7, %v3691_v4, 0  ;;  %v3679_v52 = vld [vmem:[#allocation3 + $0x90] ss:$2 sm:$0xff]  ;;  %v4226_v14 = vld [vmem:[#allocation3 + $0x121] ss:$2 sm:$0xff] }
 0x394   : > { %3627 = vst.msk [vmem:[#allocation3 + $0x169] sm:$0xff] %vm3596_vm7, %v3592_v23  ;;  %v5672_v15 = vpop.f32.mrf.mxu0  ;;  %v3677_v23 = vld [vmem:[#allocation3 + $0x60] ss:$2 sm:$0xff]  ;;  %v4476_v4 = vld [vmem:[%s7846_s11] sm:$0xff] }
 0x395   : > { %vm3518_vm13 = vcmp.gt.f32.partialorder %v3484_v0, 0.0  ;;  %v3559_v41 = vmul.f32 %v7531_v53, %v3484_v0  ;;  %v3690_v15 = vpack.c.bf16 %v3679_v52, %v3677_v23  ;;  %v3906_v23 = vld [vmem:[#allocation3 + $0x48] ss:$2 sm:$0xff] }
 0x396   : > { %v3446_v2 = vpop.f32.mrf.mxu0 }
 0x397   : > { %v3593_v54 = vsel %vm3518_vm13, %v3484_v0, %v3559_v41  ;;  %v3485_v32 = vadd.f32 %v3446_v2, %v7523_v49  ;;  %v3708_v35 = vld [vmem:[#allocation3 + $0x151] ss:$2 sm:$0xff]  ;;  %v3687_v12 = vld [vmem:[#allocation3 + $0x150] ss:$2 sm:$0xff]  ;;  %v3777_v2 = vsel %vm3596_vm7, %v3690_v15, 0 }
 0x398   : > { %3628 = vst.msk [vmem:[#allocation3 + $0x171] sm:$0xff] %vm3596_vm7, %v3593_v54  ;;  %v5675_v45 = vpop.f32.mrf.mxu0  ;;  %v3714_v3 = vpack.c.bf16 %v3708_v35, %v3706_v48  ;;  %v3692_v7 = vpack.c.bf16 %v3687_v12, %v3685_v26  ;;  %v4228_v24 = vld [vmem:[#allocation3 + $0x151] ss:$2 sm:$0xff]  ;;  %v3675_v48 = vld [vmem:[#allocation3 + $0x30] ss:$2 sm:$0xff] }
 0x399   : > { %vm3519_vm14 = vcmp.gt.f32.partialorder %v3485_v32, 0.0  ;;  %v3560_v61 = vmul.f32 %v7531_v53, %v3485_v32  ;;  %v4224_v0 = vld [vmem:[#allocation3 + $0xf1] ss:$2 sm:$0xff]  ;;  %v4222_v35 = vld [vmem:[#allocation3 + $0xc1] ss:$2 sm:$0xff] }
 0x39a   : > { %v3449_v34 = vpop.f32.mrf.mxu0  ;;  %v3728_v29 = vsel %vm3596_vm7, %v3714_v3, 0  ;;  %v3783_v38 = vsel %vm3596_vm7, %v3692_v7, 0  ;;  %v4235_v41 = vpack.c.bf16 %v4226_v14, %v4224_v0  ;;  %v4220_v45 = vld [vmem:[#allocation3 + $0x91] ss:$2 sm:$0xff]  ;;  %v3916_v12 = vld [vmem:[#allocation3 + $0x138] ss:$2 sm:$0xff] }
 0x39b   : > { %v3594_v50 = vsel %vm3519_vm14, %v3485_v32, %v3560_v61  ;;  %v3486_v30 = vadd.f32 %v3449_v34, %v7526_v11  ;;  %5678 = vmatpush3.bf16.xpose.msra.mxu1 %v3728_v29  ;;  %v3725_v11 = vsel %vm3596_vm7, %v3713_v8, 0  ;;  %v3673_v32 = vld [vmem:[#allocation3] ss:$2 sm:$0xff]  ;;  %v4234_v61 = vpack.c.bf16 %v4222_v35, %v4220_v45  ;;  %v3688_v8 = vld [vmem:[%s7840_s5] sm:$0xf] }
 0x39c   : > { %3629 = vst.msk [vmem:[#allocation3 + $0x181] sm:$0xff] %vm3596_vm7, %v3594_v50  ;;  %5679 = vmatprep.subr.bf16.mxu1 %v7868_v55  ;;  %v5676_v49 = vpop.f32.mrf.mxu0  ;;  %v4247_v54 = vsel %vm3596_vm7, %v4235_v41, 0  ;;  %v3689_v3 = vpack.c.bf16 %v3675_v48, %v3673_v32  ;;  %v3840_v50 = vld [vmem:[#allocation3 + $0x152] ss:$2 sm:$0xff]  ;;  %v4418_v7 = vsel %vm651_vm2, %v5861_v20, 0 }
 0x39d   : > { %vm3520_vm15 = vcmp.gt.f32.partialorder %v3486_v30, 0.0  ;;  %v3561_v57 = vmul.f32 %v7531_v53, %v3486_v30  ;;  %v3698_v53 = vld [vmem:[#allocation3 + $0x61] ss:$2 sm:$0xff]  ;;  %v4244_v29 = vsel %vm3596_vm7, %v4234_v61, 0  ;;  %v3838_v49 = vld [vmem:[#allocation3 + $0x122] ss:$2 sm:$0xff] }
 0x39e   : > { %v3712_v17 = vpack.c.bf16 %v3700_v5, %v3698_v53  ;;  %v3774_v34 = vsel %vm3596_vm7, %v3689_v3, 0  ;;  %v4821_v5 = vld [vmem:[%s7840_s5 + $0x1c] sm:$0xf]  ;;  %v3904_v0 = vld [vmem:[#allocation3 + $0x18] ss:$2 sm:$0xff] }
 0x39f   : > { %v3595_v33 = vsel %vm3520_vm15, %v3486_v30, %v3561_v57  ;;  %v4074_v44 = vld [vmem:[#allocation3 + $0x16a] ss:$2 sm:$0xff]  ;;  %v4218_v30 = vld [vmem:[#allocation3 + $0x61] ss:$2 sm:$0xff]  ;;  %v3846_v57 = vpack.c.bf16 %v3840_v50, %v3838_v49  ;;  %v3921_v15 = vpack.c.bf16 %v3906_v23, %v3904_v0 }
 0x3a0   : > { %3630 = vst.msk [vmem:[#allocation3 + $0x189] sm:$0xff] %vm3596_vm7, %v3595_v33  ;;  %v4080_v56 = vpack.c.bf16 %v4074_v44, %v4072_v47  ;;  %v3722_v60 = vsel %vm3596_vm7, %v3712_v17, 0  ;;  %v4233_v1 = vpack.c.bf16 %v4218_v30, %v4216_v42  ;;  %v3836_v44 = vld [vmem:[#allocation3 + $0xf2] ss:$2 sm:$0xff]  ;;  %v5859_v17 = vld [vmem:[%s7686_s17 + $0x10] sm:$0xff]  }
 0x3a1   : > { %v3860_v33 = vsel %vm3596_vm7, %v3846_v57, 0  ;;  %v3929_v41 = vsel %vm3596_vm7, %v3921_v15, 0  ;;  %v4813_v48 = vld [vmem:[%s7840_s5 + $0xc] sm:$0xf]  ;;  %v3992_v45 = vld [vmem:[#allocation3 + $0x109] ss:$2 sm:$0xff] }
 0x3a2   : > { %v4094_v9 = vsel %vm3596_vm7, %v4080_v56, 0  ;;  %v4241_v47 = vsel %vm3596_vm7, %v4233_v1, 0  ;;  %v5858_v56 = vld [vmem:[%s7686_s17 + $0x18] sm:$0xff]   ;;  %v3990_v3 = vld [vmem:[#allocation3 + $0xd9] ss:$2 sm:$0xff]  ;;  %s4831_s17 = sshll.u32 %s5932_s24, 7 }
 0x3a3   : > { %5680 = vmatpush3.bf16.xpose.msra.mxu1 %v3725_v11  ;;  %5738 = vmatpush3.bf16.xpose.msra.mxu0 %v4094_v9  ;;  %v3834_v11 = vld [vmem:[#allocation3 + $0xc2] ss:$2 sm:$0xff]  ;;  %v4427_v31 = vsel %vm651_vm2, %v5858_v56, 0  ;;  %v4001_v61 = vpack.c.bf16 %v3992_v45, %v3990_v3  ;;  %v3986_v50 = vld [vmem:[#allocation3 + $0x79] ss:$2 sm:$0xff]  ;;  %s4499_s28 = scalar_lea.hbm %s7847_s12, %s4831_s17  ;;  %s5945_s24 = smov [#allocation4]  }
 0x3a4   : > { %5681 = vmatprep.subr.bf16.mxu1 %v7868_v55  ;;  %5739 = vmatprep.subr.bf16.mxu0 %v7868_v55  ;;  %v3845_v9 = vpack.c.bf16 %v3836_v44, %v3834_v11  ;;  %v3984_v49 = vld [vmem:[#allocation3 + $0x49] ss:$2 sm:$0xff]  ;;  %v3982_v57 = vld [vmem:[#allocation3 + $0x19] ss:$2 sm:$0xff]  ;;  %v4302_v20 = vld [vmem:[#allocation3 + $0xf2] ss:$2 sm:$0xff] }
 0x3a5   : > { %v3999_v1 = vpack.c.bf16 %v3984_v49, %v3982_v57  ;;  %v4815_v56 = vld [vmem:[%s7840_s5 + $0x10] sm:$0xf]  ;;  %s5868_s14 = sshll.u32 %s5945_s24, 4  ;;  %s5869_s14 = int_to_ptr.vmem [resolvable:$false] %s5868_s14 }
 0x3a6   : > { %v3857_v53 = vsel %vm3596_vm7, %v3845_v9, 0  ;;  %v4148_v9 = vld [vmem:[#allocation3 + $0x120] ss:$2 sm:$0xff]  ;;  %s5870_s1 = scalar_lea.vmem %s5869_s14, 256  ;;  %p5871_p1 = scmp.lt.s32.totalorder %s4502_s20, %s5869_s14 }
 0x3a7   : > { %v4230_v10 = vld [vmem:[#allocation3 + $0x181] ss:$2 sm:$0xff]  ;;  %v4308_v39 = vld [vmem:[#allocation3 + $0x182] ss:$2 sm:$0xff]  ;;  %p5872_p2 = scmp.lt.s32.totalorder %s5870_s1, %s5864_s0 }
 0x3a8   : > { %v4236_v19 = vpack.c.bf16 %v4230_v10, %v4228_v24  ;;  %v5944_v10 = vmov 0   ;;  %v4469_v24 = vld [vmem:[%s7845_s10] sm:$0xff] }
 0x3a9   : > { %5856 = vset.pattern.permute.xlu0 %v5944_v10  ;;  %5857 = vset.pattern.permute.xlu1 %v5944_v10  ;;  %p5873_p3 = por %p5872_p2, %p5871_p1 }
 0x3aa   : > { %v4250_v46 = vsel %vm3596_vm7, %v4236_v19, 0  ;;  %v4393_v19 = vld [vmem:[%s7844_s9] sm:$0xf] }
 0x3ab   : > { %5682 = vmatpush3.bf16.xpose.msra.mxu1 %v3722_v60  ;;  %5740 = vmatpush3.bf16.xpose.msra.mxu0 %v4091_v27  ;;  %v3844_v60 = vpack.c.bf16 %v3832_v22, %v3830_v37  ;;  %v4424_v27 = vsel %vm651_vm2, %v5859_v17, 0  ;;  %v4144_v22 = vld [vmem:[#allocation3 + $0xc0] ss:$2 sm:$0xff]  ;;  %v4142_v17 = vld [vmem:[#allocation3 + $0x90] ss:$2 sm:$0xff]  ;;  %p5874_p5 = pnand %p5873_p3, %p5867_p0 }
 0x3ac   : > { %5683 = vmatprep.subr.bf16.mxu1 %v7868_v55  ;;  %5741 = vmatprep.subr.bf16.mxu0 %v7868_v55  ;;  %v4156_v37 = vpack.c.bf16 %v4144_v22, %v4142_v17 }
 0x3ad   : > { %v3854_v36 = vsel %vm3596_vm7, %v3844_v60, 0 }
 0x3ae   : > { %v4166_v60 = vsel %vm3596_vm7, %v4156_v37, 0 }
 0x3b3   : > { %5684 = vmatpush3.bf16.xpose.msra.mxu1 %v3719_v43  ;;  %5742 = vmatpush3.bf16.xpose.msra.mxu0 %v4088_v13  ;;  %v3851_v43 = vsel %vm3596_vm7, %v3843_v58, 0  ;;  %v3918_v13 = vld [vmem:[#allocation3 + $0x168] ss:$2 sm:$0xff] }
 0x3b4   : > { %5689 = vmatprep.subr.bf16.mxu1 %v7868_v55  ;;  %5743 = vmatprep.subr.bf16.mxu0 %v7868_v55  ;;  %v3924_v26 = vpack.c.bf16 %v3918_v13, %v3916_v12  ;;  %v4306_v58 = vld [vmem:[#allocation3 + $0x152] ss:$2 sm:$0xff]  ;;  %v4304_v12 = vld [vmem:[#allocation3 + $0x122] ss:$2 sm:$0xff] }
 0x3b6   : > { %v3938_v40 = vsel %vm3596_vm7, %v3924_v26, 0  ;;  %v4313_v26 = vpack.c.bf16 %v4304_v12, %v4302_v20 }
 0x3ba   : > { %5686 = vmatmul.mubr.msk.bf16.vlgmr.msra.gmra.mxu1 %vm3596_vm7, %v4808_v63  ;;  %v3914_v63 = vld [vmem:[#allocation3 + $0x108] ss:$2 sm:$0xff] }
 0x3bb   : > { %5690 = vmatpush3.bf16.xpose.msra.mxu1 %v3783_v38  ;;  %5744 = vmatpush3.bf16.xpose.msra.mxu0 %v4085_v6  ;;  %v4371_v38 = vld [vmem:[%s7841_s6] sm:$0xff]  ;;  %v3923_v59 = vpack.c.bf16 %v3914_v63, %v3912_v28 }
 0x3bc   : > { %5691 = vmatprep.subr.bf16.mxu1 %v7868_v55  ;;  %5761 = vmatprep.subr.bf16.mxu0 %v7868_v55  ;;  %v4378_v6 = vld [vmem:[%s7842_s7] sm:$0xff] }
 0x3bd   : > { %5697 = vmatprep.mubr.msk.bf16.mxu1 %vm5943_vm1, %v7868_v55  ;;  %4374 = vperm.xlu0 %5856, %v4371_v38   ;;  %v4294_v28 = vld [vmem:[#allocation3 + $0x32] ss:$2 sm:$0xff] }
 0x3be   : > { %4381 = vperm.xlu1 %5857, %v4378_v6   ;;  %v4296_v6 = vld [vmem:[#allocation3 + $0x62] ss:$2 sm:$0xff] }
 0x3bf   : > { %v4311_v10 = vpack.c.bf16 %v4296_v6, %v4294_v28 }
 0x3c1   : > { %4472 = vperm.xlu0 %5856, %v4469_v24   ;;  %v4823_v24 = vld [vmem:[%s7840_s5 + $0x20] sm:$0xf] }
 0x3c2   : > { %5746 = vmatmul.mubr.msk.bf16.vlgmr.msra.gmra.mxu0 %vm3596_vm7, %v4817_v16  ;;  %v3935_v16 = vsel %vm3596_vm7, %v3923_v59, 0  ;;  %4479 = vperm.xlu1 %5857, %v4476_v4   ;;  %v4319_v59 = vsel %vm3596_vm7, %v4311_v10, 0 }
 0x3c3   : > { %5692 = vmatpush3.bf16.xpose.msra.mxu1 %v3780_v62  ;;  %5762 = vmatpush3.bf16.xpose.msra.mxu0 %v4250_v46  ;;  %v3910_v62 = vld [vmem:[#allocation3 + $0xa8] ss:$2 sm:$0xff]  ;;  %v3908_v46 = vld [vmem:[#allocation3 + $0x78] ss:$2 sm:$0xff] }
 0x3c4   : > { %5693 = vmatprep.subr.bf16.mxu1 %v7868_v55  ;;  %5763 = vmatprep.subr.bf16.mxu0 %v7868_v55  ;;  %v3922_v52 = vpack.c.bf16 %v3910_v62, %v3908_v46 }
 0x3c5   : > { %5769 = vmatprep.mubr.msk.bf16.mxu0 %vm5943_vm1, %v7868_v55 }
 0x3c6   : > { %v3932_v14 = vsel %vm3596_vm7, %v3922_v52, 0 }
 0x3cb   : > { %5694 = vmatpush3.bf16.xpose.msra.mxu1 %v3777_v2  ;;  %5764 = vmatpush3.bf16.xpose.msra.mxu0 %v4247_v54  ;;  %v3996_v2 = vld [vmem:[#allocation3 + $0x169] ss:$2 sm:$0xff]  ;;  %v3994_v54 = vld [vmem:[#allocation3 + $0x139] ss:$2 sm:$0xff] }
 0x3cc   : > { %5695 = vmatprep.subr.bf16.mxu1 %v7868_v55  ;;  %5765 = vmatprep.subr.bf16.mxu0 %v7868_v55  ;;  %v4002_v32 = vpack.c.bf16 %v3996_v2, %v3994_v54 }
 0x3ce   : > { %v4016_v35 = vsel %vm3596_vm7, %v4002_v32, 0 }
 0x3d3   : > { %5696 = vmatpush3.bf16.xpose.msra.mxu1 %v3774_v34  ;;  %5766 = vmatpush3.bf16.xpose.msra.mxu0 %v4244_v29  ;;  %v4013_v34 = vsel %vm3596_vm7, %v4001_v61, 0  ;;  %v3988_v29 = vld [vmem:[#allocation3 + $0xa9] ss:$2 sm:$0xff] }
 0x3d4   : > { %5701 = vmatprep.subr.bf16.mxu1 %v7868_v55  ;;  %5767 = vmatprep.subr.bf16.mxu0 %v7868_v55  ;;  %v4000_v30 = vpack.c.bf16 %v3988_v29, %v3986_v50 }
 0x3d6   : > { %v4010_v42 = vsel %vm3596_vm7, %v4000_v30, 0 }
 0x3da   : > { %5698 = vmatmul.mubr.msk.bf16.vlgmr.msra.gmra.mxu1 %vm3596_vm7, %v3688_v8  ;;  %v4007_v8 = vsel %vm3596_vm7, %v3999_v1, 0 }
 0x3db   : > { %5702 = vmatpush3.bf16.xpose.msra.mxu1 %v3860_v33  ;;  %5768 = vmatpush3.bf16.xpose.msra.mxu0 %v4241_v47  ;;  %v4152_v33 = vld [vmem:[#allocation3 + $0x180] ss:$2 sm:$0xff]  ;;  %v4150_v47 = vld [vmem:[#allocation3 + $0x150] ss:$2 sm:$0xff] }
 0x3dc   : > { %5703 = vmatprep.subr.bf16.mxu1 %v7868_v55  ;;  %5709 = vmatprep.mubr.msk.bf16.mxu1 %vm5943_vm1, %v7868_v55  ;;  %v4158_v44 = vpack.c.bf16 %v4152_v33, %v4150_v47 }
 0x3dd   : > { %5785 = vmatprep.subr.bf16.mxu0 %v7868_v55 }
 0x3de   : > { %v4172_v11 = vsel %vm3596_vm7, %v4158_v44, 0 }
 0x3e2   : > { %5770 = vmatmul.mubr.msk.bf16.vlgmr.msra.gmra.mxu0 %vm3596_vm7, %v4821_v5  ;;  %v4146_v5 = vld [vmem:[#allocation3 + $0xf0] ss:$2 sm:$0xff] }
 0x3e3   : > { %5704 = vmatpush3.bf16.xpose.msra.mxu1 %v3857_v53  ;;  %5786 = vmatpush3.bf16.xpose.msra.mxu0 %v4427_v31  ;;  %v4157_v31 = vpack.c.bf16 %v4148_v9, %v4146_v5 }
 0x3e4   : > { %5705 = vmatprep.subr.bf16.mxu1 %v7868_v55  ;;  %5787 = vmatprep.subr.bf16.mxu0 %v7868_v55 }
 0x3e5   : > { %5793 = vmatprep.mubr.msk.bf16.mxu0 %vm5943_vm1, %v7868_v55  ;;  %v4169_v53 = vsel %vm3596_vm7, %v4157_v31, 0 }
 0x3eb   : > { %5706 = vmatpush3.bf16.xpose.msra.mxu1 %v3854_v36  ;;  %5788 = vmatpush3.bf16.xpose.msra.mxu0 %v4424_v27  ;;  %v4140_v27 = vld [vmem:[#allocation3 + $0x60] ss:$2 sm:$0xff]  ;;  %v4138_v36 = vld [vmem:[#allocation3 + $0x30] ss:$2 sm:$0xff] }
 0x3ec   : > { %5707 = vmatprep.subr.bf16.mxu1 %v7868_v55  ;;  %5789 = vmatprep.subr.bf16.mxu0 %v7868_v55  ;;  %v4155_v21 = vpack.c.bf16 %v4140_v27, %v4138_v36 }
 0x3ee   : > { %v4163_v18 = vsel %vm3596_vm7, %v4155_v21, 0 }
 0x3f3   : > { %5708 = vmatpush3.bf16.xpose.msra.mxu1 %v3851_v43  ;;  %5790 = vmatpush3.bf16.xpose.msra.mxu0 %v4421_v51  ;;  %v4314_v51 = vpack.c.bf16 %v4308_v39, %v4306_v58  ;;  %v4819_v43 = vld [vmem:[%s7840_s5 + $0x18] sm:$0xf] }
 0x3f4   : > { %5713 = vmatprep.subr.bf16.mxu1 %v7868_v55  ;;  %5791 = vmatprep.subr.bf16.mxu0 %v7868_v55 }
 0x3f5   : > { %v4328_v13 = vsel %vm3596_vm7, %v4314_v51, 0 }
 0x3fa   : > { %5710 = vmatmul.mubr.msk.bf16.vlgmr.msra.gmra.mxu1 %vm3596_vm7, %v4811_v25  ;;  %v4325_v25 = vsel %vm3596_vm7, %v4313_v26, 0 }
 0x3fb   : > { %5714 = vmatpush3.bf16.xpose.msra.mxu1 %v3938_v40  ;;  %5721 = vmatprep.mubr.msk.bf16.mxu1 %vm5943_vm1, %v7868_v55  ;;  %v4298_v40 = vld [vmem:[#allocation3 + $0x92] ss:$2 sm:$0xff] }
 0x3fc   : > { %5715 = vmatprep.subr.bf16.mxu1 %v7868_v55  ;;  %5792 = vmatpush3.bf16.xpose.msra.mxu0 %v4418_v7  ;;  %v4300_v7 = vld [vmem:[#allocation3 + $0xc2] ss:$2 sm:$0xff] }
 0x3fd   : > { %v4312_v63 = vpack.c.bf16 %v4300_v7, %v4298_v40 }
 0x3ff   : > { %v4322_v38 = vsel %vm3596_vm7, %v4312_v63, 0 }
 0x403   : > { %5716 = vmatpush3.bf16.xpose.msra.mxu1 %v3935_v16  ;;  %5794 = vmatmul.mubr.msk.bf16.vlgmr.msra.gmra.mxu0 %vm651_vm2, %v4393_v19 }
 0x404   : > { %5717 = vmatprep.subr.bf16.mxu1 %v7868_v55 }
 0x40b   : > { %5718 = vmatpush3.bf16.xpose.msra.mxu1 %v3932_v14 }
 0x40c   : > { %5719 = vmatprep.subr.bf16.mxu1 %v7868_v55 }
 0x413   : > { %5720 = vmatpush3.bf16.xpose.msra.mxu1 %v3929_v41 }
 0x414   : > { %5725 = vmatprep.subr.bf16.mxu1 %v7868_v55 }
 0x41a   : > { %5722 = vmatmul.mubr.msk.bf16.vlgmr.msra.gmra.mxu1 %vm3596_vm7, %v4813_v48 }
 0x41b   : > { %5726 = vmatpush3.bf16.xpose.msra.mxu1 %v4016_v35  ;;  %5733 = vmatprep.mubr.msk.bf16.mxu1 %vm5943_vm1, %v7868_v55 }
 0x41c   : > { %5727 = vmatprep.subr.bf16.mxu1 %v7868_v55 }
 0x423   : > { %5728 = vmatpush3.bf16.xpose.msra.mxu1 %v4013_v34 }
 0x424   : > { %5729 = vmatprep.subr.bf16.mxu1 %v7868_v55 }
 0x42b   : > { %5730 = vmatpush3.bf16.xpose.msra.mxu1 %v4010_v42 }
 0x42c   : > { %5731 = vmatprep.subr.bf16.mxu1 %v7868_v55 }
 0x433   : > { %5732 = vmatpush3.bf16.xpose.msra.mxu1 %v4007_v8 }
 0x434   : > { %5749 = vmatprep.subr.bf16.mxu1 %v7868_v55 }
 0x438   : > { %v4375_v37 = vpop.permute.xlu0 %4374 }
 0x439   : > { %v4382_v36 = vpop.permute.xlu1 %4381 }
 0x43a   : > { %5734 = vmatmul.mubr.msk.bf16.vlgmr.msra.gmra.mxu1 %vm3596_vm7, %v4815_v56 }
 0x43b   : > { %5750 = vmatpush3.bf16.xpose.msra.mxu1 %v4172_v11  ;;  %5757 = vmatprep.mubr.msk.bf16.mxu1 %vm5943_vm1, %v7868_v55 }
 0x43c   : > { %5751 = vmatprep.subr.bf16.mxu1 %v7868_v55  ;;  %v4473_v21 = vpop.permute.xlu0 %4472 }
 0x443   : > { %5752 = vmatpush3.bf16.xpose.msra.mxu1 %v4169_v53 }
 0x444   : > { %5753 = vmatprep.subr.bf16.mxu1 %v7868_v55 }
 0x44b   : > { %5754 = vmatpush3.bf16.xpose.msra.mxu1 %v4166_v60 }
 0x44c   : > { %5755 = vmatprep.subr.bf16.mxu1 %v7868_v55 }
 0x453   : > { %5756 = vmatpush3.bf16.xpose.msra.mxu1 %v4163_v18 }
 0x454   : > { %5773 = vmatprep.subr.bf16.mxu1 %v7868_v55 }
 0x45a   : > { %5758 = vmatmul.mubr.msk.bf16.vlgmr.msra.gmra.mxu1 %vm3596_vm7, %v4819_v43  ;;  %v4480_v43 = vpop.permute.xlu1 %4479 }
 0x45b   : > { %5774 = vmatpush3.bf16.xpose.msra.mxu1 %v4328_v13  ;;  %5781 = vmatprep.mubr.msk.bf16.mxu1 %vm5943_vm1, %v7868_v55  ;;  %vm4484_vm1 = vcmask 523264  }
 0x45c   : > { %5775 = vmatprep.subr.bf16.mxu1 %v7868_v55 }
 0x463   : > { %5776 = vmatpush3.bf16.xpose.msra.mxu1 %v4325_v25 }
 0x464   : > { %5777 = vmatprep.subr.bf16.mxu1 %v7868_v55 }
 0x46b   : > { %5778 = vmatpush3.bf16.xpose.msra.mxu1 %v4322_v38 }
 0x46c   : > { %5779 = vmatprep.subr.bf16.mxu1 %v7868_v55 }
 0x473   : > { %5780 = vmatpush3.bf16.xpose.msra.mxu1 %v4319_v59 }
 0x47a   : > { %5782 = vmatmul.mubr.msk.bf16.vlgmr.msra.gmra.mxu1 %vm3596_vm7, %v4823_v24  ;;  %v3764_v4 = vpop.f32.mrf.mxu1 }
 0x47c   : > { %v5687_v19 = vpop.f32.mrf.mxu1 }
 0x47e   : > { %v3767_v16 = vpop.f32.mrf.mxu1 }
 0x480   : > { %v5688_v62 = vpop.f32.mrf.mxu1 }
 0x482   : > { %v4130_v46 = vpop.f32.mrf.mxu0 }
 0x484   : > { %v5747_v52 = vpop.f32.mrf.mxu0 }
 0x486   : > { %v4133_v14 = vpop.f32.mrf.mxu0 }
 0x488   : > { %v5748_v23 = vpop.f32.mrf.mxu0 }
 0x49a   : > { %v3819_v55 = vpop.f32.mrf.mxu1 }
 0x49b   : > { %v3820_v0 = vadd.f32 %v3819_v55, %v3764_v4 }
 0x49c   : > { %v5699_v15 = vpop.f32.mrf.mxu1 }
 0x49e   : > { %v3822_v41 = vpop.f32.mrf.mxu1 }
 0x4a0   : > { %v5700_v2 = vpop.f32.mrf.mxu1 }
 0x4a2   : > { %v4286_v54 = vpop.f32.mrf.mxu0 }
 0x4a4   : > { %v5771_v32 = vpop.f32.mrf.mxu0 }
 0x4a6   : > { %v4289_v48 = vpop.f32.mrf.mxu0 }
 0x4a8   : > { %v5772_v35 = vpop.f32.mrf.mxu0 }
 0x4ba   : > { %v3896_v45 = vpop.f32.mrf.mxu1 }
 0x4bb   : > { %v3902_v3 = vadd.f32 %v3896_v45, %v3820_v0 }
 0x4bc   : > { %v5711_v61 = vpop.f32.mrf.mxu1 }
 0x4be   : > { %v3899_v34 = vpop.f32.mrf.mxu1 }
 0x4c0   : > { %v5712_v29 = vpop.f32.mrf.mxu1 }
 0x4c3   : > { %v4463_v50 = vpop.f32.mrf.mxu0 }
 0x4c4   : > { %v4475_v51 = vmul.f32 %v4473_v21, %v4463_v50 }
 0x4c5   : > { %v5795_v30 = vpop.f32.mrf.mxu0 }
 0x4c6   : > { %v4482_v25 = vadd.f32 %v4480_v43, %v4475_v51 }
 0x4c7   : > { %v4466_v42 = vpop.f32.mrf.mxu0 }
 0x4c9   : > { %v5796_v49 = vpop.f32.mrf.mxu0 }
 0x4da   : > { %v3974_v57 = vpop.f32.mrf.mxu1 }
 0x4db   : > { %v3980_v1 = vadd.f32 %v3974_v57, %v3902_v3 }
 0x4dc   : > { %v5723_v8 = vpop.f32.mrf.mxu1 }
 0x4de   : > { %v3977_v33 = vpop.f32.mrf.mxu1 }
 0x4e0   : > { %v5724_v47 = vpop.f32.mrf.mxu1 }
 0x4fa   : > { %v4052_v44 = vpop.f32.mrf.mxu1 }
 0x4fb   : > { %v4058_v17 = vadd.f32 %v4052_v44, %v3980_v1 }
 0x4fc   : > { %v5735_v56 = vpop.f32.mrf.mxu1 }
 0x4fd   : > { %v4136_v60 = vadd.f32 %v4130_v46, %v4058_v17 }
 0x4fe   : > { %v4055_v11 = vpop.f32.mrf.mxu1 }
 0x500   : > { %v5736_v9 = vpop.f32.mrf.mxu1 }
 0x51a   : > { %v4208_v5 = vpop.f32.mrf.mxu1 }
 0x51b   : > { %v4214_v27 = vadd.f32 %v4208_v5, %v4136_v60 }
 0x51c   : > { %v5759_v31 = vpop.f32.mrf.mxu1 }
 0x51d   : > { %v4292_v18 = vadd.f32 %v4286_v54, %v4214_v27 }
 0x51e   : > { %v4211_v53 = vpop.f32.mrf.mxu1 }
 0x520   : > { %v5760_v22 = vpop.f32.mrf.mxu1 }
 0x53a   : > { %v4364_v39 = vpop.f32.mrf.mxu1 }
 0x53b   : > { %v4370_v58 = vadd.f32 %v4364_v39, %v4292_v18 }
 0x53c   : > { %v5783_v13 = vpop.f32.mrf.mxu1 }
 0x53d   : > { %v4377_v12 = vmul.f32 %v4375_v37, %v4370_v58 }
 0x53e   : > { %v4367_v20 = vpop.f32.mrf.mxu1 }
 0x53f   : > { %v4384_v26 = vadd.f32 %v4382_v36, %v4377_v12 }
 0x540   : > { %v5784_v7 = vpop.f32.mrf.mxu1 }
 0x541   : > { %v4483_v40 = vadd.f32 %v4482_v25, %v4384_v26 }
 0x543   : > { %4485 = vst.msk [vmem:[%s446_s18] sm:$0xff] %vm4484_vm1, %v4483_v40 }
 0x544   : > { %5877 = shalt.err (!%p5874_p5)
}
 0x545   : > { %s5878_s2 = scalar_lea.hbm %s4499_s28, 128  ;;  %s5882_s18 = scalar_lea.hbm %s7847_s12, 256 }
 0x546   : > { %p5879_p6 = scmp.ne.s32.totalorder %s4499_s28, %s5878_s2  ;;  %p5883_p10 = scmp.lt.s32.totalorder %s4499_s28, %s7847_s12 }
 0x547   : > { %p5884_p11 = scmp.lt.s32.totalorder %s5882_s18, %s5878_s2 }
 0x548   : > { %p5880_p7 = pnand %p5879_p6, %p6051_p4 }
 0x549   : > { %p5885_p12 = por %p5884_p11, %p5883_p10 }
 0x54a   : > { %p5881_p9 = pneg %p5880_p7 }
 0x54c   : > { %p5886_p13 = pnand %p5885_p12, %p5881_p9 }
 0x54e   : > { %5889 = shalt.err (!%p5886_p13)
}
 0x54f   : > { %5798 = dma.vmem_to_hbm [thread:$0]  (%p6051_p4), %s4502_s20, 128, %s4499_s28, %s4487_s19  }
 0x550 PF: > { %p5804_p0 = scmp.ge.s32.totalorder %s5940_s26, 2  ;;  %s4513_s0 = sand.u32 1, %s5920_s21  }
 0x551   : > { %s4514_s1 = scalar_lea.sflag [#allocation5], %s4513_s0 }
 0x552   : > { %p5801_p1 = pnand %p5804_p0, %p6058_p8 }
 0x554   : > { %p5802_p2 = pneg %p5801_p1 }
 0x556   : > { %5915 = dma.done.wait (%p5802_p2), %s4514_s1, 128  }
 0x557   : > { %5917 = vsyncadd (%p5802_p2), %s4514_s1, 4294967168  ;;  %s25_s26 = sadd.s32 1, %s5940_s26   ;;  %s7875_s2 = sld [smem:[#allocation7_spill]] }
 0x558   : > { %p22_p3 = scmp.ge.s32.totalorder %s25_s26, 4   ;;  %s7876_s21 = smov %s5924_s22 }
 0x559   : > { %s7877_s22 = smov %s5928_s23  ;;  %s7878_s23 = smov %s6064_s16 }
 0x55a   : > { %s7879_s24 = smov %s5936_s25  ;;  %24 = sbr.rel (!%p22_p3) target bundleno = 8 (0x8), region = 205 }
 0x55d   : > { %s7880_s25 = smov %s7875_s2 }
 0x55f   :  { %4519 = vsyncpa [#allocation5], 1 }
 0x560   :  { %4521 = vsyncpa [#allocation5 + $0x1], 1 }

</bundles_post_ra>
